<compile_context>
chip_gen: v6e
topology: v6e:2x2x1
jax: 0.10.0
libtpu: 0.0.40
codegen_flags: <defaults>
</compile_context>

<pallas_src>
import functools

import numpy as np
import jax
import jax.numpy as jnp
from jax.experimental import pallas as pl
from jax.experimental.pallas import tpu as pltpu


# ---------------------------------------------------------------------------
# Fused kernel (one grid step == one batch element)
# ---------------------------------------------------------------------------
def _fused_up_block_kernel(x_ref, br_ref, t_ref,
                           wup_ref, sup_ref, bup_ref,
                           cropm_ref,
                           wc1u_ref, wc1b_ref, bc1_ref,
                           shift_ref,
                           linw_ref, linb_ref,
                           wc2_ref, bc2_ref,
                           o_ref, *, cu, cout):
    f32 = jnp.float32
    sdt = shift_ref.dtype  # bf16: structural 0/1 matmuls, f32 accumulation

    # ---- ConvTranspose2d(k=2, s=2): channel mix, then sub-pixel scatter ----
    xf = x_ref[0]                                                 # (Cin, H*W)
    u = jnp.dot(wup_ref[...], xf, preferred_element_type=f32)     # (4*Cu, H*W)
    up = None
    for p in range(4):                                            # p = dy*2+dx
        term = jnp.dot(u[p * cu:(p + 1) * cu, :].astype(sdt), sup_ref[p],
                       preferred_element_type=f32)                # (Cu, Hp*Wp)
        up = term if up is None else up + term
    up = up + bup_ref[...]                                        # bias (Cu,1)

    # ---- center_crop(bridge) as a gather matmul ----
    bcrop = jnp.dot(br_ref[0].astype(sdt), cropm_ref[...],
                    preferred_element_type=f32)                   # (Cb, Hp*Wp)

    # ---- conv1: 3x3 pad=1 over cat([up, bridge]) -> ReLU ----
    z1 = (jnp.dot(wc1u_ref[...], up, preferred_element_type=f32)
          + jnp.dot(wc1b_ref[...], bcrop, preferred_element_type=f32))
    acc1 = None
    for tap in range(9):                                          # tap = ky*3+kx
        term = jnp.dot(z1[tap * cout:(tap + 1) * cout, :].astype(sdt),
                       shift_ref[tap], preferred_element_type=f32)
        acc1 = term if acc1 is None else acc1 + term
    h1 = jnp.maximum(acc1 + bc1_ref[...], 0.0)                    # (Cout, Hp*Wp)

    # ---- + Linear(SiLU(t)), broadcast over pixels ----
    tv = t_ref[0]                                                 # (1, T)
    silu = tv * jax.nn.sigmoid(tv)
    temb = jnp.sum(linw_ref[...] * silu, axis=-1, keepdims=True) + linb_ref[...]
    h1 = h1 + temb                                                # (Cout,1) bcast

    # ---- conv2: 3x3 pad=1 -> ReLU ----
    z2 = jnp.dot(wc2_ref[...], h1, preferred_element_type=f32)    # (9*Cout, Hp*Wp)
    acc2 = None
    for tap in range(9):
        term = jnp.dot(z2[tap * cout:(tap + 1) * cout, :].astype(sdt),
                       shift_ref[tap], preferred_element_type=f32)
        acc2 = term if acc2 is None else acc2 + term
    o_ref[0] = jnp.maximum(acc2 + bc2_ref[...], 0.0)


# ---------------------------------------------------------------------------
# Precomputed 0/1 structural matrices (exact in bf16)
# ---------------------------------------------------------------------------
@functools.lru_cache(maxsize=None)
def _structural_mats(H, W, BH, BW):
    Hp, Wp = 2 * H, 2 * W
    HW, NPIX, BHW = H * W, Hp * Wp, BH * BW
    dy0, dx0 = (BH - Hp) // 2, (BW - Wp) // 2

    # sub-pixel scatter of ConvTranspose2d(k=2, s=2), one matrix per phase
    sup = np.zeros((4, HW, NPIX), np.float32)
    for dy in range(2):
        for dx in range(2):
            p = dy * 2 + dx
            for i in range(H):
                for j in range(W):
                    sup[p, i * W + j, (2 * i + dy) * Wp + (2 * j + dx)] = 1.0

    # center-crop gather (flat bridge pixels -> flat cropped pixels)
    cropm = np.zeros((BHW, NPIX), np.float32)
    for y in range(Hp):
        for x in range(Wp):
            cropm[(dy0 + y) * BW + (dx0 + x), y * Wp + x] = 1.0

    # 3x3 (padding=1) shifted-image selection, one matrix per tap
    shift = np.zeros((9, NPIX, NPIX), np.float32)
    for ky in range(3):
        for kx in range(3):
            tap = ky * 3 + kx
            for y in range(Hp):
                for x in range(Wp):
                    sy, sx = y + ky - 1, x + kx - 1
                    if 0 <= sy < Hp and 0 <= sx < Wp:
                        shift[tap, sy * Wp + sx, y * Wp + x] = 1.0
    return sup, cropm, shift


# ---------------------------------------------------------------------------
# Full UNetUpBlock forward (NCHW in / NCHW out, like the PyTorch module)
# ---------------------------------------------------------------------------
def unet_up_block_forward(x_nchw, t, bridge_nchw, params):
    B, Cin, H, W = x_nchw.shape
    Cu = params["w_up"].shape[1]           # out_size (upconv channels)
    Cout = params["w_c1"].shape[0]         # out_size
    Cb = bridge_nchw.shape[1]
    T = t.shape[-1]
    BH, BW = bridge_nchw.shape[2], bridge_nchw.shape[3]
    Hp, Wp = 2 * H, 2 * W
    HW, NPIX, BHW = H * W, Hp * Wp, BH * BW
    assert params["w_c1"].shape[1] == Cu + Cb

    sup_np, cropm_np, shift_np = _structural_mats(H, W, BH, BW)
    sdt = jnp.bfloat16
    sup = jnp.asarray(sup_np, sdt)
    cropm = jnp.asarray(cropm_np, sdt)
    shift = jnp.asarray(shift_np, sdt)

    # weight refolds (tiny one-time ops, outside the hot loop)
    wup = jnp.transpose(params["w_up"], (2, 3, 1, 0)).reshape(4 * Cu, Cin)
    wc1u = jnp.transpose(params["w_c1"][:, :Cu], (2, 3, 0, 1)).reshape(9 * Cout, Cu)
    wc1b = jnp.transpose(params["w_c1"][:, Cu:], (2, 3, 0, 1)).reshape(9 * Cout, Cb)
    wc2 = jnp.transpose(params["w_c2"], (2, 3, 0, 1)).reshape(9 * Cout, Cout)
    bup = params["b_up"].reshape(Cu, 1)
    bc1 = params["b_c1"].reshape(Cout, 1)
    bc2 = params["b_c2"].reshape(Cout, 1)
    linw = params["lin_w"]                               # (Cout, T)
    linb = params["lin_b"].reshape(Cout, 1)

    # free contiguous reshapes of the NCHW tensors (no transposes / pads)
    xf = x_nchw.reshape(B, Cin, HW)
    brf = bridge_nchw.reshape(B, Cb, BHW)
    tr = t.reshape(B, 1, T)

    out = pl.pallas_call(
        functools.partial(_fused_up_block_kernel, cu=Cu, cout=Cout),
        out_shape=jax.ShapeDtypeStruct((B, Cout, NPIX), jnp.float32),
        grid=(B,),
        in_specs=[
            pl.BlockSpec((1, Cin, HW), lambda b: (b, 0, 0)),     # x
            pl.BlockSpec((1, Cb, BHW), lambda b: (b, 0, 0)),     # bridge (flat)
            pl.BlockSpec((1, 1, T), lambda b: (b, 0, 0)),        # time emb
            pl.BlockSpec((4 * Cu, Cin), lambda b: (0, 0)),       # w_up (folded)
            pl.BlockSpec((4, HW, NPIX), lambda b: (0, 0, 0)),    # sub-pixel scatter
            pl.BlockSpec((Cu, 1), lambda b: (0, 0)),             # b_up
            pl.BlockSpec((BHW, NPIX), lambda b: (0, 0)),         # crop gather
            pl.BlockSpec((9 * Cout, Cu), lambda b: (0, 0)),      # w_c1 (up chans)
            pl.BlockSpec((9 * Cout, Cb), lambda b: (0, 0)),      # w_c1 (bridge chans)
            pl.BlockSpec((Cout, 1), lambda b: (0, 0)),           # b_c1
            pl.BlockSpec((9, NPIX, NPIX), lambda b: (0, 0, 0)),  # 3x3 tap shifts
            pl.BlockSpec((Cout, T), lambda b: (0, 0)),           # lin_w
            pl.BlockSpec((Cout, 1), lambda b: (0, 0)),           # lin_b
            pl.BlockSpec((9 * Cout, Cout), lambda b: (0, 0)),    # w_c2
            pl.BlockSpec((Cout, 1), lambda b: (0, 0)),           # b_c2
        ],
        out_specs=pl.BlockSpec((1, Cout, NPIX), lambda b: (b, 0, 0)),
        compiler_params=pltpu.CompilerParams(dimension_semantics=("parallel",)),
    )(xf, brf, tr, wup, sup, bup, cropm, wc1u, wc1b, bc1, shift,
      linw, linb, wc2, bc2)

    return out.reshape(B, Cout, Hp, Wp)                 # NCHW output, free reshape


# ---------------------------------------------------------------------------
# Pure-JAX reference (for correctness check)
# ---------------------------------------------------------------------------
def ref_forward(x, t, bridge, p):
    # ConvTranspose2d k=2 s=2
    up = jnp.einsum("bcij,codk->boidjk", x, p["w_up"])
    B, Co, H, _, W, _ = up.shape
    up = up.reshape(B, Co, 2 * H, 2 * W) + p["b_up"][None, :, None, None]
    th, tw = up.shape[2], up.shape[3]
    dy = (bridge.shape[2] - th) // 2
    dx = (bridge.shape[3] - tw) // 2
    crop = bridge[:, :, dy:dy + th, dx:dx + tw]
    cat = jnp.concatenate([up, crop], axis=1)

    def conv3(z, w, b):
        y = jax.lax.conv_general_dilated(
            z, w, (1, 1), ((1, 1), (1, 1)),
            dimension_numbers=("NCHW", "OIHW", "NCHW"))
        return y + b[None, :, None, None]

    h = jnp.maximum(conv3(cat, p["w_c1"], p["b_c1"]), 0.0)
    silu = t * jax.nn.sigmoid(t)
    temb = silu @ p["lin_w"].T + p["lin_b"]
    h = h + temb[:, :, None, None]
    h = jnp.maximum(conv3(h, p["w_c2"], p["b_c2"]), 0.0)
    return h


# ---------------------------------------------------------------------------
if __name__ == "__main__":
    # config: in_size=8, out_size=4, up_mode='upconv', padding=True,
    #         batch_norm=False, time_emb_dim=8
    B, IN, OUT, T = 2, 8, 4, 8
    H = W = 8                      # x spatial; up-sampled to 16x16
    BH = BW = 18                   # bridge spatial (exercises center_crop)

    key = jax.random.PRNGKey(0)
    ks = jax.random.split(key, 16)
    f32 = jnp.float32

    params = {
        # ConvTranspose2d(in_size, out_size, 2, 2): weight (Cin, Cout, 2, 2)
        "w_up": 0.1 * jax.random.normal(ks[0], (IN, OUT, 2, 2), f32),
        "b_up": 0.1 * jax.random.normal(ks[1], (OUT,), f32),
        # Conv2d(in_size, out_size, 3, padding=1): weight (Cout, Cin, 3, 3)
        "w_c1": 0.1 * jax.random.normal(ks[2], (OUT, IN, 3, 3), f32),
        "b_c1": 0.1 * jax.random.normal(ks[3], (OUT,), f32),
        # Conv2d(out_size, out_size, 3, padding=1)
        "w_c2": 0.1 * jax.random.normal(ks[4], (OUT, OUT, 3, 3), f32),
        "b_c2": 0.1 * jax.random.normal(ks[5], (OUT,), f32),
        # Linear(time_emb_dim, out_size): weight (Cout, T)
        "lin_w": 0.1 * jax.random.normal(ks[6], (OUT, T), f32),
        "lin_b": 0.1 * jax.random.normal(ks[7], (OUT,), f32),
    }

    x = jax.random.normal(ks[8], (B, IN, H, W), f32)           # NCHW
    t = jax.random.normal(ks[9], (B, T), f32)
    bridge = jax.random.normal(ks[10], (B, IN - OUT, BH, BW), f32)

    fwd = jax.jit(unet_up_block_forward)
    out = fwd(x, t, bridge, params)
    jax.block_until_ready(out)

    ref = ref_forward(x, t, bridge, params)
    assert out.shape == (B, OUT, 2 * H, 2 * W), out.shape
    # bf16 is only used for the exact 0/1 structural matmuls (activations get a
    # couple of bf16 roundings); 2e-2 tolerance is comfortably loose for that.
    assert jnp.allclose(out, ref, atol=2e-2, rtol=2e-2), (
        float(jnp.max(jnp.abs(out - ref))))

    print("KERNEL_OK")
</pallas_src>

<mosaic_0001>
module attributes {stable_mosaic.version = 11 : i64} {
  func.func @_fused_up_block_kernel(%arg0: i32, %arg1: memref<1x8x64xf32, #tpu.memory_space<vmem>>, %arg2: memref<1x4x324xf32, #tpu.memory_space<vmem>>, %arg3: memref<1x1x8xf32, #tpu.memory_space<vmem>>, %arg4: memref<16x8xf32, #tpu.memory_space<vmem>>, %arg5: memref<4x64x256xbf16, #tpu.memory_space<vmem>>, %arg6: memref<4x1xf32, #tpu.memory_space<vmem>>, %arg7: memref<324x256xbf16, #tpu.memory_space<vmem>>, %arg8: memref<36x4xf32, #tpu.memory_space<vmem>>, %arg9: memref<36x4xf32, #tpu.memory_space<vmem>>, %arg10: memref<4x1xf32, #tpu.memory_space<vmem>>, %arg11: memref<9x256x256xbf16, #tpu.memory_space<vmem>>, %arg12: memref<4x8xf32, #tpu.memory_space<vmem>>, %arg13: memref<4x1xf32, #tpu.memory_space<vmem>>, %arg14: memref<36x4xf32, #tpu.memory_space<vmem>>, %arg15: memref<4x1xf32, #tpu.memory_space<vmem>>, %arg16: memref<1x4x256xf32, #tpu.memory_space<vmem>>) attributes {dimension_semantics = [#tpu.dimension_semantics<parallel>], iteration_bounds = array<i64: 2>, scalar_prefetch = 0 : i64, scratch_operands = 0 : i64, tpu.core_type = #tpu.core_type<tc>, window_params = [{transform_indices = @transform_0, window_bounds = array<i64: 1, 8, 64>}, {transform_indices = @transform_1, window_bounds = array<i64: 1, 4, 324>}, {transform_indices = @transform_2, window_bounds = array<i64: 1, 1, 8>}, {pipeline_mode = #tpu.pipeline_mode<synchronous>, transform_indices = @transform_3, window_bounds = array<i64: 16, 8>}, {pipeline_mode = #tpu.pipeline_mode<synchronous>, transform_indices = @transform_4, window_bounds = array<i64: 4, 64, 256>}, {pipeline_mode = #tpu.pipeline_mode<synchronous>, transform_indices = @transform_5, window_bounds = array<i64: 4, 1>}, {pipeline_mode = #tpu.pipeline_mode<synchronous>, transform_indices = @transform_6, window_bounds = array<i64: 324, 256>}, {pipeline_mode = #tpu.pipeline_mode<synchronous>, transform_indices = @transform_7, window_bounds = array<i64: 36, 4>}, {pipeline_mode = #tpu.pipeline_mode<synchronous>, transform_indices = @transform_8, window_bounds = array<i64: 36, 4>}, {pipeline_mode = #tpu.pipeline_mode<synchronous>, transform_indices = @transform_9, window_bounds = array<i64: 4, 1>}, {pipeline_mode = #tpu.pipeline_mode<synchronous>, transform_indices = @transform_10, window_bounds = array<i64: 9, 256, 256>}, {pipeline_mode = #tpu.pipeline_mode<synchronous>, transform_indices = @transform_11, window_bounds = array<i64: 4, 8>}, {pipeline_mode = #tpu.pipeline_mode<synchronous>, transform_indices = @transform_12, window_bounds = array<i64: 4, 1>}, {pipeline_mode = #tpu.pipeline_mode<synchronous>, transform_indices = @transform_13, window_bounds = array<i64: 36, 4>}, {pipeline_mode = #tpu.pipeline_mode<synchronous>, transform_indices = @transform_14, window_bounds = array<i64: 4, 1>}, {transform_indices = @transform_15, window_bounds = array<i64: 1, 4, 256>}]} {
    %c0 = arith.constant 0 : index
    %c0_0 = arith.constant 0 : index
    %c0_1 = arith.constant 0 : index
    %0 = vector.load %arg1[%c0, %c0_0, %c0_1] : memref<1x8x64xf32, #tpu.memory_space<vmem>>, vector<1x8x64xf32>
    %1 = vector.shape_cast %0 : vector<1x8x64xf32> to vector<8x64xf32>
    %c0_2 = arith.constant 0 : index
    %c0_3 = arith.constant 0 : index
    %2 = vector.load %arg4[%c0_2, %c0_3] : memref<16x8xf32, #tpu.memory_space<vmem>>, vector<16x8xf32>
    %cst = arith.constant dense<0.000000e+00> : vector<16x64xf32>
    %3 = tpu.matmul %2, %1, %cst {dimension_numbers = #tpu.dot_dimension_numbers<[1], [0], [0], [1], [0, 0, 1, 1], [], []>} : vector<16x8xf32>, vector<8x64xf32>, vector<16x64xf32> -> vector<16x64xf32>
    %4 = vector.extract_strided_slice %3 {offsets = [0, 0], sizes = [4, 64], strides = [1, 1]} : vector<16x64xf32> to vector<4x64xf32>
    %5 = arith.truncf %4 : vector<4x64xf32> to vector<4x64xbf16>
    %c0_4 = arith.constant 0 : index
    %c0_5 = arith.constant 0 : index
    %c0_6 = arith.constant 0 : index
    %6 = vector.load %arg5[%c0_4, %c0_5, %c0_6] : memref<4x64x256xbf16, #tpu.memory_space<vmem>>, vector<1x64x256xbf16>
    %7 = vector.shape_cast %6 : vector<1x64x256xbf16> to vector<64x256xbf16>
    %cst_7 = arith.constant dense<0.000000e+00> : vector<4x256xf32>
    %8 = tpu.matmul %5, %7, %cst_7 {dimension_numbers = #tpu.dot_dimension_numbers<[1], [0], [0], [1], [0, 0, 1, 1], [], []>} : vector<4x64xbf16>, vector<64x256xbf16>, vector<4x256xf32> -> vector<4x256xf32>
    %9 = vector.extract_strided_slice %3 {offsets = [4, 0], sizes = [4, 64], strides = [1, 1]} : vector<16x64xf32> to vector<4x64xf32>
    %10 = arith.truncf %9 : vector<4x64xf32> to vector<4x64xbf16>
    %c1 = arith.constant 1 : index
    %c0_8 = arith.constant 0 : index
    %c0_9 = arith.constant 0 : index
    %11 = vector.load %arg5[%c1, %c0_8, %c0_9] : memref<4x64x256xbf16, #tpu.memory_space<vmem>>, vector<1x64x256xbf16>
    %12 = vector.shape_cast %11 : vector<1x64x256xbf16> to vector<64x256xbf16>
    %cst_10 = arith.constant dense<0.000000e+00> : vector<4x256xf32>
    %13 = tpu.matmul %10, %12, %cst_10 {dimension_numbers = #tpu.dot_dimension_numbers<[1], [0], [0], [1], [0, 0, 1, 1], [], []>} : vector<4x64xbf16>, vector<64x256xbf16>, vector<4x256xf32> -> vector<4x256xf32>
    %14 = arith.addf %8, %13 : vector<4x256xf32>
    %15 = vector.extract_strided_slice %3 {offsets = [8, 0], sizes = [4, 64], strides = [1, 1]} : vector<16x64xf32> to vector<4x64xf32>
    %16 = arith.truncf %15 : vector<4x64xf32> to vector<4x64xbf16>
    %c2 = arith.constant 2 : index
    %c0_11 = arith.constant 0 : index
    %c0_12 = arith.constant 0 : index
    %17 = vector.load %arg5[%c2, %c0_11, %c0_12] : memref<4x64x256xbf16, #tpu.memory_space<vmem>>, vector<1x64x256xbf16>
    %18 = vector.shape_cast %17 : vector<1x64x256xbf16> to vector<64x256xbf16>
    %cst_13 = arith.constant dense<0.000000e+00> : vector<4x256xf32>
    %19 = tpu.matmul %16, %18, %cst_13 {dimension_numbers = #tpu.dot_dimension_numbers<[1], [0], [0], [1], [0, 0, 1, 1], [], []>} : vector<4x64xbf16>, vector<64x256xbf16>, vector<4x256xf32> -> vector<4x256xf32>
    %20 = arith.addf %14, %19 : vector<4x256xf32>
    %21 = vector.extract_strided_slice %3 {offsets = [12, 0], sizes = [4, 64], strides = [1, 1]} : vector<16x64xf32> to vector<4x64xf32>
    %22 = arith.truncf %21 : vector<4x64xf32> to vector<4x64xbf16>
    %c3 = arith.constant 3 : index
    %c0_14 = arith.constant 0 : index
    %c0_15 = arith.constant 0 : index
    %23 = vector.load %arg5[%c3, %c0_14, %c0_15] : memref<4x64x256xbf16, #tpu.memory_space<vmem>>, vector<1x64x256xbf16>
    %24 = vector.shape_cast %23 : vector<1x64x256xbf16> to vector<64x256xbf16>
    %cst_16 = arith.constant dense<0.000000e+00> : vector<4x256xf32>
    %25 = tpu.matmul %22, %24, %cst_16 {dimension_numbers = #tpu.dot_dimension_numbers<[1], [0], [0], [1], [0, 0, 1, 1], [], []>} : vector<4x64xbf16>, vector<64x256xbf16>, vector<4x256xf32> -> vector<4x256xf32>
    %26 = arith.addf %20, %25 : vector<4x256xf32>
    %c0_17 = arith.constant 0 : index
    %c0_18 = arith.constant 0 : index
    %27 = vector.load %arg6[%c0_17, %c0_18] : memref<4x1xf32, #tpu.memory_space<vmem>>, vector<4x1xf32>
    %28 = vector.broadcast %27 : vector<4x1xf32> to vector<4x256xf32>
    %29 = arith.addf %26, %28 : vector<4x256xf32>
    %c0_19 = arith.constant 0 : index
    %c0_20 = arith.constant 0 : index
    %c0_21 = arith.constant 0 : index
    %30 = vector.load %arg2[%c0_19, %c0_20, %c0_21] : memref<1x4x324xf32, #tpu.memory_space<vmem>>, vector<1x4x324xf32>
    %31 = vector.shape_cast %30 : vector<1x4x324xf32> to vector<4x324xf32>
    %32 = arith.truncf %31 : vector<4x324xf32> to vector<4x324xbf16>
    %c0_22 = arith.constant 0 : index
    %c0_23 = arith.constant 0 : index
    %33 = vector.load %arg7[%c0_22, %c0_23] : memref<324x256xbf16, #tpu.memory_space<vmem>>, vector<324x256xbf16>
    %cst_24 = arith.constant dense<0.000000e+00> : vector<4x256xf32>
    %34 = tpu.matmul %32, %33, %cst_24 {dimension_numbers = #tpu.dot_dimension_numbers<[1], [0], [0], [1], [0, 0, 1, 1], [], []>} : vector<4x324xbf16>, vector<324x256xbf16>, vector<4x256xf32> -> vector<4x256xf32>
    %c0_25 = arith.constant 0 : index
    %c0_26 = arith.constant 0 : index
    %35 = vector.load %arg8[%c0_25, %c0_26] : memref<36x4xf32, #tpu.memory_space<vmem>>, vector<36x4xf32>
    %cst_27 = arith.constant dense<0.000000e+00> : vector<36x256xf32>
    %36 = tpu.matmul %35, %29, %cst_27 {dimension_numbers = #tpu.dot_dimension_numbers<[1], [0], [0], [1], [0, 0, 1, 1], [], []>} : vector<36x4xf32>, vector<4x256xf32>, vector<36x256xf32> -> vector<36x256xf32>
    %c0_28 = arith.constant 0 : index
    %c0_29 = arith.constant 0 : index
    %37 = vector.load %arg9[%c0_28, %c0_29] : memref<36x4xf32, #tpu.memory_space<vmem>>, vector<36x4xf32>
    %cst_30 = arith.constant dense<0.000000e+00> : vector<36x256xf32>
    %38 = tpu.matmul %37, %34, %cst_30 {dimension_numbers = #tpu.dot_dimension_numbers<[1], [0], [0], [1], [0, 0, 1, 1], [], []>} : vector<36x4xf32>, vector<4x256xf32>, vector<36x256xf32> -> vector<36x256xf32>
    %39 = arith.addf %36, %38 : vector<36x256xf32>
    %40 = vector.extract_strided_slice %39 {offsets = [0, 0], sizes = [4, 256], strides = [1, 1]} : vector<36x256xf32> to vector<4x256xf32>
    %41 = arith.truncf %40 : vector<4x256xf32> to vector<4x256xbf16>
    %c0_31 = arith.constant 0 : index
    %c0_32 = arith.constant 0 : index
    %c0_33 = arith.constant 0 : index
    %42 = vector.load %arg11[%c0_31, %c0_32, %c0_33] : memref<9x256x256xbf16, #tpu.memory_space<vmem>>, vector<1x256x256xbf16>
    %43 = vector.shape_cast %42 : vector<1x256x256xbf16> to vector<256x256xbf16>
    %cst_34 = arith.constant dense<0.000000e+00> : vector<4x256xf32>
    %44 = tpu.matmul %41, %43, %cst_34 {dimension_numbers = #tpu.dot_dimension_numbers<[1], [0], [0], [1], [0, 0, 1, 1], [], []>} : vector<4x256xbf16>, vector<256x256xbf16>, vector<4x256xf32> -> vector<4x256xf32>
    %45 = vector.extract_strided_slice %39 {offsets = [4, 0], sizes = [4, 256], strides = [1, 1]} : vector<36x256xf32> to vector<4x256xf32>
    %46 = arith.truncf %45 : vector<4x256xf32> to vector<4x256xbf16>
    %c1_35 = arith.constant 1 : index
    %c0_36 = arith.constant 0 : index
    %c0_37 = arith.constant 0 : index
    %47 = vector.load %arg11[%c1_35, %c0_36, %c0_37] : memref<9x256x256xbf16, #tpu.memory_space<vmem>>, vector<1x256x256xbf16>
    %48 = vector.shape_cast %47 : vector<1x256x256xbf16> to vector<256x256xbf16>
    %cst_38 = arith.constant dense<0.000000e+00> : vector<4x256xf32>
    %49 = tpu.matmul %46, %48, %cst_38 {dimension_numbers = #tpu.dot_dimension_numbers<[1], [0], [0], [1], [0, 0, 1, 1], [], []>} : vector<4x256xbf16>, vector<256x256xbf16>, vector<4x256xf32> -> vector<4x256xf32>
    %50 = arith.addf %44, %49 : vector<4x256xf32>
    %51 = vector.extract_strided_slice %39 {offsets = [8, 0], sizes = [4, 256], strides = [1, 1]} : vector<36x256xf32> to vector<4x256xf32>
    %52 = arith.truncf %51 : vector<4x256xf32> to vector<4x256xbf16>
    %c2_39 = arith.constant 2 : index
    %c0_40 = arith.constant 0 : index
    %c0_41 = arith.constant 0 : index
    %53 = vector.load %arg11[%c2_39, %c0_40, %c0_41] : memref<9x256x256xbf16, #tpu.memory_space<vmem>>, vector<1x256x256xbf16>
    %54 = vector.shape_cast %53 : vector<1x256x256xbf16> to vector<256x256xbf16>
    %cst_42 = arith.constant dense<0.000000e+00> : vector<4x256xf32>
    %55 = tpu.matmul %52, %54, %cst_42 {dimension_numbers = #tpu.dot_dimension_numbers<[1], [0], [0], [1], [0, 0, 1, 1], [], []>} : vector<4x256xbf16>, vector<256x256xbf16>, vector<4x256xf32> -> vector<4x256xf32>
    %56 = arith.addf %50, %55 : vector<4x256xf32>
    %57 = vector.extract_strided_slice %39 {offsets = [12, 0], sizes = [4, 256], strides = [1, 1]} : vector<36x256xf32> to vector<4x256xf32>
    %58 = arith.truncf %57 : vector<4x256xf32> to vector<4x256xbf16>
    %c3_43 = arith.constant 3 : index
    %c0_44 = arith.constant 0 : index
    %c0_45 = arith.constant 0 : index
    %59 = vector.load %arg11[%c3_43, %c0_44, %c0_45] : memref<9x256x256xbf16, #tpu.memory_space<vmem>>, vector<1x256x256xbf16>
    %60 = vector.shape_cast %59 : vector<1x256x256xbf16> to vector<256x256xbf16>
    %cst_46 = arith.constant dense<0.000000e+00> : vector<4x256xf32>
    %61 = tpu.matmul %58, %60, %cst_46 {dimension_numbers = #tpu.dot_dimension_numbers<[1], [0], [0], [1], [0, 0, 1, 1], [], []>} : vector<4x256xbf16>, vector<256x256xbf16>, vector<4x256xf32> -> vector<4x256xf32>
    %62 = arith.addf %56, %61 : vector<4x256xf32>
    %63 = vector.extract_strided_slice %39 {offsets = [16, 0], sizes = [4, 256], strides = [1, 1]} : vector<36x256xf32> to vector<4x256xf32>
    %64 = arith.truncf %63 : vector<4x256xf32> to vector<4x256xbf16>
    %c4 = arith.constant 4 : index
    %c0_47 = arith.constant 0 : index
    %c0_48 = arith.constant 0 : index
    %65 = vector.load %arg11[%c4, %c0_47, %c0_48] : memref<9x256x256xbf16, #tpu.memory_space<vmem>>, vector<1x256x256xbf16>
    %66 = vector.shape_cast %65 : vector<1x256x256xbf16> to vector<256x256xbf16>
    %cst_49 = arith.constant dense<0.000000e+00> : vector<4x256xf32>
    %67 = tpu.matmul %64, %66, %cst_49 {dimension_numbers = #tpu.dot_dimension_numbers<[1], [0], [0], [1], [0, 0, 1, 1], [], []>} : vector<4x256xbf16>, vector<256x256xbf16>, vector<4x256xf32> -> vector<4x256xf32>
    %68 = arith.addf %62, %67 : vector<4x256xf32>
    %69 = vector.extract_strided_slice %39 {offsets = [20, 0], sizes = [4, 256], strides = [1, 1]} : vector<36x256xf32> to vector<4x256xf32>
    %70 = arith.truncf %69 : vector<4x256xf32> to vector<4x256xbf16>
    %c5 = arith.constant 5 : index
    %c0_50 = arith.constant 0 : index
    %c0_51 = arith.constant 0 : index
    %71 = vector.load %arg11[%c5, %c0_50, %c0_51] : memref<9x256x256xbf16, #tpu.memory_space<vmem>>, vector<1x256x256xbf16>
    %72 = vector.shape_cast %71 : vector<1x256x256xbf16> to vector<256x256xbf16>
    %cst_52 = arith.constant dense<0.000000e+00> : vector<4x256xf32>
    %73 = tpu.matmul %70, %72, %cst_52 {dimension_numbers = #tpu.dot_dimension_numbers<[1], [0], [0], [1], [0, 0, 1, 1], [], []>} : vector<4x256xbf16>, vector<256x256xbf16>, vector<4x256xf32> -> vector<4x256xf32>
    %74 = arith.addf %68, %73 : vector<4x256xf32>
    %75 = vector.extract_strided_slice %39 {offsets = [24, 0], sizes = [4, 256], strides = [1, 1]} : vector<36x256xf32> to vector<4x256xf32>
    %76 = arith.truncf %75 : vector<4x256xf32> to vector<4x256xbf16>
    %c6 = arith.constant 6 : index
    %c0_53 = arith.constant 0 : index
    %c0_54 = arith.constant 0 : index
    %77 = vector.load %arg11[%c6, %c0_53, %c0_54] : memref<9x256x256xbf16, #tpu.memory_space<vmem>>, vector<1x256x256xbf16>
    %78 = vector.shape_cast %77 : vector<1x256x256xbf16> to vector<256x256xbf16>
    %cst_55 = arith.constant dense<0.000000e+00> : vector<4x256xf32>
    %79 = tpu.matmul %76, %78, %cst_55 {dimension_numbers = #tpu.dot_dimension_numbers<[1], [0], [0], [1], [0, 0, 1, 1], [], []>} : vector<4x256xbf16>, vector<256x256xbf16>, vector<4x256xf32> -> vector<4x256xf32>
    %80 = arith.addf %74, %79 : vector<4x256xf32>
    %81 = vector.extract_strided_slice %39 {offsets = [28, 0], sizes = [4, 256], strides = [1, 1]} : vector<36x256xf32> to vector<4x256xf32>
    %82 = arith.truncf %81 : vector<4x256xf32> to vector<4x256xbf16>
    %c7 = arith.constant 7 : index
    %c0_56 = arith.constant 0 : index
    %c0_57 = arith.constant 0 : index
    %83 = vector.load %arg11[%c7, %c0_56, %c0_57] : memref<9x256x256xbf16, #tpu.memory_space<vmem>>, vector<1x256x256xbf16>
    %84 = vector.shape_cast %83 : vector<1x256x256xbf16> to vector<256x256xbf16>
    %cst_58 = arith.constant dense<0.000000e+00> : vector<4x256xf32>
    %85 = tpu.matmul %82, %84, %cst_58 {dimension_numbers = #tpu.dot_dimension_numbers<[1], [0], [0], [1], [0, 0, 1, 1], [], []>} : vector<4x256xbf16>, vector<256x256xbf16>, vector<4x256xf32> -> vector<4x256xf32>
    %86 = arith.addf %80, %85 : vector<4x256xf32>
    %87 = vector.extract_strided_slice %39 {offsets = [32, 0], sizes = [4, 256], strides = [1, 1]} : vector<36x256xf32> to vector<4x256xf32>
    %88 = arith.truncf %87 : vector<4x256xf32> to vector<4x256xbf16>
    %c8 = arith.constant 8 : index
    %c0_59 = arith.constant 0 : index
    %c0_60 = arith.constant 0 : index
    %89 = vector.load %arg11[%c8, %c0_59, %c0_60] : memref<9x256x256xbf16, #tpu.memory_space<vmem>>, vector<1x256x256xbf16>
    %90 = vector.shape_cast %89 : vector<1x256x256xbf16> to vector<256x256xbf16>
    %cst_61 = arith.constant dense<0.000000e+00> : vector<4x256xf32>
    %91 = tpu.matmul %88, %90, %cst_61 {dimension_numbers = #tpu.dot_dimension_numbers<[1], [0], [0], [1], [0, 0, 1, 1], [], []>} : vector<4x256xbf16>, vector<256x256xbf16>, vector<4x256xf32> -> vector<4x256xf32>
    %92 = arith.addf %86, %91 : vector<4x256xf32>
    %c0_62 = arith.constant 0 : index
    %c0_63 = arith.constant 0 : index
    %93 = vector.load %arg10[%c0_62, %c0_63] : memref<4x1xf32, #tpu.memory_space<vmem>>, vector<4x1xf32>
    %94 = vector.broadcast %93 : vector<4x1xf32> to vector<4x256xf32>
    %95 = arith.addf %92, %94 : vector<4x256xf32>
    %cst_64 = arith.constant 0.000000e+00 : f32
    %96 = vector.broadcast %cst_64 : f32 to vector<4x256xf32>
    %97 = arith.maximumf %95, %96 : vector<4x256xf32>
    %c0_65 = arith.constant 0 : index
    %c0_66 = arith.constant 0 : index
    %c0_67 = arith.constant 0 : index
    %98 = vector.load %arg3[%c0_65, %c0_66, %c0_67] : memref<1x1x8xf32, #tpu.memory_space<vmem>>, vector<1x1x8xf32>
    %99 = vector.shape_cast %98 : vector<1x1x8xf32> to vector<1x8xf32>
    %100 = arith.negf %99 : vector<1x8xf32>
    %101 = math.exp %100 : vector<1x8xf32>
    %cst_68 = arith.constant 1.000000e+00 : f32
    %102 = vector.broadcast %cst_68 : f32 to vector<1x8xf32>
    %103 = arith.addf %102, %101 : vector<1x8xf32>
    %104 = arith.divf %102, %103 : vector<1x8xf32>
    %105 = arith.mulf %99, %104 : vector<1x8xf32>
    %c0_69 = arith.constant 0 : index
    %c0_70 = arith.constant 0 : index
    %106 = vector.load %arg12[%c0_69, %c0_70] : memref<4x8xf32, #tpu.memory_space<vmem>>, vector<4x8xf32>
    %107 = vector.broadcast %105 : vector<1x8xf32> to vector<4x8xf32>
    %108 = arith.mulf %106, %107 : vector<4x8xf32>
    %cst_71 = arith.constant dense<0.000000e+00> : vector<4xf32>
    %109 = vector.multi_reduction <add>, %108, %cst_71 [1] : vector<4x8xf32> to vector<4xf32>
    %110 = vector.shape_cast %109 : vector<4xf32> to vector<4x1xf32>
    %c0_72 = arith.constant 0 : index
    %c0_73 = arith.constant 0 : index
    %111 = vector.load %arg13[%c0_72, %c0_73] : memref<4x1xf32, #tpu.memory_space<vmem>>, vector<4x1xf32>
    %112 = arith.addf %110, %111 : vector<4x1xf32>
    %113 = vector.broadcast %112 : vector<4x1xf32> to vector<4x256xf32>
    %114 = arith.addf %97, %113 : vector<4x256xf32>
    %c0_74 = arith.constant 0 : index
    %c0_75 = arith.constant 0 : index
    %115 = vector.load %arg14[%c0_74, %c0_75] : memref<36x4xf32, #tpu.memory_space<vmem>>, vector<36x4xf32>
    %cst_76 = arith.constant dense<0.000000e+00> : vector<36x256xf32>
    %116 = tpu.matmul %115, %114, %cst_76 {dimension_numbers = #tpu.dot_dimension_numbers<[1], [0], [0], [1], [0, 0, 1, 1], [], []>} : vector<36x4xf32>, vector<4x256xf32>, vector<36x256xf32> -> vector<36x256xf32>
    %117 = vector.extract_strided_slice %116 {offsets = [0, 0], sizes = [4, 256], strides = [1, 1]} : vector<36x256xf32> to vector<4x256xf32>
    %118 = arith.truncf %117 : vector<4x256xf32> to vector<4x256xbf16>
    %c0_77 = arith.constant 0 : index
    %c0_78 = arith.constant 0 : index
    %c0_79 = arith.constant 0 : index
    %119 = vector.load %arg11[%c0_77, %c0_78, %c0_79] : memref<9x256x256xbf16, #tpu.memory_space<vmem>>, vector<1x256x256xbf16>
    %120 = vector.shape_cast %119 : vector<1x256x256xbf16> to vector<256x256xbf16>
    %cst_80 = arith.constant dense<0.000000e+00> : vector<4x256xf32>
    %121 = tpu.matmul %118, %120, %cst_80 {dimension_numbers = #tpu.dot_dimension_numbers<[1], [0], [0], [1], [0, 0, 1, 1], [], []>} : vector<4x256xbf16>, vector<256x256xbf16>, vector<4x256xf32> -> vector<4x256xf32>
    %122 = vector.extract_strided_slice %116 {offsets = [4, 0], sizes = [4, 256], strides = [1, 1]} : vector<36x256xf32> to vector<4x256xf32>
    %123 = arith.truncf %122 : vector<4x256xf32> to vector<4x256xbf16>
    %c1_81 = arith.constant 1 : index
    %c0_82 = arith.constant 0 : index
    %c0_83 = arith.constant 0 : index
    %124 = vector.load %arg11[%c1_81, %c0_82, %c0_83] : memref<9x256x256xbf16, #tpu.memory_space<vmem>>, vector<1x256x256xbf16>
    %125 = vector.shape_cast %124 : vector<1x256x256xbf16> to vector<256x256xbf16>
    %cst_84 = arith.constant dense<0.000000e+00> : vector<4x256xf32>
    %126 = tpu.matmul %123, %125, %cst_84 {dimension_numbers = #tpu.dot_dimension_numbers<[1], [0], [0], [1], [0, 0, 1, 1], [], []>} : vector<4x256xbf16>, vector<256x256xbf16>, vector<4x256xf32> -> vector<4x256xf32>
    %127 = arith.addf %121, %126 : vector<4x256xf32>
    %128 = vector.extract_strided_slice %116 {offsets = [8, 0], sizes = [4, 256], strides = [1, 1]} : vector<36x256xf32> to vector<4x256xf32>
    %129 = arith.truncf %128 : vector<4x256xf32> to vector<4x256xbf16>
    %c2_85 = arith.constant 2 : index
    %c0_86 = arith.constant 0 : index
    %c0_87 = arith.constant 0 : index
    %130 = vector.load %arg11[%c2_85, %c0_86, %c0_87] : memref<9x256x256xbf16, #tpu.memory_space<vmem>>, vector<1x256x256xbf16>
    %131 = vector.shape_cast %130 : vector<1x256x256xbf16> to vector<256x256xbf16>
    %cst_88 = arith.constant dense<0.000000e+00> : vector<4x256xf32>
    %132 = tpu.matmul %129, %131, %cst_88 {dimension_numbers = #tpu.dot_dimension_numbers<[1], [0], [0], [1], [0, 0, 1, 1], [], []>} : vector<4x256xbf16>, vector<256x256xbf16>, vector<4x256xf32> -> vector<4x256xf32>
    %133 = arith.addf %127, %132 : vector<4x256xf32>
    %134 = vector.extract_strided_slice %116 {offsets = [12, 0], sizes = [4, 256], strides = [1, 1]} : vector<36x256xf32> to vector<4x256xf32>
    %135 = arith.truncf %134 : vector<4x256xf32> to vector<4x256xbf16>
    %c3_89 = arith.constant 3 : index
    %c0_90 = arith.constant 0 : index
    %c0_91 = arith.constant 0 : index
    %136 = vector.load %arg11[%c3_89, %c0_90, %c0_91] : memref<9x256x256xbf16, #tpu.memory_space<vmem>>, vector<1x256x256xbf16>
    %137 = vector.shape_cast %136 : vector<1x256x256xbf16> to vector<256x256xbf16>
    %cst_92 = arith.constant dense<0.000000e+00> : vector<4x256xf32>
    %138 = tpu.matmul %135, %137, %cst_92 {dimension_numbers = #tpu.dot_dimension_numbers<[1], [0], [0], [1], [0, 0, 1, 1], [], []>} : vector<4x256xbf16>, vector<256x256xbf16>, vector<4x256xf32> -> vector<4x256xf32>
    %139 = arith.addf %133, %138 : vector<4x256xf32>
    %140 = vector.extract_strided_slice %116 {offsets = [16, 0], sizes = [4, 256], strides = [1, 1]} : vector<36x256xf32> to vector<4x256xf32>
    %141 = arith.truncf %140 : vector<4x256xf32> to vector<4x256xbf16>
    %c4_93 = arith.constant 4 : index
    %c0_94 = arith.constant 0 : index
    %c0_95 = arith.constant 0 : index
    %142 = vector.load %arg11[%c4_93, %c0_94, %c0_95] : memref<9x256x256xbf16, #tpu.memory_space<vmem>>, vector<1x256x256xbf16>
    %143 = vector.shape_cast %142 : vector<1x256x256xbf16> to vector<256x256xbf16>
    %cst_96 = arith.constant dense<0.000000e+00> : vector<4x256xf32>
    %144 = tpu.matmul %141, %143, %cst_96 {dimension_numbers = #tpu.dot_dimension_numbers<[1], [0], [0], [1], [0, 0, 1, 1], [], []>} : vector<4x256xbf16>, vector<256x256xbf16>, vector<4x256xf32> -> vector<4x256xf32>
    %145 = arith.addf %139, %144 : vector<4x256xf32>
    %146 = vector.extract_strided_slice %116 {offsets = [20, 0], sizes = [4, 256], strides = [1, 1]} : vector<36x256xf32> to vector<4x256xf32>
    %147 = arith.truncf %146 : vector<4x256xf32> to vector<4x256xbf16>
    %c5_97 = arith.constant 5 : index
    %c0_98 = arith.constant 0 : index
    %c0_99 = arith.constant 0 : index
    %148 = vector.load %arg11[%c5_97, %c0_98, %c0_99] : memref<9x256x256xbf16, #tpu.memory_space<vmem>>, vector<1x256x256xbf16>
    %149 = vector.shape_cast %148 : vector<1x256x256xbf16> to vector<256x256xbf16>
    %cst_100 = arith.constant dense<0.000000e+00> : vector<4x256xf32>
    %150 = tpu.matmul %147, %149, %cst_100 {dimension_numbers = #tpu.dot_dimension_numbers<[1], [0], [0], [1], [0, 0, 1, 1], [], []>} : vector<4x256xbf16>, vector<256x256xbf16>, vector<4x256xf32> -> vector<4x256xf32>
    %151 = arith.addf %145, %150 : vector<4x256xf32>
    %152 = vector.extract_strided_slice %116 {offsets = [24, 0], sizes = [4, 256], strides = [1, 1]} : vector<36x256xf32> to vector<4x256xf32>
    %153 = arith.truncf %152 : vector<4x256xf32> to vector<4x256xbf16>
    %c6_101 = arith.constant 6 : index
    %c0_102 = arith.constant 0 : index
    %c0_103 = arith.constant 0 : index
    %154 = vector.load %arg11[%c6_101, %c0_102, %c0_103] : memref<9x256x256xbf16, #tpu.memory_space<vmem>>, vector<1x256x256xbf16>
    %155 = vector.shape_cast %154 : vector<1x256x256xbf16> to vector<256x256xbf16>
    %cst_104 = arith.constant dense<0.000000e+00> : vector<4x256xf32>
    %156 = tpu.matmul %153, %155, %cst_104 {dimension_numbers = #tpu.dot_dimension_numbers<[1], [0], [0], [1], [0, 0, 1, 1], [], []>} : vector<4x256xbf16>, vector<256x256xbf16>, vector<4x256xf32> -> vector<4x256xf32>
    %157 = arith.addf %151, %156 : vector<4x256xf32>
    %158 = vector.extract_strided_slice %116 {offsets = [28, 0], sizes = [4, 256], strides = [1, 1]} : vector<36x256xf32> to vector<4x256xf32>
    %159 = arith.truncf %158 : vector<4x256xf32> to vector<4x256xbf16>
    %c7_105 = arith.constant 7 : index
    %c0_106 = arith.constant 0 : index
    %c0_107 = arith.constant 0 : index
    %160 = vector.load %arg11[%c7_105, %c0_106, %c0_107] : memref<9x256x256xbf16, #tpu.memory_space<vmem>>, vector<1x256x256xbf16>
    %161 = vector.shape_cast %160 : vector<1x256x256xbf16> to vector<256x256xbf16>
    %cst_108 = arith.constant dense<0.000000e+00> : vector<4x256xf32>
    %162 = tpu.matmul %159, %161, %cst_108 {dimension_numbers = #tpu.dot_dimension_numbers<[1], [0], [0], [1], [0, 0, 1, 1], [], []>} : vector<4x256xbf16>, vector<256x256xbf16>, vector<4x256xf32> -> vector<4x256xf32>
    %163 = arith.addf %157, %162 : vector<4x256xf32>
    %164 = vector.extract_strided_slice %116 {offsets = [32, 0], sizes = [4, 256], strides = [1, 1]} : vector<36x256xf32> to vector<4x256xf32>
    %165 = arith.truncf %164 : vector<4x256xf32> to vector<4x256xbf16>
    %c8_109 = arith.constant 8 : index
    %c0_110 = arith.constant 0 : index
    %c0_111 = arith.constant 0 : index
    %166 = vector.load %arg11[%c8_109, %c0_110, %c0_111] : memref<9x256x256xbf16, #tpu.memory_space<vmem>>, vector<1x256x256xbf16>
    %167 = vector.shape_cast %166 : vector<1x256x256xbf16> to vector<256x256xbf16>
    %cst_112 = arith.constant dense<0.000000e+00> : vector<4x256xf32>
    %168 = tpu.matmul %165, %167, %cst_112 {dimension_numbers = #tpu.dot_dimension_numbers<[1], [0], [0], [1], [0, 0, 1, 1], [], []>} : vector<4x256xbf16>, vector<256x256xbf16>, vector<4x256xf32> -> vector<4x256xf32>
    %169 = arith.addf %163, %168 : vector<4x256xf32>
    %c0_113 = arith.constant 0 : index
    %c0_114 = arith.constant 0 : index
    %170 = vector.load %arg15[%c0_113, %c0_114] : memref<4x1xf32, #tpu.memory_space<vmem>>, vector<4x1xf32>
    %171 = vector.broadcast %170 : vector<4x1xf32> to vector<4x256xf32>
    %172 = arith.addf %169, %171 : vector<4x256xf32>
    %cst_115 = arith.constant 0.000000e+00 : f32
    %173 = vector.broadcast %cst_115 : f32 to vector<4x256xf32>
    %174 = arith.maximumf %172, %173 : vector<4x256xf32>
    %c0_116 = arith.constant 0 : index
    %c0_117 = arith.constant 0 : index
    %c0_118 = arith.constant 0 : index
    %175 = vector.load %arg16[%c0_116, %c0_117, %c0_118] : memref<1x4x256xf32, #tpu.memory_space<vmem>>, vector<1x4x256xf32>
    %176 = vector.shape_cast %175 : vector<1x4x256xf32> to vector<4x256xf32>
    %177 = vector.shape_cast %174 : vector<4x256xf32> to vector<1x4x256xf32>
    tpu.vector_store %arg16[%c0_116, %c0_117, %c0_118], %177 {strides = array<i32>} : memref<1x4x256xf32, #tpu.memory_space<vmem>>, vector<1x4x256xf32>,
    return
  }
  func.func @transform_0(%arg0: i32) -> (i32, i32, i32) {
    %c0_i32 = arith.constant 0 : i32
    %c0_i32_0 = arith.constant 0 : i32
    %c0_i32_1 = arith.constant 0 : i32
    return %arg0, %c0_i32, %c0_i32_0 : i32, i32, i32
  }
  func.func @transform_1(%arg0: i32) -> (i32, i32, i32) {
    %c0_i32 = arith.constant 0 : i32
    %c0_i32_0 = arith.constant 0 : i32
    %c0_i32_1 = arith.constant 0 : i32
    return %arg0, %c0_i32, %c0_i32_0 : i32, i32, i32
  }
  func.func @transform_2(%arg0: i32) -> (i32, i32, i32) {
    %c0_i32 = arith.constant 0 : i32
    %c0_i32_0 = arith.constant 0 : i32
    %c0_i32_1 = arith.constant 0 : i32
    return %arg0, %c0_i32, %c0_i32_0 : i32, i32, i32
  }
  func.func @transform_3(%arg0: i32) -> (i32, i32) {
    %c0_i32 = arith.constant 0 : i32
    %c0_i32_0 = arith.constant 0 : i32
    %c0_i32_1 = arith.constant 0 : i32
    return %c0_i32, %c0_i32_0 : i32, i32
  }
  func.func @transform_4(%arg0: i32) -> (i32, i32, i32) {
    %c0_i32 = arith.constant 0 : i32
    %c0_i32_0 = arith.constant 0 : i32
    %c0_i32_1 = arith.constant 0 : i32
    %c0_i32_2 = arith.constant 0 : i32
    return %c0_i32, %c0_i32_0, %c0_i32_1 : i32, i32, i32
  }
  func.func @transform_5(%arg0: i32) -> (i32, i32) {
    %c0_i32 = arith.constant 0 : i32
    %c0_i32_0 = arith.constant 0 : i32
    %c0_i32_1 = arith.constant 0 : i32
    return %c0_i32, %c0_i32_0 : i32, i32
  }
  func.func @transform_6(%arg0: i32) -> (i32, i32) {
    %c0_i32 = arith.constant 0 : i32
    %c0_i32_0 = arith.constant 0 : i32
    %c0_i32_1 = arith.constant 0 : i32
    return %c0_i32, %c0_i32_0 : i32, i32
  }
  func.func @transform_7(%arg0: i32) -> (i32, i32) {
    %c0_i32 = arith.constant 0 : i32
    %c0_i32_0 = arith.constant 0 : i32
    %c0_i32_1 = arith.constant 0 : i32
    return %c0_i32, %c0_i32_0 : i32, i32
  }
  func.func @transform_8(%arg0: i32) -> (i32, i32) {
    %c0_i32 = arith.constant 0 : i32
    %c0_i32_0 = arith.constant 0 : i32
    %c0_i32_1 = arith.constant 0 : i32
    return %c0_i32, %c0_i32_0 : i32, i32
  }
  func.func @transform_9(%arg0: i32) -> (i32, i32) {
    %c0_i32 = arith.constant 0 : i32
    %c0_i32_0 = arith.constant 0 : i32
    %c0_i32_1 = arith.constant 0 : i32
    return %c0_i32, %c0_i32_0 : i32, i32
  }
  func.func @transform_10(%arg0: i32) -> (i32, i32, i32) {
    %c0_i32 = arith.constant 0 : i32
    %c0_i32_0 = arith.constant 0 : i32
    %c0_i32_1 = arith.constant 0 : i32
    %c0_i32_2 = arith.constant 0 : i32
    return %c0_i32, %c0_i32_0, %c0_i32_1 : i32, i32, i32
  }
  func.func @transform_11(%arg0: i32) -> (i32, i32) {
    %c0_i32 = arith.constant 0 : i32
    %c0_i32_0 = arith.constant 0 : i32
    %c0_i32_1 = arith.constant 0 : i32
    return %c0_i32, %c0_i32_0 : i32, i32
  }
  func.func @transform_12(%arg0: i32) -> (i32, i32) {
    %c0_i32 = arith.constant 0 : i32
    %c0_i32_0 = arith.constant 0 : i32
    %c0_i32_1 = arith.constant 0 : i32
    return %c0_i32, %c0_i32_0 : i32, i32
  }
  func.func @transform_13(%arg0: i32) -> (i32, i32) {
    %c0_i32 = arith.constant 0 : i32
    %c0_i32_0 = arith.constant 0 : i32
    %c0_i32_1 = arith.constant 0 : i32
    return %c0_i32, %c0_i32_0 : i32, i32
  }
  func.func @transform_14(%arg0: i32) -> (i32, i32) {
    %c0_i32 = arith.constant 0 : i32
    %c0_i32_0 = arith.constant 0 : i32
    %c0_i32_1 = arith.constant 0 : i32
    return %c0_i32, %c0_i32_0 : i32, i32
  }
  func.func @transform_15(%arg0: i32) -> (i32, i32, i32) {
    %c0_i32 = arith.constant 0 : i32
    %c0_i32_0 = arith.constant 0 : i32
    %c0_i32_1 = arith.constant 0 : i32
    return %arg0, %c0_i32, %c0_i32_0 : i32, i32, i32
  }
}

</mosaic_0001>

<bundles_post_ra>
// kernel: unet_up_block_forward.1
= control target key start
LH: loop header
LB: loop body
LE: loop exit
PB: predicated region body
PF: predicated region fallthrough
CT: control target
= control target key end

     0   :  { %s6768_s0 = inlined_call_operand.vmem [shape: f32[2,8,64], index: 0, kind: input, shape index: {}]   ;;  %s6769_s1 = inlined_call_operand.vmem [shape: f32[2,4,324], index: 1, kind: input, shape index: {}]   ;;  %s6770_s2 = inlined_call_operand.hbm [shape: f32[2,1,8], index: 2, kind: input, shape index: {}]   ;;  %s6771_s3 = inlined_call_operand.vmem [shape: f32[16,8], index: 3, kind: input, shape index: {}]   ;;  %s6772_s4 = inlined_call_operand.hbm [shape: bf16[4,64,256], index: 4, kind: input, shape index: {}]   ;;  %s6773_s5 = inlined_call_operand.vmem [shape: f32[4,1], index: 5, kind: input, shape index: {}]   ;;  %s6774_s6 = inlined_call_operand.hbm [shape: bf16[324,256], index: 6, kind: input, shape index: {}]   ;;  %s6775_s7 = inlined_call_operand.vmem [shape: f32[36,4], index: 7, kind: input, shape index: {}]   ;;  %s6776_s8 = inlined_call_operand.vmem [shape: f32[36,4], index: 8, kind: input, shape index: {}]   ;;  %s6777_s9 = inlined_call_operand.vmem [shape: f32[4,1], index: 9, kind: input, shape index: {}]   ;;  %s6778_s10 = inlined_call_operand.hbm [shape: bf16[9,256,256], index: 10, kind: input, shape index: {}]   ;;  %s6779_s11 = inlined_call_operand.hbm [shape: f32[4,8], index: 11, kind: input, shape index: {}]   ;;  %s6780_s12 = inlined_call_operand.vmem [shape: f32[4,1], index: 12, kind: input, shape index: {}]   ;;  %s6781_s13 = inlined_call_operand.vmem [shape: f32[36,4], index: 13, kind: input, shape index: {}]   ;;  %s6782_s14 = inlined_call_operand.vmem [shape: f32[4,1], index: 14, kind: input, shape index: {}]   ;;  %s6783_s15 = inlined_call_operand.vmem [shape: f32[2,4,256], index: 15, kind: output, shape index: {}]  }
   0x1   :  { %6840 = sst [smem:[#allocation63_spill]] %s6772_s4 }
   0x2   :  { %6841 = sst [smem:[#allocation64_spill]] %s6774_s6 }
   0x3   :  { %6842 = sst [smem:[#allocation65_spill]] %s6778_s10 }
   0x4   :  { %6843 = sst [smem:[#allocation66_spill]] %s6779_s11 }
   0x5   :  { %6844 = sst [smem:[#allocation67_spill]] %s6781_s13 }
   0x6   :  { %6845 = sst [smem:[#allocation68_spill]] %s6783_s15 }
   0x7   :  { %20 = vsyncpa [#allocation3], 0 }
   0x8   :  { %22 = vsyncpa [#allocation3 + $0x1], 0 }
   0x9   :  { %23 = vsyncpa [#allocation5], 0 }
   0xa   :  { %24 = vsyncpa [#allocation8], 0  ;;  %s6059_s18 = smov 0   ;;  %s6061_s19 = smov 0  }
   0xb   :  { %s6063_s20 = smov 0   ;;  %s6065_s21 = smov 0  }
   0xc LB: > { %s5970_s22 = smov [#allocation4]   ;;  %s6080_s24 = sadd.s32 4294967295, %s5968_s21   ;;  %s5968_s21 = sphi %s6065_s21, %s6966_s21   ;;  %s5964_s20 = sphi %s6063_s20, %s6965_s20   ;;  %s5960_s19 = sphi %s6061_s19, %s6964_s19   ;;  %s5956_s18 = sphi %s6059_s18, %s6963_s18  }
   0xd   : > { %s406_s23 = sshll.u32 %s5970_s22, 4  ;;  %p4541_p0 = scmp.ge.s32.totalorder %s5968_s21, 1  ;;  %s407_s23 = int_to_ptr.vmem [resolvable:$true] %s406_s23 }
   0xe   : > { %p6785_p1 = scmp.eq.s32.totalorder %s6080_s24, 0  ;;  %p391_p2 = scmp.lt.s32.totalorder %s5968_s21, 3 }
   0xf   : > { %s5971_s26 = smov [#allocation7]   ;;  %s5972_s29 = smov [#allocation6]  }
  0x10   : > { %p6085_p3 = pnand %p4541_p0, %p391_p2  ;;  %s444_s27 = sshll.u32 %s5971_s26, 4  ;;  %s6097_s27 = int_to_ptr.vmem [resolvable:$true] %s444_s27 }
  0x11   : > { %s422_s30 = sshll.u32 %s5972_s29, 4  ;;  %s5805_s16 = scalar_lea.vmem %s407_s23, 4096  ;;  %s6099_s30 = int_to_ptr.vmem [resolvable:$true] %s422_s30 }
  0x12   : > { %s6846_s25 = scalar_select %p6085_p3, 1, 0 }
  0x13   : > { %p4979_p4 = pneg %p6085_p3  ;;  %p5806_p7 = scmp.ne.s32.totalorder %s407_s23, %s5805_s16 }
  0x14   : > { %p5813_p10 = scmp.lt.s32.totalorder %s407_s23, %s407_s23  ;;  %p5814_p11 = scmp.lt.s32.totalorder %s5805_s16, %s5805_s16 }
  0x15   : > { %p6093_p5 = pnand %p4979_p4, %p6785_p1 }
  0x16   : > { %p5815_p12 = por %p5814_p11, %p5813_p10 }
  0x17   : > { %p5796_p6 = pneg %p6093_p5 }
  0x19   : > { %p5808_p8 = pnand %p5806_p7, %p5796_p6 }
  0x1b   : > { %p5809_p9 = pneg %p5808_p8 }
  0x1d   : > { %p5816_p13 = pnand %p5815_p12, %p5809_p9 }
  0x1f   : > { %5819 = shalt.err (!%p5816_p13)
}
  0x20   : > { %s5973_s17 = smov 128   ;;  %s5974_s22 = smov 8  }
  0x21   : > { %s6848_s4 = sld [smem:[#allocation63_spill]]  ;;  %s5831_s15 = scalar_lea.vmem %s6097_s27, 36864 }
  0x22   : > { %p5832_p0 = scmp.ne.s32.totalorder %s6097_s27, %s5831_s15  ;;  %p5839_p7 = scmp.lt.s32.totalorder %s6097_s27, %s6097_s27 }
  0x23   : > { %p5840_p8 = scmp.lt.s32.totalorder %s5831_s15, %s5831_s15 }
  0x24   : > { %p5834_p2 = pnand %p5832_p0, %p5796_p6 }
  0x25   : > { %p5841_p9 = por %p5840_p8, %p5839_p7 }
  0x26   : > { %p5835_p4 = pneg %p5834_p2 }
  0x27   : > { %4982 = dma.hbm_to_vmem [thread:$0]  (!%p6093_p5), %s6848_s4, 4096, %s407_s23, [#allocation5], %s5973_s17, %s5973_s17, %s5974_s22  }
  0x28   : > { %p5842_p10 = pnand %p5841_p9, %p5835_p4 }
  0x2a   : > { %5845 = shalt.err (!%p5842_p10)
}
  0x2b   : > { %s6849_s10 = sld [smem:[#allocation65_spill]]  ;;  %s5857_s23 = scalar_lea.vmem %s6099_s30, 5248 }
  0x2c   : > { %p5858_p11 = scmp.ne.s32.totalorder %s6099_s30, %s5857_s23  ;;  %p5865_p0 = scmp.lt.s32.totalorder %s6099_s30, %s6099_s30 }
  0x2d   : > { %p5866_p2 = scmp.lt.s32.totalorder %s5857_s23, %s5857_s23 }
  0x2e   : > { %p5860_p12 = pnand %p5858_p11, %p5796_p6 }
  0x2f   : > { %p5867_p4 = por %p5866_p2, %p5865_p0 }
  0x30   : > { %p5861_p13 = pneg %p5860_p12 }
  0x31   : > { %4988 = dma.hbm_to_vmem [thread:$0]  (!%p6093_p5), %s6849_s10, 36864, %s6097_s27, [#allocation8], %s5973_s17, %s5973_s17, %s5974_s22  }
  0x32   : > { %p5868_p7 = pnand %p5867_p4, %p5861_p13 }
  0x34   : > { %5871 = shalt.err (!%p5868_p7)
}
  0x35   : > { %s6850_s6 = sld [smem:[#allocation64_spill]]  ;;  %s5975_s27 = smov [#allocation9]  }
  0x36   : > { %s458_s26 = sshll.u32 %s5975_s27, 4  ;;  %s459_s26 = int_to_ptr.vmem [resolvable:$true] %s458_s26 }
  0x37   : > { %s5883_s29 = scalar_lea.vmem %s459_s26, 64  ;;  %p5891_p11 = scmp.lt.s32.totalorder %s459_s26, %s459_s26 }
  0x38   : > { %p5884_p8 = scmp.ne.s32.totalorder %s459_s26, %s5883_s29  ;;  %p5892_p12 = scmp.lt.s32.totalorder %s5883_s29, %s5883_s29 }
  0x3a   : > { %p5886_p9 = pnand %p5884_p8, %p5796_p6  ;;  %p5893_p13 = por %p5892_p12, %p5891_p11 }
  0x3b   : > { %4985 = dma.hbm_to_vmem [thread:$0]  (!%p6093_p5), %s6850_s6, 5248, %s6099_s30, [#allocation5], %s5973_s17, %s5973_s17, %s5974_s22  }
  0x3c   : > { %p5887_p10 = pneg %p5886_p9 }
  0x3e   : > { %p5894_p0 = pnand %p5893_p13, %p5887_p10 }
  0x40   : > { %5897 = shalt.err (!%p5894_p0)
}
  0x41   : > { %s6851_s11 = sld [smem:[#allocation66_spill]]  ;;  %s6146_s30 = sadd.s32 1, %s5968_s21  }
  0x42   : > { %s89_s28 = sadd.s32 1, %s5964_s20  ;;  %s86_s17 = ssub.s32 %s5968_s21, %s6146_s30 }
  0x43   : > { %p96_p6 = scmp.ne.s32.totalorder %s5964_s20, %s5960_s19  ;;  %p87_p2 = scmp.eq.s32.totalorder %s86_s17, 0 }
  0x44   : > { %p97_p4 = scmp.eq.s32.totalorder %s5968_s21, 0  ;;  %p102_p7 = scmp.ne.s32.totalorder %s5960_s19, %s5956_s18 }
  0x45   : > { %p5000_p8 = scmp.lt.s32.totalorder %s5968_s21, 2  ;;  %s493_s15 = sand.u32 1, %s5964_s20  }
  0x46   : > { %s6158_s22 = scalar_select %p87_p2, %s5964_s20, %s89_s28  }
  0x47   : > { %4991 = dma.hbm_to_vmem [thread:$0]  (!%p6093_p5), %s6851_s11, 64, %s459_s26, [#allocation8]  }
  0x48   : > { %p98_p9 = por %p97_p4, %p96_p6  ;;  %p6162_p10 = por %p6785_p1, %p102_p7 }
  0x49   : > { %s4547_s27 = sshll.u32 %s5968_s21, 4  ;;  %s496_s18 = scalar_lea.vmem [#allocation2], %s493_s15 }
  0x4a   : > { %s6852_s13 = scalar_select %p6162_p10, 1, 0 }
  0x4b   : > { %s6171_s16 = scalar_lea.hbm %s6770_s2, %s4547_s27  ;;  %s503_s23 = sshll.u32 %s496_s18, 4  ;;  %s504_s23 = int_to_ptr.vmem [resolvable:$true] %s503_s23 }
  0x4c   : > { %p6173_p5 = pnand %p5000_p8, %p98_p9  ;;  %s494_s17 = scalar_lea.sflag [#allocation3], %s493_s15 }
  0x4d   : > { %s5898_s4 = scalar_lea.hbm %s6171_s16, 16  ;;  %s5903_s26 = scalar_lea.hbm %s6770_s2, 32 }
  0x4e   : > { %p5899_p11 = scmp.ne.s32.totalorder %s6171_s16, %s5898_s4  ;;  %p5900_p12 = pneg %p6173_p5 }
  0x4f   : > { %p5904_p6 = scmp.lt.s32.totalorder %s6171_s16, %s6770_s2  ;;  %p5905_p2 = scmp.lt.s32.totalorder %s5903_s26, %s5898_s4 }
  0x50   : > { %p5901_p13 = pnand %p5900_p12, %p5899_p11 }
  0x51   : > { %p5906_p4 = por %p5905_p2, %p5904_p6 }
  0x52   : > { %p5902_p0 = pneg %p5901_p13 }
  0x54   : > { %p5907_p7 = pnand %p5906_p4, %p5902_p0 }
  0x56   : > { %5910 = shalt.err (!%p5907_p7)
}
  0x57   : > { %s5911_s18 = scalar_lea.vmem %s504_s23, 16  ;;  %s5976_s15 = smov [#allocation2]  }
  0x58   : > { %p5912_p8 = scmp.ne.s32.totalorder %s504_s23, %s5911_s18  ;;  %s5916_s10 = sshll.u32 %s5976_s15, 4  ;;  %s5917_s10 = int_to_ptr.vmem [resolvable:$false] %s5916_s10 }
  0x59   : > { %s5918_s11 = scalar_lea.vmem %s5917_s10, 32  ;;  %p5919_p11 = scmp.lt.s32.totalorder %s504_s23, %s5917_s10 }
  0x5a   : > { %p5914_p9 = pnand %p5912_p8, %p5900_p12  ;;  %p5920_p13 = scmp.lt.s32.totalorder %s5918_s11, %s5911_s18 }
  0x5c   : > { %p5915_p1 = pneg %p5914_p9  ;;  %p5921_p10 = por %p5920_p13, %p5919_p11 }
  0x5e   : > { %p5922_p3 = pnand %p5921_p10, %p5915_p1 }
  0x60   : > { %5925 = shalt.err (!%p5922_p3)
}
  0x61   : > { %4995 = dma.hbm_to_vmem [thread:$0]  (!%p6173_p5), %s6171_s16, 16, %s504_s23, %s494_s17  }
  0x62   : > { %p6854_p0 = scmp.ne.s32.totalorder %s6846_s25, 0 }
  0x64   : > { %512 = sbr.rel (%p6854_p0) target bundleno = 1943 (0x797), region = 80 }
  0x69   : > { %s514_s4 = sand.u32 1, %s5960_s19   ;;  %p6855_p12 = scmp.ne.s32.totalorder %s6852_s13, 0 }
  0x6a   : > { %s515_s6 = scalar_lea.sflag [#allocation3], %s514_s4  ;;  %s6194_s21 = scalar_lea.vmem [#allocation2], %s514_s4 }
  0x6b   : > { %5943 = dma.done.wait (%p6855_p12), %s515_s6, 16  }
  0x6c   : > { %5945 = vsyncadd (%p6855_p12), %s515_s6, 4294967280  ;;  %p6856_p1 = scmp.eq.s32.totalorder %s6080_s24, 0 }
  0x6e   : > { %5947 = dma.done.wait (%p6856_p1), [#allocation5], 9344   ;;  %p6857_p3 = pmov %p6856_p1 }
  0x6f   : > { %p6858_p10 = pmov %p6856_p1 }
  0x70   : > { %5949 = vsyncadd (%p6857_p3), [#allocation5], 4294957952 }
  0x71   : > { %5951 = dma.done.wait (%p6858_p10), [#allocation8], 36928   ;;  %p6859_p5 = pmov %p6856_p1 }
  0x72   : > { %p588_p6 = scmp.lt.s32.totalorder %s6080_s24, 1  ;;  %vm606_vm0 = vcmask 64512   ;;  %v604_v1 = vld [vmem:[%s6771_s3] sm:$0xff]  ;;  %v605_v2 = vld [vmem:[%s6771_s3 + $0x8] sm:$0xff]  ;;  %v5047_v3 = vld [vmem:[#allocation4 + $0x30] ss:$8 sps:$4 sm:$0xff]  }
  0x73   : > { %5953 = vsyncadd (%p6859_p5), [#allocation8], 4294930368  ;;  %4957 = vmatprep.mubr.msk.f32.mxu0 %vm606_vm0, %v604_v1  ;;  %v5049_v4 = vld [vmem:[#allocation4 + $0x34] ss:$8 sps:$4 sm:$0xff]   ;;  %v5052_v6 = vld [vmem:[#allocation4 + $0x70] ss:$8 sps:$4 sm:$0xff]  }
  0x74   : > { %s6968_s24 = smov (!%p588_p6, %s6080_s24), 1  ;;  %v5050_v5 = vld [vmem:[#allocation4 + $0x74] ss:$8 sps:$4 sm:$0xff]   ;;  %v5053_v7 = vld [vmem:[#allocation4 + $0x20] ss:$8 sps:$4 sm:$0xff]   ;;  %v5977_v20 = vmov 0  }
  0x75   : > { %s4553_s10 = sshll.u32 %s6968_s24, 3  ;;  %760 = vmatprep.subr.bf16.mxu1 %v5050_v5  ;;  %v5055_v8 = vld [vmem:[#allocation4 + $0x24] ss:$8 sps:$4 sm:$0xff]   ;;  %v5058_v10 = vld [vmem:[#allocation4 + $0x60] ss:$8 sps:$4 sm:$0xff]   ;;  %784 = vmatprep.mubr.bf16.mxu1 %v5977_v20  ;;  %vm748_vm1 = vcmask 523264  }
  0x76   : > { %s591_s13 = scalar_lea.vmem %s6768_s0, %s4553_s10  ;;  %761 = vmatpush1.bf16.msra.mxu1 %v5052_v6  ;;  %v5056_v9 = vld [vmem:[#allocation4 + $0x64] ss:$8 sps:$4 sm:$0xff]   ;;  %v5059_v11 = vld [vmem:[#allocation4 + $0x10] ss:$8 sps:$4 sm:$0xff]   ;;  %v5061_v12 = vld [vmem:[#allocation4 + $0x14] ss:$8 sps:$4 sm:$0xff]   ;;  %5045 = vset.pattern.permute.xlu0 %v5977_v20 }
  0x77   : > { %v603_v0 = vld [vmem:[%s591_s13] sm:$0xff]  ;;  %762 = vmatprep.subr.bf16.mxu1 %v5056_v9  ;;  %v5064_v14 = vld [vmem:[#allocation4 + $0x50] ss:$8 sps:$4 sm:$0xff]   ;;  %5046 = vset.pattern.permute.xlu1 %v5977_v20  ;;  %s4960_s29 = smul.u32 12, %s6968_s24  ;;  %vm1336_vm2 = vcmask 1041408   ;;  %vm1332_vm3 = vcmask 556032  }
  0x78   : > { %4955 = vmatprep.subr.mxu0 %v603_v0  ;;  %v5062_v13 = vld [vmem:[#allocation4 + $0x54] ss:$8 sps:$4 sm:$0xff]   ;;  %v5067_v15 = vld [vmem:[#allocation4 + $0x4] ss:$8 sps:$4 sm:$0xff]   ;;  %v5065_v16 = vld [vmem:[#allocation4] ss:$8 sps:$4 sm:$0xff]  }
  0x79   : > { %4956 = vmatpush3.msra.mxu0 %v603_v0  ;;  %v5068_v17 = vld [vmem:[#allocation4 + $0x44] ss:$8 sps:$4 sm:$0xff]   ;;  %v5070_v18 = vld [vmem:[#allocation4 + $0x40] ss:$8 sps:$4 sm:$0xff]   ;;  %v5073_v19 = vld [vmem:[#allocation4 + $0xf4] ss:$8 sps:$4 sm:$0xff]   ;;  %s6239_s4 = scalar_lea.vmem %s6769_s1, %s4960_s29 }
  0x7a   : > { %4958 = vmatmul.mubr.msk.f32.vlgmr.msra.gmra.mxu0 %vm606_vm0, %v605_v2  ;;  %844 = vmatprep.subr.bf16.mxu0 %v5049_v4  ;;  %v5076_v21 = vld [vmem:[#allocation4 + $0xb4] ss:$8 sps:$4 sm:$0xff]   ;;  %v5071_v25 = vld [vmem:[#allocation4 + $0xf0] ss:$8 sps:$4 sm:$0xff]   ;;  %v5079_v27 = vld [vmem:[#allocation4 + $0xe4] ss:$8 sps:$4 sm:$0xff]  }
  0x7b   : > { %845 = vmatpush1.bf16.msra.mxu0 %v5047_v3  ;;  %763 = vmatpush1.bf16.msra.mxu1 %v5058_v10  ;;  %v1070_v22 = vld [vmem:[%s6773_s5] sm:$0xf]  ;;  %v5074_v28 = vld [vmem:[#allocation4 + $0xb0] ss:$8 sps:$4 sm:$0xff]   ;;  %v5082_v30 = vld [vmem:[#allocation4 + $0xa4] ss:$8 sps:$4 sm:$0xff]  }
  0x7c   : > { %846 = vmatprep.subr.bf16.mxu0 %v5055_v8  ;;  %764 = vmatprep.subr.bf16.mxu1 %v5062_v13  ;;  %v5077_v31 = vld [vmem:[#allocation4 + $0xe0] ss:$8 sps:$4 sm:$0xff]   ;;  %v5085_v32 = vld [vmem:[#allocation4 + $0xd4] ss:$8 sps:$4 sm:$0xff]   ;;  %v5083_v35 = vld [vmem:[#allocation4 + $0xd0] ss:$8 sps:$4 sm:$0xff]  }
  0x7d   : > { %868 = vmatprep.mubr.bf16.mxu0 %v5977_v20  ;;  %1073 = vperm.xlu0 %5045, %v1070_v22   ;;  %v5080_v33 = vld [vmem:[#allocation4 + $0xa0] ss:$8 sps:$4 sm:$0xff]   ;;  %v5088_v34 = vld [vmem:[#allocation4 + $0x94] ss:$8 sps:$4 sm:$0xff]   ;;  %v5091_v36 = vld [vmem:[#allocation4 + $0xc4] ss:$8 sps:$4 sm:$0xff]  }
  0x7e   : > { %v5086_v37 = vld [vmem:[#allocation4 + $0x90] ss:$8 sps:$4 sm:$0xff]   ;;  %v1126_v38 = vld [vmem:[#allocation6 + $0x140] sm:$0x33]  ;;  %v5097_v47 = vld [vmem:[#allocation6 + $0x74] ss:$8 sps:$4 sm:$0xff]  }
  0x7f   : > { %847 = vmatpush1.bf16.msra.mxu0 %v5053_v7  ;;  %765 = vmatpush1.bf16.msra.mxu1 %v5064_v14  ;;  %v5094_v39 = vld [vmem:[#allocation4 + $0x84] ss:$8 sps:$4 sm:$0xff]   ;;  %v5089_v41 = vld [vmem:[#allocation4 + $0xc0] ss:$8 sps:$4 sm:$0xff]   ;;  %v4636_v43 = vcombine.high %v1126_v38, %v1126_v38  ;;  %v4635_v44 = vcombine.low %v1126_v38, %v1126_v38  ;;  %v5132_v50 = vld [vmem:[#allocation6 + $0x134] ss:$8 sps:$4 sm:$0xff]  }
  0x80   : > { %848 = vmatprep.subr.bf16.mxu0 %v5061_v12  ;;  %766 = vmatprep.subr.bf16.mxu1 %v5068_v17  ;;  %v6242_v40 = vld [vmem:[%s6239_s4] sm:$0xff]  ;;  %v5095_v51 = vld [vmem:[#allocation6 + $0x70] ss:$8 sps:$4 sm:$0xff]   ;;  %v1079_v2 = vld [vmem:[%s6239_s4 + $0x8] sm:$0xf]  ;;  %vm1451_vm4 = vcmask 1043456  }
  0x81   : > { %v5092_v45 = vld [vmem:[#allocation4 + $0x80] ss:$8 sps:$4 sm:$0xff]   ;;  %v1081_v46 = vcombine.high %v6242_v40, %v6242_v40  ;;  %v1338_v49 = vsel %vm1336_vm2, %v4635_v44, 0  ;;  %v5100_v53 = vld [vmem:[#allocation6 + $0x64] ss:$8 sps:$4 sm:$0xff]   ;;  %v1085_v5 = vpack.c.bf16 %v1079_v2, %v1079_v2  ;;  %vm1435_vm5 = vcmask 31744  }
  0x82   : > { %v5130_v54 = vld [vmem:[#allocation6 + $0x130] ss:$8 sps:$4 sm:$0xff]   ;;  %v5138_v55 = vld [vmem:[#allocation6 + $0x124] ss:$8 sps:$4 sm:$0xff]   ;;  %v5098_v56 = vld [vmem:[#allocation6 + $0x60] ss:$8 sps:$4 sm:$0xff]  }
  0x83   : > { %849 = vmatpush1.bf16.msra.mxu0 %v5059_v11  ;;  %767 = vmatpush1.bf16.msra.mxu1 %v5070_v18  ;;  %v1084_v52 = vpack.c.bf16 %v1081_v46, %v1081_v46  ;;  %v5103_v57 = vld [vmem:[#allocation6 + $0x54] ss:$8 sps:$4 sm:$0xff]   ;;  %v5136_v58 = vld [vmem:[#allocation6 + $0x120] ss:$8 sps:$4 sm:$0xff]   ;;  %v5101_v60 = vld [vmem:[#allocation6 + $0x50] ss:$8 sps:$4 sm:$0xff]  }
  0x84   : > { %850 = vmatprep.subr.bf16.mxu0 %v5067_v15  ;;  %938 = vmatprep.subr.bf16.mxu1 %v5076_v21  ;;  %v5144_v59 = vld [vmem:[#allocation6 + $0x114] ss:$8 sps:$4 sm:$0xff]   ;;  %v5106_v61 = vld [vmem:[#allocation6 + $0x44] ss:$8 sps:$4 sm:$0xff]   ;;  %v5142_v62 = vld [vmem:[#allocation6 + $0x110] ss:$8 sps:$4 sm:$0xff]  }
  0x85   : > { %v5150_v63 = vld [vmem:[#allocation6 + $0x104] ss:$8 sps:$4 sm:$0xff]   ;;  %v5104_v0 = vld [vmem:[#allocation6 + $0x40] ss:$8 sps:$4 sm:$0xff]   ;;  %v5109_v1 = vld [vmem:[#allocation6 + $0x34] ss:$8 sps:$4 sm:$0xff]  }
  0x86   : > { %v5148_v3 = vld [vmem:[#allocation6 + $0x100] ss:$8 sps:$4 sm:$0xff]   ;;  %v5107_v4 = vld [vmem:[#allocation6 + $0x30] ss:$8 sps:$4 sm:$0xff]   ;;  %v5112_v6 = vld [vmem:[#allocation6 + $0x24] ss:$8 sps:$4 sm:$0xff]  }
  0x87   : > { %851 = vmatpush1.bf16.msra.mxu0 %v5065_v16  ;;  %v5110_v7 = vld [vmem:[#allocation6 + $0x20] ss:$8 sps:$4 sm:$0xff]   ;;  %v5115_v8 = vld [vmem:[#allocation6 + $0x14] ss:$8 sps:$4 sm:$0xff]   ;;  %v5113_v9 = vld [vmem:[#allocation6 + $0x10] ss:$8 sps:$4 sm:$0xff]  }
  0x88   : > { %1035 = vmatprep.subr.bf16.mxu0 %v5073_v19  ;;  %v5118_v10 = vld [vmem:[#allocation6 + $0x4] ss:$8 sps:$4 sm:$0xff]   ;;  %v5116_v11 = vld [vmem:[#allocation6] ss:$8 sps:$4 sm:$0xff]   ;;  %v5121_v12 = vld [vmem:[#allocation6 + $0xf4] ss:$8 sps:$4 sm:$0xff]  }
  0x89   : > { %v5119_v13 = vld [vmem:[#allocation6 + $0xf0] ss:$8 sps:$4 sm:$0xff]   ;;  %v5124_v14 = vld [vmem:[#allocation6 + $0xe4] ss:$8 sps:$4 sm:$0xff]   ;;  %v5122_v15 = vld [vmem:[#allocation6 + $0xe0] ss:$8 sps:$4 sm:$0xff]  }
  0x8a   : > { %v5129_v16 = vld [vmem:[#allocation6 + $0xd4] ss:$8 sps:$4 sm:$0xff]   ;;  %v5127_v17 = vld [vmem:[#allocation6 + $0xd0] ss:$8 sps:$4 sm:$0xff]   ;;  %v5135_v18 = vld [vmem:[#allocation6 + $0xc4] ss:$8 sps:$4 sm:$0xff]  }
  0x8b   : > { %v5133_v19 = vld [vmem:[#allocation6 + $0xc0] ss:$8 sps:$4 sm:$0xff]   ;;  %v5139_v21 = vld [vmem:[#allocation6 + $0xb0] ss:$8 sps:$4 sm:$0xff]   ;;  %v5147_v22 = vld [vmem:[#allocation6 + $0xa4] ss:$8 sps:$4 sm:$0xff]  }
  0x8c   : > { %vm3848_vm6 = vcmask 60416   ;;  %s6911_s4 = sld [smem:[#allocation67_spill]] }
  0x8d   : > { %s6962_s26 = sld [smem:[#allocation68_spill]] }
  0x93   : > { %s601_s29 = scalar_lea.vmem %s6962_s26, %s4553_s10 }
 0x13a   : > { %v4959_v23 = vpop.f32.mrf.mxu0 }
 0x13b   : > { %v877_v42 = vpack.c.bf16 %v4959_v23, %v4959_v23  ;;  %v5145_v23 = vld [vmem:[#allocation6 + $0xa0] ss:$8 sps:$4 sm:$0xff]  }
 0x13c   : > { %v679_v24 = vpop.f32.mrf.mxu0 }
 0x13d   : > { %v688_v26 = vpack.c.bf16 %v679_v24, %v679_v24  ;;  %v983_v48 = vrot.slane %v877_v42, 2  ;;  %v5153_v24 = vld [vmem:[#allocation6 + $0x94] ss:$8 sps:$4 sm:$0xff]  }
 0x13f   : > { %v707_v29 = vrot.slane %v688_v26, 2  ;;  %4576 = vmatmul.mubr.msk.bf16.vlgmr.msra.gmra.mxu0 %vm748_vm1, %v688_v26  ;;  %v5156_v26 = vld [vmem:[#allocation6 + $0x84] ss:$8 sps:$4 sm:$0xff]  }
 0x140   : > { %1036 = vmatpush1.bf16.msra.mxu0 %v5071_v25  ;;  %1059 = vmatprep.mubr.bf16.mxu0 %v5977_v20  ;;  %v5151_v25 = vld [vmem:[#allocation6 + $0x90] ss:$8 sps:$4 sm:$0xff]  }
 0x141   : > { %4567 = vmatmul.mubr.msk.bf16.vlgmr.msra.gmra.mxu1 %vm748_vm1, %v707_v29  ;;  %1037 = vmatprep.subr.bf16.mxu0 %v5079_v27  ;;  %v5154_v27 = vld [vmem:[#allocation6 + $0x80] ss:$8 sps:$4 sm:$0xff]   ;;  %v6788_v29 = vmov 0.0  }
 0x142   : > { %939 = vmatpush1.bf16.msra.mxu1 %v5074_v28  ;;  %962 = vmatprep.mubr.bf16.mxu1 %v5977_v20  ;;  %v1083_v28 = vpack.c.bf16 %v6242_v40, %v6242_v40  ;;  %v5170_v40 = vld [vmem:[#allocation7 + $0x50] ss:$8 sps:$4 sm:$0xff]  }
 0x143   : > { %940 = vmatprep.subr.bf16.mxu1 %v5082_v30  ;;  %v5158_v30 = vld [vmem:[#allocation7 + $0x70] ss:$8 sps:$4 sm:$0xff]  }
 0x144   : > { %1038 = vmatpush1.bf16.msra.mxu0 %v5077_v31  ;;  %v5160_v31 = vld [vmem:[#allocation7 + $0x74] ss:$8 sps:$4 sm:$0xff]  }
 0x145   : > { %1039 = vmatprep.subr.bf16.mxu0 %v5085_v32  ;;  %v5166_v32 = vld [vmem:[#allocation7 + $0x64] ss:$8 sps:$4 sm:$0xff]  }
 0x146   : > { %941 = vmatpush1.bf16.msra.mxu1 %v5080_v33 }
 0x147   : > { %942 = vmatprep.subr.bf16.mxu1 %v5088_v34  ;;  %v5164_v34 = vld [vmem:[#allocation7 + $0x60] ss:$8 sps:$4 sm:$0xff]  }
 0x148   : > { %1040 = vmatpush1.bf16.msra.mxu0 %v5083_v35  ;;  %v5172_v35 = vld [vmem:[#allocation7 + $0x54] ss:$8 sps:$4 sm:$0xff]  }
 0x149   : > { %1041 = vmatprep.subr.bf16.mxu0 %v5091_v36 }
 0x14a   : > { %943 = vmatpush1.bf16.msra.mxu1 %v5086_v37 }
 0x14b   : > { %944 = vmatprep.subr.bf16.mxu1 %v5094_v39 }
 0x14c   : > { %1042 = vmatpush1.bf16.msra.mxu0 %v5089_v41 }
 0x14d   : > { %4637 = vmatprep.subr.msk.bf16.mxu0 %vm1336_vm2, %v4636_v43  ;;  %v5178_v43 = vld [vmem:[#allocation7 + $0x44] ss:$8 sps:$4 sm:$0xff]  }
 0x14e   : > { %945 = vmatpush1.bf16.msra.mxu1 %v5092_v45 }
 0x14f   : > { %4594 = vmatmul.mubr.msk.bf16.vlgmr.msra.gmra.mxu0 %vm748_vm1, %v983_v48  ;;  %1343 = vmatprep.subr.bf16.mxu1 %v5097_v47  ;;  %v5176_v47 = vld [vmem:[#allocation7 + $0x40] ss:$8 sps:$4 sm:$0xff]   ;;  %v5184_v48 = vld [vmem:[#allocation7 + $0x34] ss:$8 sps:$4 sm:$0xff]  }
 0x150   : > { %1391 = vmatpush1.bf16.msra.mxu0 %v1338_v49  ;;  %1416 = vmatprep.mubr.bf16.mxu0 %v5977_v20  ;;  %v5141_v20 = vld [vmem:[#allocation6 + $0xb4] ss:$8 sps:$4 sm:$0xff]   ;;  %v5182_v49 = vld [vmem:[#allocation7 + $0x30] ss:$8 sps:$4 sm:$0xff]  }
 0x151   : > { %4585 = vmatmul.mubr.msk.bf16.vlgmr.msra.gmra.mxu1 %vm748_vm1, %v877_v42  ;;  %1392 = vmatprep.subr.bf16.mxu0 %v5132_v50  ;;  %v5190_v50 = vld [vmem:[#allocation7 + $0x24] ss:$8 sps:$4 sm:$0xff]  }
 0x152   : > { %1344 = vmatpush1.bf16.msra.mxu1 %v5095_v51  ;;  %1375 = vmatprep.mubr.bf16.mxu1 %v1084_v52  ;;  %v5188_v52 = vld [vmem:[#allocation7 + $0x20] ss:$8 sps:$4 sm:$0xff]  }
 0x153   : > { %1345 = vmatprep.subr.bf16.mxu1 %v5100_v53  ;;  %v5196_v53 = vld [vmem:[#allocation7 + $0x14] ss:$8 sps:$4 sm:$0xff]  }
 0x154   : > { %1393 = vmatpush1.bf16.msra.mxu0 %v5130_v54 }
 0x155   : > { %1394 = vmatprep.subr.bf16.mxu0 %v5138_v55 }
 0x156   : > { %1346 = vmatpush1.bf16.msra.mxu1 %v5098_v56 }
 0x157   : > { %1347 = vmatprep.subr.bf16.mxu1 %v5103_v57 }
 0x158   : > { %1395 = vmatpush1.bf16.msra.mxu0 %v5136_v58 }
 0x159   : > { %1396 = vmatprep.subr.bf16.mxu0 %v5144_v59  ;;  %v5194_v59 = vld [vmem:[#allocation7 + $0x10] ss:$8 sps:$4 sm:$0xff]  }
 0x15a   : > { %1348 = vmatpush1.bf16.msra.mxu1 %v5101_v60 }
 0x15b   : > { %1349 = vmatprep.subr.bf16.mxu1 %v5106_v61 }
 0x15c   : > { %1397 = vmatpush1.bf16.msra.mxu0 %v5142_v62  ;;  %v5202_v62 = vld [vmem:[#allocation7 + $0x4] ss:$8 sps:$4 sm:$0xff]  }
 0x15d   : > { %1398 = vmatprep.subr.bf16.mxu0 %v5150_v63 }
 0x15e   : > { %1350 = vmatpush1.bf16.msra.mxu1 %v5104_v0 }
 0x15f   : > { %1351 = vmatprep.subr.bf16.mxu1 %v5109_v1 }
 0x160   : > { %1399 = vmatpush1.bf16.msra.mxu0 %v5148_v3  ;;  %v5200_v3 = vld [vmem:[#allocation7] ss:$8 sps:$4 sm:$0xff]  }
 0x162   : > { %1352 = vmatpush1.bf16.msra.mxu1 %v5107_v4  ;;  %v5208_v4 = vld [vmem:[#allocation7 + $0xf4] ss:$8 sps:$4 sm:$0xff]  }
 0x163   : > { %1353 = vmatprep.subr.bf16.mxu1 %v5112_v6  ;;  %4638 = vmatmul.mubr.msk.bf16.vlgmr.msra.gmra.mxu0 %vm1332_vm3, %v1085_v5  ;;  %v5206_v5 = vld [vmem:[#allocation7 + $0xf0] ss:$8 sps:$4 sm:$0xff]   ;;  %v5214_v6 = vld [vmem:[#allocation7 + $0xe4] ss:$8 sps:$4 sm:$0xff]  }
 0x164   : > { %1522 = vmatprep.mubr.f32.mxu0 %v6788_v29 }
 0x166   : > { %1354 = vmatpush1.bf16.msra.mxu1 %v5110_v7  ;;  %v5212_v7 = vld [vmem:[#allocation7 + $0xe0] ss:$8 sps:$4 sm:$0xff]  }
 0x167   : > { %1355 = vmatprep.subr.bf16.mxu1 %v5115_v8 }
 0x16a   : > { %1356 = vmatpush1.bf16.msra.mxu1 %v5113_v9 }
 0x16b   : > { %1357 = vmatprep.subr.bf16.mxu1 %v5118_v10 }
 0x16e   : > { %1358 = vmatpush1.bf16.msra.mxu1 %v5116_v11 }
 0x16f   : > { %1359 = vmatprep.subr.bf16.mxu1 %v5121_v12 }
 0x172   : > { %1360 = vmatpush2.bf16.msra.mxu1 %v5119_v13 }
 0x173   : > { %1361 = vmatprep.subr.bf16.mxu1 %v5124_v14  ;;  %v1074_v14 = vpop.permute.xlu0 %1073 }
 0x176   : > { %1362 = vmatpush2.bf16.msra.mxu1 %v5122_v15 }
 0x177   : > { %1363 = vmatprep.subr.bf16.mxu1 %v5129_v16 }
 0x17a   : > { %1364 = vmatpush2.bf16.msra.mxu1 %v5127_v17 }
 0x17b   : > { %1365 = vmatprep.subr.bf16.mxu1 %v5135_v18  ;;  %v1430_v18 = vld [vmem:[%s6776_s8] sm:$0xff] }
 0x17e   : > { %1366 = vmatpush2.bf16.msra.mxu1 %v5133_v19 }
 0x17f   : > { %1367 = vmatprep.subr.bf16.mxu1 %v5141_v20  ;;  %v5163_v20 = vld [vmem:[#allocation7 + $0x174] ss:$8 sps:$4 sm:$0xff]  }
 0x182   : > { %1368 = vmatpush2.bf16.msra.mxu1 %v5139_v21 }
 0x183   : > { %1369 = vmatprep.subr.bf16.mxu1 %v5147_v22 }
 0x186   : > { %1370 = vmatpush2.bf16.msra.mxu1 %v5145_v23  ;;  %v1431_v23 = vld [vmem:[%s6776_s8 + $0x8] sm:$0xff] }
 0x187   : > { %1371 = vmatprep.subr.bf16.mxu1 %v5153_v24  ;;  %v1432_v24 = vld [vmem:[%s6776_s8 + $0x10] sm:$0xff] }
 0x18a   : > { %1372 = vmatpush2.bf16.msra.mxu1 %v5151_v25  ;;  %v1433_v25 = vld [vmem:[%s6776_s8 + $0x18] sm:$0xff] }
 0x18b   : > { %1373 = vmatprep.subr.bf16.mxu1 %v5156_v26  ;;  %v1434_v26 = vld [vmem:[%s6776_s8 + $0x20] sm:$0xf] }
 0x18e   : > { %1374 = vmatpush2.bf16.msra.mxu1 %v5154_v27  ;;  %v1425_v27 = vld [vmem:[%s6775_s7] sm:$0xff] }
 0x18f   : > { %2103 = vmatprep.subr.bf16.mxu1 %v5160_v31  ;;  %v1426_v31 = vld [vmem:[%s6775_s7 + $0x8] sm:$0xff] }
 0x191   : > { %1376 = vmatmul.mubr.bf16.vlgmr.msra.gmra.mxu1 %v1083_v28  ;;  %v5161_v28 = vld [vmem:[#allocation7 + $0x170] ss:$8 sps:$4 sm:$0xff]  }
 0x192   : > { %2104 = vmatpush1.bf16.msra.mxu1 %v5158_v30  ;;  %v5169_v30 = vld [vmem:[#allocation7 + $0x164] ss:$8 sps:$4 sm:$0xff]  }
 0x193   : > { %2105 = vmatprep.subr.bf16.mxu1 %v5166_v32  ;;  %v5167_v32 = vld [vmem:[#allocation7 + $0x160] ss:$8 sps:$4 sm:$0xff]  }
 0x196   : > { %2106 = vmatpush1.bf16.msra.mxu1 %v5164_v34  ;;  %v1427_v34 = vld [vmem:[%s6775_s7 + $0x10] sm:$0xff] }
 0x197   : > { %2107 = vmatprep.subr.bf16.mxu1 %v5172_v35  ;;  %v5173_v35 = vld [vmem:[#allocation7 + $0x150] ss:$8 sps:$4 sm:$0xff]  }
 0x19a   : > { %2108 = vmatpush1.bf16.msra.mxu1 %v5170_v40  ;;  %v5185_v40 = vld [vmem:[#allocation7 + $0x130] ss:$8 sps:$4 sm:$0xff]  }
 0x19b   : > { %2109 = vmatprep.subr.bf16.mxu1 %v5178_v43  ;;  %v5191_v43 = vld [vmem:[#allocation7 + $0x120] ss:$8 sps:$4 sm:$0xff]  }
 0x19e   : > { %2110 = vmatpush1.bf16.msra.mxu1 %v5176_v47  ;;  %v5203_v47 = vld [vmem:[#allocation7 + $0x100] ss:$8 sps:$4 sm:$0xff]  }
 0x19f   : > { %2111 = vmatprep.subr.bf16.mxu1 %v5184_v48  ;;  %v5211_v48 = vld [vmem:[#allocation7 + $0x1f4] ss:$8 sps:$4 sm:$0xff]  }
 0x1a2   : > { %2112 = vmatpush1.bf16.msra.mxu1 %v5182_v49  ;;  %v5209_v49 = vld [vmem:[#allocation7 + $0x1f0] ss:$8 sps:$4 sm:$0xff]  }
 0x1a3   : > { %2113 = vmatprep.subr.bf16.mxu1 %v5190_v50  ;;  %v5217_v50 = vld [vmem:[#allocation7 + $0x1e4] ss:$8 sps:$4 sm:$0xff]  }
 0x1a6   : > { %2114 = vmatpush1.bf16.msra.mxu1 %v5188_v52  ;;  %v5220_v52 = vld [vmem:[#allocation7 + $0xd4] ss:$8 sps:$4 sm:$0xff]  }
 0x1a7   : > { %2115 = vmatprep.subr.bf16.mxu1 %v5196_v53  ;;  %v5218_v53 = vld [vmem:[#allocation7 + $0xd0] ss:$8 sps:$4 sm:$0xff]  }
 0x1aa   : > { %2116 = vmatpush1.bf16.msra.mxu1 %v5194_v59  ;;  %v5227_v59 = vld [vmem:[#allocation7 + $0x1c0] ss:$8 sps:$4 sm:$0xff]  }
 0x1ab   : > { %2117 = vmatprep.subr.bf16.mxu1 %v5202_v62  ;;  %v5235_v62 = vld [vmem:[#allocation7 + $0x1b4] ss:$8 sps:$4 sm:$0xff]  }
 0x1ae   : > { %2118 = vmatpush1.bf16.msra.mxu1 %v5200_v3  ;;  %v5239_v3 = vld [vmem:[#allocation7 + $0x1a0] ss:$8 sps:$4 sm:$0xff]  }
 0x1af   : > { %2119 = vmatprep.subr.bf16.mxu1 %v5208_v4  ;;  %v5244_v4 = vld [vmem:[#allocation7 + $0x94] ss:$8 sps:$4 sm:$0xff]  }
 0x1b2   : > { %2120 = vmatpush2.bf16.msra.mxu1 %v5206_v5  ;;  %v5242_v5 = vld [vmem:[#allocation7 + $0x90] ss:$8 sps:$4 sm:$0xff]  }
 0x1b3   : > { %2121 = vmatprep.subr.bf16.mxu1 %v5214_v6  ;;  %v5247_v6 = vld [vmem:[#allocation7 + $0x194] ss:$8 sps:$4 sm:$0xff]  }
 0x1b6   : > { %2122 = vmatpush2.bf16.msra.mxu1 %v5212_v7  ;;  %v5245_v7 = vld [vmem:[#allocation7 + $0x190] ss:$8 sps:$4 sm:$0xff]  }
 0x1b7   : > { %2123 = vmatprep.subr.bf16.mxu1 %v5220_v52 }
 0x1ba   : > { %2124 = vmatpush2.bf16.msra.mxu1 %v5218_v53  ;;  %v5274_v53 = vld [vmem:[#allocation7 + $0x344] ss:$8 sps:$4 sm:$0xff]  }
 0x1ff   : > { %v870_v33 = vpop.f32.mrf.mxu0 }
 0x201   : > { %v786_v36 = vpop.f32.mrf.mxu1  ;;  %v872_v37 = vpop.f32.mrf.mxu0 }
 0x202   : > { %v871_v38 = vadd.f32 %v870_v33, %v786_v36  ;;  %v5175_v33 = vld [vmem:[#allocation7 + $0x154] ss:$8 sps:$4 sm:$0xff]   ;;  %v5181_v36 = vld [vmem:[#allocation7 + $0x144] ss:$8 sps:$4 sm:$0xff]  }
 0x203   : > { %v788_v39 = vpop.f32.mrf.mxu1  ;;  %v874_v41 = vpop.f32.mrf.mxu0 }
 0x204   : > { %v873_v42 = vadd.f32 %v872_v37, %v788_v39  ;;  %v1428_v37 = vld [vmem:[%s6775_s7 + $0x18] sm:$0xff]  ;;  %v1429_v41 = vld [vmem:[%s6775_s7 + $0x20] sm:$0xf] }
 0x205   : > { %v790_v44 = vpop.f32.mrf.mxu1  ;;  %v875_v45 = vpop.f32.mrf.mxu0  ;;  %v5187_v39 = vld [vmem:[#allocation7 + $0x134] ss:$8 sps:$4 sm:$0xff]  }
 0x206   : > { %v5199_v44 = vld [vmem:[#allocation7 + $0x114] ss:$8 sps:$4 sm:$0xff]   ;;  %v5197_v45 = vld [vmem:[#allocation7 + $0x110] ss:$8 sps:$4 sm:$0xff]  }
 0x207   : > { %v791_v46 = vpop.f32.mrf.mxu1 }
 0x208   : > { %v5205_v46 = vld [vmem:[#allocation7 + $0x104] ss:$8 sps:$4 sm:$0xff]  }
 0x20f   : > { %v1061_v51 = vpop.f32.mrf.mxu0 }
 0x211   : > { %v964_v54 = vpop.f32.mrf.mxu1  ;;  %v1063_v55 = vpop.f32.mrf.mxu0 }
 0x212   : > { %v971_v56 = vadd.f32 %v964_v54, %v871_v38  ;;  %v5179_v38 = vld [vmem:[#allocation7 + $0x140] ss:$8 sps:$4 sm:$0xff]   ;;  %v5223_v54 = vld [vmem:[#allocation7 + $0x1d4] ss:$8 sps:$4 sm:$0xff]  }
 0x213   : > { %v966_v57 = vpop.f32.mrf.mxu1  ;;  %v1065_v58 = vpop.f32.mrf.mxu0 }
 0x214   : > { %v1068_v60 = vadd.f32 %v1061_v51, %v971_v56  ;;  %v972_v61 = vadd.f32 %v966_v57, %v873_v42  ;;  %v5193_v42 = vld [vmem:[#allocation7 + $0x124] ss:$8 sps:$4 sm:$0xff]   ;;  %v5215_v51 = vld [vmem:[#allocation7 + $0x1e0] ss:$8 sps:$4 sm:$0xff]  }
 0x215   : > { %v968_v63 = vpop.f32.mrf.mxu1  ;;  %v1066_v0 = vpop.f32.mrf.mxu0  ;;  %v5226_v56 = vld [vmem:[#allocation7 + $0xc4] ss:$8 sps:$4 sm:$0xff]   ;;  %v5224_v57 = vld [vmem:[#allocation7 + $0xc0] ss:$8 sps:$4 sm:$0xff]  }
 0x216   : > { %v1069_v1 = vadd.f32 %v1063_v55, %v972_v61  ;;  %v1076_v21 = vadd.f32 %v1074_v14, %v1068_v60  ;;  %v5221_v55 = vld [vmem:[#allocation7 + $0x1d0] ss:$8 sps:$4 sm:$0xff]   ;;  %2125 = vmatprep.subr.bf16.mxu1 %v5226_v56  ;;  %v5229_v58 = vld [vmem:[#allocation7 + $0x1c4] ss:$8 sps:$4 sm:$0xff]   ;;  %v5232_v60 = vld [vmem:[#allocation7 + $0xb4] ss:$8 sps:$4 sm:$0xff]  }
 0x217   : > { %v969_v2 = vpop.f32.mrf.mxu1  ;;  %2126 = vmatpush2.bf16.msra.mxu1 %v5224_v57  ;;  %v5230_v61 = vld [vmem:[#allocation7 + $0xb0] ss:$8 sps:$4 sm:$0xff]   ;;  %v5238_v0 = vld [vmem:[#allocation7 + $0xa4] ss:$8 sps:$4 sm:$0xff]  }
 0x218   : > { %v1077_v19 = vadd.f32 %v1074_v14, %v1069_v1  ;;  %2127 = vmatprep.subr.bf16.mxu1 %v5232_v60  ;;  %v5233_v63 = vld [vmem:[#allocation7 + $0x1b0] ss:$8 sps:$4 sm:$0xff]   ;;  %v5236_v1 = vld [vmem:[#allocation7 + $0xa0] ss:$8 sps:$4 sm:$0xff]   ;;  %v5241_v2 = vld [vmem:[#allocation7 + $0x1a4] ss:$8 sps:$4 sm:$0xff]  }
 0x219   : > { %v5277_v56 = vld [vmem:[#allocation7 + $0x244] ss:$8 sps:$4 sm:$0xff]   ;;  %v5275_v60 = vld [vmem:[#allocation7 + $0x240] ss:$8 sps:$4 sm:$0xff]  }
 0x21b   : > { %2128 = vmatpush2.bf16.msra.mxu1 %v5230_v61  ;;  %v5283_v61 = vld [vmem:[#allocation7 + $0x234] ss:$8 sps:$4 sm:$0xff]  }
 0x21c   : > { %2129 = vmatprep.subr.bf16.mxu1 %v5238_v0  ;;  %v5281_v0 = vld [vmem:[#allocation7 + $0x230] ss:$8 sps:$4 sm:$0xff]  }
 0x21f   : > { %2130 = vmatpush2.bf16.msra.mxu1 %v5236_v1  ;;  %v5289_v1 = vld [vmem:[#allocation7 + $0x224] ss:$8 sps:$4 sm:$0xff]  }
 0x220   : > { %2131 = vmatprep.subr.bf16.mxu1 %v5244_v4  ;;  %v5287_v4 = vld [vmem:[#allocation7 + $0x220] ss:$8 sps:$4 sm:$0xff]  }
 0x223   : > { %v1418_v8 = vpop.f32.mrf.mxu0  ;;  %2132 = vmatpush2.bf16.msra.mxu1 %v5242_v5  ;;  %v6327_v5 = vld [vmem:[%s6194_s21] sm:$0x1] }
 0x225   : > { %v1420_v9 = vpop.f32.mrf.mxu0 }
 0x227   : > { %v1422_v10 = vpop.f32.mrf.mxu0 }
 0x228   : > { %v5253_v10 = vld [vmem:[#allocation7 + $0x184] ss:$8 sps:$4 sm:$0xff]  }
 0x229   : > { %v1423_v11 = vpop.f32.mrf.mxu0 }
 0x22a   : > { %v5251_v11 = vld [vmem:[#allocation7 + $0x180] ss:$8 sps:$4 sm:$0xff]  }
 0x251   : > { %v1377_v12 = vpop.f32.mrf.mxu1 }
 0x252   : > { %v1419_v16 = vadd.f32 %v1418_v8, %v1377_v12  ;;  %v5250_v8 = vld [vmem:[#allocation7 + $0x84] ss:$8 sps:$4 sm:$0xff]   ;;  %v5256_v12 = vld [vmem:[#allocation7 + $0x374] ss:$8 sps:$4 sm:$0xff]  }
 0x253   : > { %v1379_v13 = vpop.f32.mrf.mxu1  ;;  %2133 = vmatprep.subr.bf16.mxu1 %v5250_v8  ;;  %v5290_v8 = vld [vmem:[#allocation7 + $0x310] ss:$8 sps:$4 sm:$0xff]  }
 0x254   : > { %v1421_v15 = vadd.f32 %v1420_v9, %v1379_v13  ;;  %v5248_v9 = vld [vmem:[#allocation7 + $0x80] ss:$8 sps:$4 sm:$0xff]   ;;  %v5259_v13 = vld [vmem:[#allocation7 + $0x274] ss:$8 sps:$4 sm:$0xff]  }
 0x255   : > { %v1381_v17 = vpop.f32.mrf.mxu1  ;;  %2134 = vmatpush2.bf16.msra.mxu1 %v5248_v9  ;;  %v5298_v9 = vld [vmem:[#allocation7 + $0x304] ss:$8 sps:$4 sm:$0xff]  }
 0x256   : > { %4639 = vmatprep.subr.msk.mxu0 %vm1451_vm4, %v1421_v15  ;;  %2581 = vmatprep.subr.bf16.mxu1 %v5256_v12  ;;  %v5296_v12 = vld [vmem:[#allocation7 + $0x300] ss:$8 sps:$4 sm:$0xff]  }
 0x257   : > { %v1382_v22 = vpop.f32.mrf.mxu1  ;;  %4640 = vmatpush1.msk.msra.mxu0 %vm1451_vm4, %v1419_v16 }
 0x258   : > { %4641 = vmatmul.mubr.msk.f32.vlgmr.msra.gmra.mxu0 %vm1435_vm5, %v1430_v18  ;;  %4646 = vmatprep.subr.msk.mxu0 %vm1451_vm4, %v1077_v19 }
 0x259   : > { %4647 = vmatpush1.msk.msra.mxu0 %vm1451_vm4, %v1076_v21  ;;  %1528 = vmatprep.mubr.f32.mxu0 %v6788_v29 }
 0x25a   : > { %1902 = vmatprep.subr.bf16.mxu0 %v5163_v20 }
 0x25c   : > { %4642 = vmatmul.mubr.msk.f32.gmra.mxu0 %vm1435_vm5, %v1431_v23 }
 0x25d   : > { %1534 = vmatprep.mubr.f32.mxu0 %v6788_v29 }
 0x260   : > { %4643 = vmatmul.mubr.msk.f32.gmra.mxu0 %vm1435_vm5, %v1432_v24 }
 0x261   : > { %1540 = vmatprep.mubr.f32.mxu0 %v6788_v29 }
 0x264   : > { %4644 = vmatmul.mubr.msk.f32.gmra.mxu0 %vm1435_vm5, %v1433_v25 }
 0x265   : > { %1546 = vmatprep.mubr.f32.mxu0 %v6788_v29 }
 0x268   : > { %4645 = vmatmul.mubr.msk.f32.gmra.mxu0 %vm1435_vm5, %v1434_v26 }
 0x269   : > { %1638 = vmatprep.mubr.f32.mxu0 %v6788_v29 }
 0x26c   : > { %4648 = vmatmul.mubr.msk.f32.vlgmr.msra.gmra.mxu0 %vm1435_vm5, %v1425_v27 }
 0x26d   : > { %1644 = vmatprep.mubr.f32.mxu0 %v6788_v29  ;;  %1903 = vmatpush1.bf16.msra.mxu0 %v5161_v28 }
 0x26e   : > { %1904 = vmatprep.subr.bf16.mxu0 %v5169_v30 }
 0x270   : > { %4649 = vmatmul.mubr.msk.f32.gmra.mxu0 %vm1435_vm5, %v1426_v31 }
 0x271   : > { %1650 = vmatprep.mubr.f32.mxu0 %v6788_v29  ;;  %1905 = vmatpush1.bf16.msra.mxu0 %v5167_v32  ;;  %v5254_v32 = vld [vmem:[#allocation7 + $0x370] ss:$8 sps:$4 sm:$0xff]  }
 0x272   : > { %1906 = vmatprep.subr.bf16.mxu0 %v5175_v33 }
 0x274   : > { %4650 = vmatmul.mubr.msk.f32.gmra.mxu0 %vm1435_vm5, %v1427_v34  ;;  %v5262_v34 = vld [vmem:[#allocation7 + $0x364] ss:$8 sps:$4 sm:$0xff]  }
 0x275   : > { %1656 = vmatprep.mubr.f32.mxu0 %v6788_v29  ;;  %1907 = vmatpush1.bf16.msra.mxu0 %v5173_v35 }
 0x276   : > { %1908 = vmatprep.subr.bf16.mxu0 %v5181_v36 }
 0x278   : > { %4651 = vmatmul.mubr.msk.f32.gmra.mxu0 %vm1435_vm5, %v1428_v37  ;;  %v5257_v37 = vld [vmem:[#allocation7 + $0x270] ss:$8 sps:$4 sm:$0xff]  }
 0x279   : > { %1662 = vmatprep.mubr.f32.mxu0 %v6788_v29  ;;  %1909 = vmatpush1.bf16.msra.mxu0 %v5179_v38 }
 0x27a   : > { %1910 = vmatprep.subr.bf16.mxu0 %v5187_v39 }
 0x27c   : > { %4652 = vmatmul.mubr.msk.f32.gmra.mxu0 %vm1435_vm5, %v1429_v41  ;;  %v5265_v41 = vld [vmem:[#allocation7 + $0x264] ss:$8 sps:$4 sm:$0xff]  }
 0x27d   : > { %1911 = vmatpush1.bf16.msra.mxu0 %v5185_v40 }
 0x27e   : > { %1912 = vmatprep.subr.bf16.mxu0 %v5193_v42 }
 0x281   : > { %1913 = vmatpush1.bf16.msra.mxu0 %v5191_v43  ;;  %v5260_v43 = vld [vmem:[#allocation7 + $0x360] ss:$8 sps:$4 sm:$0xff]  }
 0x282   : > { %1914 = vmatprep.subr.bf16.mxu0 %v5199_v44 }
 0x285   : > { %1915 = vmatpush1.bf16.msra.mxu0 %v5197_v45  ;;  %v5268_v45 = vld [vmem:[#allocation7 + $0x354] ss:$8 sps:$4 sm:$0xff]  }
 0x286   : > { %1916 = vmatprep.subr.bf16.mxu0 %v5205_v46 }
 0x289   : > { %1917 = vmatpush1.bf16.msra.mxu0 %v5203_v47  ;;  %v5263_v47 = vld [vmem:[#allocation7 + $0x260] ss:$8 sps:$4 sm:$0xff]  }
 0x28a   : > { %1918 = vmatprep.subr.bf16.mxu0 %v5211_v48 }
 0x28d   : > { %1919 = vmatpush2.bf16.msra.mxu0 %v5209_v49  ;;  %v5271_v49 = vld [vmem:[#allocation7 + $0x254] ss:$8 sps:$4 sm:$0xff]  }
 0x28e   : > { %1920 = vmatprep.subr.bf16.mxu0 %v5217_v50 }
 0x291   : > { %1921 = vmatpush2.bf16.msra.mxu0 %v5215_v51  ;;  %v5266_v51 = vld [vmem:[#allocation7 + $0x350] ss:$8 sps:$4 sm:$0xff]  }
 0x292   : > { %1922 = vmatprep.subr.bf16.mxu0 %v5223_v54  ;;  %v5269_v54 = vld [vmem:[#allocation7 + $0x250] ss:$8 sps:$4 sm:$0xff]  }
 0x295   : > { %1923 = vmatpush2.bf16.msra.mxu0 %v5221_v55 }
 0x296   : > { %1924 = vmatprep.subr.bf16.mxu0 %v5229_v58  ;;  %v5272_v58 = vld [vmem:[#allocation7 + $0x340] ss:$8 sps:$4 sm:$0xff]  }
 0x299   : > { %1925 = vmatpush2.bf16.msra.mxu0 %v5227_v59  ;;  %v5280_v59 = vld [vmem:[#allocation7 + $0x334] ss:$8 sps:$4 sm:$0xff]  }
 0x29a   : > { %1926 = vmatprep.subr.bf16.mxu0 %v5235_v62  ;;  %v5278_v62 = vld [vmem:[#allocation7 + $0x330] ss:$8 sps:$4 sm:$0xff]  }
 0x29d   : > { %1927 = vmatpush2.bf16.msra.mxu0 %v5233_v63  ;;  %v5286_v63 = vld [vmem:[#allocation7 + $0x324] ss:$8 sps:$4 sm:$0xff]  }
 0x29e   : > { %1928 = vmatprep.subr.bf16.mxu0 %v5241_v2  ;;  %v5284_v2 = vld [vmem:[#allocation7 + $0x320] ss:$8 sps:$4 sm:$0xff]  }
 0x2a1   : > { %1929 = vmatpush2.bf16.msra.mxu0 %v5239_v3  ;;  %v5292_v3 = vld [vmem:[#allocation7 + $0x314] ss:$8 sps:$4 sm:$0xff]  }
 0x2a2   : > { %1930 = vmatprep.subr.bf16.mxu0 %v5247_v6  ;;  %v5295_v6 = vld [vmem:[#allocation7 + $0x214] ss:$8 sps:$4 sm:$0xff]  }
 0x2a5   : > { %1931 = vmatpush2.bf16.msra.mxu0 %v5245_v7  ;;  %v4941_v7 = vmul.f32 -1.442695, %v6327_v5 }
 0x2a6   : > { %1932 = vmatprep.subr.bf16.mxu0 %v5253_v10  ;;  %v5293_v10 = vld [vmem:[#allocation7 + $0x210] ss:$8 sps:$4 sm:$0xff]  }
 0x2a7   : > { %5590 = vpow2.f32 %v4941_v7  ;;  %v5355_v7 = vld [vmem:[#allocation7 + $0x474] ss:$8 sps:$4 sm:$0xff]  }
 0x2a9   : > { %1933 = vmatpush2.bf16.msra.mxu0 %v5251_v11  ;;  %v5301_v11 = vld [vmem:[#allocation7 + $0x204] ss:$8 sps:$4 sm:$0xff]  }
 0x2aa   : > { %2339 = vmatprep.subr.bf16.mxu0 %v5259_v13  ;;  %v5304_v13 = vld [vmem:[#allocation7 + $0x3f4] ss:$8 sps:$4 sm:$0xff]  }
 0x318   : > { %v1524_v14 = vpop.f32.mrf.mxu0 }
 0x31a   : > { %v1526_v15 = vpop.f32.mrf.mxu0 }
 0x31c   : > { %v6306_v16 = vpop.f32.mrf.mxu0 }
 0x31e   : > { %v1532_v17 = vpop.f32.mrf.mxu0 }
 0x320   : > { %v1536_v18 = vpop.f32.mrf.mxu0 }
 0x322   : > { %v6308_v19 = vpop.f32.mrf.mxu0 }
 0x324   : > { %v1542_v20 = vpop.f32.mrf.mxu0 }
 0x326   : > { %v6310_v21 = vpop.f32.mrf.mxu0 }
 0x328   : > { %v1548_v22 = vpop.f32.mrf.mxu0 }
 0x32a   : > { %v6312_v23 = vpop.f32.mrf.mxu0 }
 0x32c   : > { %v1640_v24 = vpop.f32.mrf.mxu0 }
 0x32d   : > { %v1641_v25 = vadd.f32 %v1640_v24, %v1524_v14  ;;  %v5299_v14 = vld [vmem:[#allocation7 + $0x200] ss:$8 sps:$4 sm:$0xff]  }
 0x32e   : > { %v1642_v26 = vpop.f32.mrf.mxu0  ;;  %v5308_v24 = vld [vmem:[#allocation7 + $0x3e0] ss:$8 sps:$4 sm:$0xff]  }
 0x32f   : > { %v1643_v27 = vadd.f32 %v1642_v26, %v1526_v15  ;;  %v1669_v28 = vpack.c.bf16 %v1641_v25, %v1641_v25  ;;  %v5307_v15 = vld [vmem:[#allocation7 + $0x2f4] ss:$8 sps:$4 sm:$0xff]   ;;  %v5591_v26 = vpop.eup %5590 }
 0x330   : > { %v6314_v30 = vpop.f32.mrf.mxu0  ;;  %v5316_v25 = vld [vmem:[#allocation7 + $0x3d4] ss:$8 sps:$4 sm:$0xff]  }
 0x331   : > { %v1670_v31 = vpack.c.bf16 %v1643_v27, %v1643_v27  ;;  %v1738_v38 = vrot.slane %v1669_v28, 2  ;;  %v5311_v27 = vld [vmem:[#allocation7 + $0x2e0] ss:$8 sps:$4 sm:$0xff]  }
 0x332   : > { %v1648_v33 = vpop.f32.mrf.mxu0 }
 0x333   : > { %v1739_v35 = vrot.slane %v1670_v31, 2  ;;  %v1649_v36 = vadd.f32 %v1648_v33, %v1532_v17  ;;  %2135 = vmatprep.mubr.bf16.mxu1 %v1670_v31  ;;  %v5302_v17 = vld [vmem:[#allocation7 + $0x3f0] ss:$8 sps:$4 sm:$0xff]   ;;  %v3836_v31 = vadd.f32 1.0, %v5591_v26  ;;  %v5322_v33 = vld [vmem:[#allocation7 + $0x3c4] ss:$8 sps:$4 sm:$0xff]  }
 0x334   : > { %v1652_v39 = vpop.f32.mrf.mxu0  ;;  %2136 = vmatmul.mubr.bf16.vlgmr.msra.gmra.mxu1 %v1669_v28  ;;  %v5319_v28 = vld [vmem:[#allocation7 + $0x2d4] ss:$8 sps:$4 sm:$0xff]   ;;  %v5371_v26 = vld [vmem:[#allocation7 + $0x440] ss:$8 sps:$4 sm:$0xff]  }
 0x335   : > { %v2145_v40 = vpack.c.bf16 %v1649_v36, %v1649_v36  ;;  %v6316_v42 = vadd.f32 %v1652_v39, %v1536_v18  ;;  %2582 = vmatpush1.bf16.msra.mxu1 %v5254_v32  ;;  %1934 = vmatprep.mubr.bf16.mxu0 %v1739_v35  ;;  %v5310_v18 = vld [vmem:[#allocation7 + $0x3e4] ss:$8 sps:$4 sm:$0xff]   ;;  %v5314_v32 = vld [vmem:[#allocation7 + $0x3d0] ss:$8 sps:$4 sm:$0xff]   ;;  %5592 = vrcp.f32 %v3836_v31  ;;  %v5320_v36 = vld [vmem:[#allocation7 + $0x3c0] ss:$8 sps:$4 sm:$0xff]  }
 0x336   : > { %v6318_v44 = vpop.f32.mrf.mxu0  ;;  %1935 = vmatmul.mubr.bf16.vlgmr.msra.gmra.mxu0 %v1738_v38  ;;  %2583 = vmatprep.subr.bf16.mxu1 %v5262_v34  ;;  %v5317_v34 = vld [vmem:[#allocation7 + $0x2d0] ss:$8 sps:$4 sm:$0xff]   ;;  %v5325_v35 = vld [vmem:[#allocation7 + $0x2c4] ss:$8 sps:$4 sm:$0xff]   ;;  %v5323_v38 = vld [vmem:[#allocation7 + $0x2c0] ss:$8 sps:$4 sm:$0xff]  }
 0x337   : > { %v2418_v46 = vrot.slane %v2145_v40, 2  ;;  %2340 = vmatpush1.bf16.msra.mxu0 %v5257_v37  ;;  %2371 = vmatprep.mubr.bf16.mxu0 %v2145_v40  ;;  %v5328_v37 = vld [vmem:[#allocation7 + $0x3b4] ss:$8 sps:$4 sm:$0xff]   ;;  %v5334_v40 = vld [vmem:[#allocation7 + $0x3a4] ss:$8 sps:$4 sm:$0xff]  }
 0x338   : > { %v1658_v48 = vpop.f32.mrf.mxu0  ;;  %2341 = vmatprep.subr.bf16.mxu0 %v5265_v41  ;;  %v5331_v39 = vld [vmem:[#allocation7 + $0x2b4] ss:$8 sps:$4 sm:$0xff]   ;;  %v5326_v41 = vld [vmem:[#allocation7 + $0x3b0] ss:$8 sps:$4 sm:$0xff]   ;;  %v5382_v31 = vld [vmem:[#allocation7 + $0x524] ss:$8 sps:$4 sm:$0xff]  }
 0x339   : > { %v6320_v50 = vadd.f32 %v1658_v48, %v1542_v20  ;;  %2584 = vmatpush1.bf16.msra.mxu1 %v5260_v43  ;;  %2613 = vmatprep.mubr.bf16.mxu1 %v2418_v46  ;;  %v5305_v20 = vld [vmem:[#allocation7 + $0x2f0] ss:$8 sps:$4 sm:$0xff]   ;;  %v3842_v46 = vlaneseq  ;;  %v5340_v48 = vld [vmem:[#allocation7 + $0x394] ss:$8 sps:$4 sm:$0xff]  }
 0x33a   : > { %v6322_v52 = vpop.f32.mrf.mxu0  ;;  %2585 = vmatprep.subr.bf16.mxu1 %v5268_v45  ;;  %v5329_v43 = vld [vmem:[#allocation7 + $0x2b0] ss:$8 sps:$4 sm:$0xff]   ;;  %v5337_v45 = vld [vmem:[#allocation7 + $0x2a4] ss:$8 sps:$4 sm:$0xff]  }
 0x33b   : > { %2342 = vmatpush1.bf16.msra.mxu0 %v5263_v47  ;;  %v5332_v47 = vld [vmem:[#allocation7 + $0x3a0] ss:$8 sps:$4 sm:$0xff]  }
 0x33c   : > { %v1664_v55 = vpop.f32.mrf.mxu0  ;;  %2343 = vmatprep.subr.bf16.mxu0 %v5271_v49  ;;  %v3843_v49 = vshrl.u32 %v3842_v46, 7  ;;  %v5395_v46 = vld [vmem:[#allocation7 + $0x400] ss:$8 sps:$4 sm:$0xff]  }
 0x33d   : > { %v6324_v57 = vadd.f32 %v1664_v55, %v1548_v22  ;;  %2586 = vmatpush1.bf16.msra.mxu1 %v5266_v51  ;;  %v5313_v22 = vld [vmem:[#allocation7 + $0x2e4] ss:$8 sps:$4 sm:$0xff]  }
 0x33e   : > { %2587 = vmatprep.subr.bf16.mxu1 %v5274_v53  ;;  %v5335_v53 = vld [vmem:[#allocation7 + $0x2a0] ss:$8 sps:$4 sm:$0xff]  }
 0x33f   : > { %2344 = vmatpush1.bf16.msra.mxu0 %v5269_v54  ;;  %v5343_v54 = vld [vmem:[#allocation7 + $0x294] ss:$8 sps:$4 sm:$0xff]  }
 0x340   : > { %2345 = vmatprep.subr.bf16.mxu0 %v5277_v56  ;;  %v3844_v56 = vsub.s32 0, %v3843_v49  ;;  %v5406_v49 = vld [vmem:[#allocation7 + $0x5e4] ss:$8 sps:$4 sm:$0xff]  }
 0x341   : > { %2588 = vmatpush1.bf16.msra.mxu1 %v5272_v58  ;;  %v5338_v58 = vld [vmem:[#allocation7 + $0x390] ss:$8 sps:$4 sm:$0xff]  }
 0x342   : > { %2589 = vmatprep.subr.bf16.mxu1 %v5280_v59  ;;  %v5593_v51 = vpop.eup %5592  ;;  %v1647_v59 = vadd.f32 %v6314_v30, %v6306_v16  ;;  %v5347_v30 = vld [vmem:[#allocation7 + $0x280] ss:$8 sps:$4 sm:$0xff]  }
 0x343   : > { %2346 = vmatpush1.bf16.msra.mxu0 %v5275_v60  ;;  %v3839_v55 = vmul.f32 %v5593_v51, %v6327_v5  ;;  %v5346_v60 = vld [vmem:[#allocation7 + $0x384] ss:$8 sps:$4 sm:$0xff]   ;;  %v5352_v5 = vld [vmem:[#allocation7 + $0x574] ss:$8 sps:$4 sm:$0xff]   ;;  %v5401_v51 = vld [vmem:[#allocation7 + $0x4f0] ss:$8 sps:$4 sm:$0xff]  }
 0x344   : > { %2347 = vmatprep.subr.bf16.mxu0 %v5283_v61 }
 0x345   : > { %2590 = vmatpush1.bf16.msra.mxu1 %v5278_v62  ;;  %v3845_v61 = vrot.slane %v3839_v55, %v3844_v56  ;;  %v1655_v62 = vadd.f32 %v6318_v44, %v6308_v19  ;;  %v5350_v19 = vld [vmem:[#allocation7 + $0x570] ss:$8 sps:$4 sm:$0xff]   ;;  %v5412_v55 = vld [vmem:[#allocation7 + $0x5d4] ss:$8 sps:$4 sm:$0xff]   ;;  %v5407_v56 = vld [vmem:[#allocation7 + $0x4e0] ss:$8 sps:$4 sm:$0xff]  }
 0x346   : > { %2591 = vmatprep.subr.bf16.mxu1 %v5286_v63  ;;  %v5341_v63 = vld [vmem:[#allocation7 + $0x290] ss:$8 sps:$4 sm:$0xff]  }
 0x347   : > { %2348 = vmatpush1.bf16.msra.mxu0 %v5281_v0  ;;  %v3840_v0 = vld [vmem:[#allocation9] sm:$0xf]  ;;  %v2625_v16 = vpack.c.bf16 %v1655_v62, %v1655_v62  ;;  %v5421_v62 = vld [vmem:[#allocation7 + $0x4c4] ss:$8 sps:$4 sm:$0xff]  }
 0x348   : > { %2349 = vmatprep.subr.bf16.mxu0 %v5289_v1  ;;  %v5349_v1 = vld [vmem:[#allocation7 + $0x284] ss:$8 sps:$4 sm:$0xff]  }
 0x349   : > { %2592 = vmatpush1.bf16.msra.mxu1 %v5284_v2  ;;  %v3847_v2 = vmul.f32 %v3845_v61, %v3840_v0  ;;  %v5413_v61 = vld [vmem:[#allocation7 + $0x4d0] ss:$8 sps:$4 sm:$0xff]   ;;  %v5424_v0 = vld [vmem:[#allocation7 + $0x5b4] ss:$8 sps:$4 sm:$0xff]  }
 0x34a   : > { %2593 = vmatprep.subr.bf16.mxu1 %v5292_v3  ;;  %v5344_v3 = vld [vmem:[#allocation7 + $0x380] ss:$8 sps:$4 sm:$0xff]  }
 0x34b   : > { %2350 = vmatpush1.bf16.msra.mxu0 %v5287_v4  ;;  %v2144_v4 = vpack.c.bf16 %v1647_v59, %v1647_v59  ;;  %v5410_v59 = vld [vmem:[#allocation7 + $0x5d0] ss:$8 sps:$4 sm:$0xff]  }
 0x34c   : > { %2351 = vmatprep.subr.bf16.mxu0 %v5295_v6  ;;  %v3849_v6 = vsel %vm3848_vm6, %v3847_v2, 0.0  ;;  %v5427_v2 = vld [vmem:[#allocation7 + $0x4b4] ss:$8 sps:$4 sm:$0xff]  }
 0x34d   : > { %2594 = vmatpush1.bf16.msra.mxu1 %v5290_v8  ;;  %3850 = vadd.xlane.f32.xlu0 %v3849_v6  ;;  %v2417_v44 = vrot.slane %v2144_v4, 2  ;;  %v5358_v8 = vld [vmem:[#allocation7 + $0x564] ss:$8 sps:$4 sm:$0xff]  }
 0x34e   : > { %2595 = vmatprep.subr.bf16.mxu1 %v5298_v9  ;;  %v2898_v9 = vrot.slane %v2625_v16, 2  ;;  %v5433_v6 = vld [vmem:[#allocation7 + $0x4a4] ss:$8 sps:$4 sm:$0xff]  }
 0x34f   : > { %2352 = vmatpush1.bf16.msra.mxu0 %v5293_v10  ;;  %v5353_v10 = vld [vmem:[#allocation7 + $0x470] ss:$8 sps:$4 sm:$0xff]  }
 0x350   : > { %2353 = vmatprep.subr.bf16.mxu0 %v5301_v11  ;;  %v5361_v11 = vld [vmem:[#allocation7 + $0x464] ss:$8 sps:$4 sm:$0xff]  }
 0x351   : > { %2596 = vmatpush1.bf16.msra.mxu1 %v5296_v12  ;;  %v5356_v12 = vld [vmem:[#allocation7 + $0x560] ss:$8 sps:$4 sm:$0xff]  }
 0x352   : > { %2597 = vmatprep.subr.bf16.mxu1 %v5304_v13  ;;  %v5364_v13 = vld [vmem:[#allocation7 + $0x554] ss:$8 sps:$4 sm:$0xff]  }
 0x353   : > { %2354 = vmatpush1.bf16.msra.mxu0 %v5299_v14  ;;  %v5359_v14 = vld [vmem:[#allocation7 + $0x460] ss:$8 sps:$4 sm:$0xff]  }
 0x354   : > { %2355 = vmatprep.subr.bf16.mxu0 %v5307_v15  ;;  %v5367_v15 = vld [vmem:[#allocation7 + $0x454] ss:$8 sps:$4 sm:$0xff]  }
 0x355   : > { %2598 = vmatpush2.bf16.msra.mxu1 %v5302_v17  ;;  %v5362_v17 = vld [vmem:[#allocation7 + $0x550] ss:$8 sps:$4 sm:$0xff]  }
 0x356   : > { %2599 = vmatprep.subr.bf16.mxu1 %v5310_v18  ;;  %v5370_v18 = vld [vmem:[#allocation7 + $0x544] ss:$8 sps:$4 sm:$0xff]  }
 0x357   : > { %2356 = vmatpush2.bf16.msra.mxu0 %v5305_v20  ;;  %v5365_v20 = vld [vmem:[#allocation7 + $0x450] ss:$8 sps:$4 sm:$0xff]  }
 0x358   : > { %2357 = vmatprep.subr.bf16.mxu0 %v5313_v22  ;;  %v5373_v22 = vld [vmem:[#allocation7 + $0x444] ss:$8 sps:$4 sm:$0xff]  }
 0x359   : > { %2600 = vmatpush2.bf16.msra.mxu1 %v5308_v24  ;;  %v5368_v24 = vld [vmem:[#allocation7 + $0x540] ss:$8 sps:$4 sm:$0xff]  }
 0x35a   : > { %2601 = vmatprep.subr.bf16.mxu1 %v5316_v25  ;;  %v5376_v25 = vld [vmem:[#allocation7 + $0x534] ss:$8 sps:$4 sm:$0xff]  }
 0x35b   : > { %2358 = vmatpush2.bf16.msra.mxu0 %v5311_v27  ;;  %v5379_v27 = vld [vmem:[#allocation7 + $0x434] ss:$8 sps:$4 sm:$0xff]  }
 0x35c   : > { %2359 = vmatprep.subr.bf16.mxu0 %v5319_v28  ;;  %v5374_v28 = vld [vmem:[#allocation7 + $0x530] ss:$8 sps:$4 sm:$0xff]  }
 0x35d   : > { %2602 = vmatpush2.bf16.msra.mxu1 %v5314_v32  ;;  %v5377_v32 = vld [vmem:[#allocation7 + $0x430] ss:$8 sps:$4 sm:$0xff]  }
 0x35e   : > { %2603 = vmatprep.subr.bf16.mxu1 %v5322_v33  ;;  %v5385_v33 = vld [vmem:[#allocation7 + $0x424] ss:$8 sps:$4 sm:$0xff]  }
 0x35f   : > { %2360 = vmatpush2.bf16.msra.mxu0 %v5317_v34  ;;  %v5380_v34 = vld [vmem:[#allocation7 + $0x520] ss:$8 sps:$4 sm:$0xff]  }
 0x360   : > { %2361 = vmatprep.subr.bf16.mxu0 %v5325_v35  ;;  %v5388_v35 = vld [vmem:[#allocation7 + $0x514] ss:$8 sps:$4 sm:$0xff]  }
 0x361   : > { %2604 = vmatpush2.bf16.msra.mxu1 %v5320_v36  ;;  %v5383_v36 = vld [vmem:[#allocation7 + $0x420] ss:$8 sps:$4 sm:$0xff]  }
 0x362   : > { %2605 = vmatprep.subr.bf16.mxu1 %v5328_v37  ;;  %v5391_v37 = vld [vmem:[#allocation7 + $0x414] ss:$8 sps:$4 sm:$0xff]  }
 0x363   : > { %2362 = vmatpush2.bf16.msra.mxu0 %v5323_v38  ;;  %v5386_v38 = vld [vmem:[#allocation7 + $0x510] ss:$8 sps:$4 sm:$0xff]  }
 0x364   : > { %2363 = vmatprep.subr.bf16.mxu0 %v5331_v39  ;;  %v5394_v39 = vld [vmem:[#allocation7 + $0x504] ss:$8 sps:$4 sm:$0xff]  }
 0x365   : > { %2606 = vmatpush2.bf16.msra.mxu1 %v5326_v41  ;;  %v5389_v41 = vld [vmem:[#allocation7 + $0x410] ss:$8 sps:$4 sm:$0xff]  }
 0x366   : > { %2607 = vmatprep.subr.bf16.mxu1 %v5334_v40  ;;  %v5397_v40 = vld [vmem:[#allocation7 + $0x404] ss:$8 sps:$4 sm:$0xff]  }
 0x367   : > { %2364 = vmatpush2.bf16.msra.mxu0 %v5329_v43  ;;  %v5392_v43 = vld [vmem:[#allocation7 + $0x500] ss:$8 sps:$4 sm:$0xff]  }
 0x368   : > { %2365 = vmatprep.subr.bf16.mxu0 %v5337_v45  ;;  %v5400_v45 = vld [vmem:[#allocation7 + $0x5f4] ss:$8 sps:$4 sm:$0xff]  }
 0x369   : > { %2608 = vmatpush2.bf16.msra.mxu1 %v5332_v47  ;;  %v5403_v47 = vld [vmem:[#allocation7 + $0x4f4] ss:$8 sps:$4 sm:$0xff]  }
 0x36a   : > { %2609 = vmatprep.subr.bf16.mxu1 %v5340_v48  ;;  %v5398_v48 = vld [vmem:[#allocation7 + $0x5f0] ss:$8 sps:$4 sm:$0xff]  }
 0x36b   : > { %2366 = vmatpush2.bf16.msra.mxu0 %v5335_v53  ;;  %v5409_v53 = vld [vmem:[#allocation7 + $0x4e4] ss:$8 sps:$4 sm:$0xff]  }
 0x36c   : > { %2367 = vmatprep.subr.bf16.mxu0 %v5343_v54  ;;  %v5404_v54 = vld [vmem:[#allocation7 + $0x5e0] ss:$8 sps:$4 sm:$0xff]  }
 0x36d   : > { %2610 = vmatpush2.bf16.msra.mxu1 %v5338_v58  ;;  %v5415_v58 = vld [vmem:[#allocation7 + $0x4d4] ss:$8 sps:$4 sm:$0xff]  }
 0x36e   : > { %2611 = vmatprep.subr.bf16.mxu1 %v5346_v60  ;;  %v5418_v60 = vld [vmem:[#allocation7 + $0x5c4] ss:$8 sps:$4 sm:$0xff]  }
 0x36f   : > { %2368 = vmatpush2.bf16.msra.mxu0 %v5341_v63  ;;  %v5416_v63 = vld [vmem:[#allocation7 + $0x5c0] ss:$8 sps:$4 sm:$0xff]  }
 0x370   : > { %2369 = vmatprep.subr.bf16.mxu0 %v5349_v1  ;;  %v5419_v1 = vld [vmem:[#allocation7 + $0x4c0] ss:$8 sps:$4 sm:$0xff]  }
 0x371   : > { %2612 = vmatpush2.bf16.msra.mxu1 %v5344_v3  ;;  %v5422_v3 = vld [vmem:[#allocation7 + $0x5b0] ss:$8 sps:$4 sm:$0xff]  }
 0x372   : > { %3061 = vmatprep.subr.bf16.mxu1 %v5352_v5  ;;  %v5425_v5 = vld [vmem:[#allocation7 + $0x4b0] ss:$8 sps:$4 sm:$0xff]  }
 0x373   : > { %2370 = vmatpush2.bf16.msra.mxu0 %v5347_v30  ;;  %v5436_v30 = vld [vmem:[#allocation7 + $0x594] ss:$8 sps:$4 sm:$0xff]  }
 0x374   : > { %2614 = vmatmul.mubr.bf16.vlgmr.msra.gmra.mxu1 %v2417_v44  ;;  %2819 = vmatprep.subr.bf16.mxu0 %v5355_v7  ;;  %v5431_v7 = vld [vmem:[#allocation7 + $0x4a0] ss:$8 sps:$4 sm:$0xff]   ;;  %v5434_v44 = vld [vmem:[#allocation7 + $0x590] ss:$8 sps:$4 sm:$0xff]  }
 0x375   : > { %3062 = vmatpush1.bf16.msra.mxu1 %v5350_v19  ;;  %3093 = vmatprep.mubr.bf16.mxu1 %v2898_v9  ;;  %v5439_v19 = vld [vmem:[#allocation7 + $0x494] ss:$8 sps:$4 sm:$0xff]   ;;  %v1661_v9 = vadd.f32 %v6322_v52, %v6310_v21  ;;  %v5454_v21 = vld [vmem:[#allocation7 + $0x764] ss:$8 sps:$4 sm:$0xff]  }
 0x376   : > { %2372 = vmatmul.mubr.bf16.vlgmr.msra.gmra.mxu0 %v2144_v4  ;;  %3063 = vmatprep.subr.bf16.mxu1 %v5358_v8  ;;  %v5430_v4 = vld [vmem:[#allocation7 + $0x5a4] ss:$8 sps:$4 sm:$0xff]  }
 0x377   : > { %2820 = vmatpush1.bf16.msra.mxu0 %v5353_v10  ;;  %2851 = vmatprep.mubr.bf16.mxu0 %v2625_v16  ;;  %v5428_v16 = vld [vmem:[#allocation7 + $0x5a0] ss:$8 sps:$4 sm:$0xff]   ;;  %v5442_v8 = vld [vmem:[#allocation7 + $0x584] ss:$8 sps:$4 sm:$0xff]   ;;  %v5437_v10 = vld [vmem:[#allocation7 + $0x490] ss:$8 sps:$4 sm:$0xff]  }
 0x378   : > { %2821 = vmatprep.subr.bf16.mxu0 %v5361_v11  ;;  %v5445_v11 = vld [vmem:[#allocation7 + $0x484] ss:$8 sps:$4 sm:$0xff]  }
 0x379   : > { %3064 = vmatpush1.bf16.msra.mxu1 %v5356_v12  ;;  %v5440_v12 = vld [vmem:[#allocation7 + $0x580] ss:$8 sps:$4 sm:$0xff]  }
 0x37a   : > { %3065 = vmatprep.subr.bf16.mxu1 %v5364_v13  ;;  %v2624_v13 = vpack.c.bf16 %v6316_v42, %v6316_v42  ;;  %v5452_v42 = vld [vmem:[#allocation7 + $0x760] ss:$8 sps:$4 sm:$0xff]  }
 0x37b   : > { %2822 = vmatpush1.bf16.msra.mxu0 %v5359_v14  ;;  %v5448_v14 = vld [vmem:[#allocation7 + $0x774] ss:$8 sps:$4 sm:$0xff]  }
 0x37c   : > { %2823 = vmatprep.subr.bf16.mxu0 %v5367_v15  ;;  %v3105_v15 = vpack.c.bf16 %v1661_v9, %v1661_v9  ;;  %v6465_v9 = vld [vmem:[#allocation7 + $0x7a4] ss:$8 sps:$4 sm:$0xff]  }
 0x37d   : > { %3066 = vmatpush1.bf16.msra.mxu1 %v5362_v17  ;;  %v5443_v17 = vld [vmem:[#allocation7 + $0x480] ss:$8 sps:$4 sm:$0xff]   ;;  %6865 = vst [vmem:[#allocation18_spill] sm:$0xff] %v6465_v9 }
 0x37e   : > { %3067 = vmatprep.subr.bf16.mxu1 %v5370_v18  ;;  %v5451_v18 = vld [vmem:[#allocation7 + $0x674] ss:$8 sps:$4 sm:$0xff]   ;;  %v3378_v52 = vrot.slane %v3105_v15, 2 }
 0x37f   : > { %2824 = vmatpush1.bf16.msra.mxu0 %v5365_v20  ;;  %v5446_v20 = vld [vmem:[#allocation7 + $0x770] ss:$8 sps:$4 sm:$0xff]  }
 0x380   : > { %2825 = vmatprep.subr.bf16.mxu0 %v5373_v22  ;;  %v2897_v22 = vrot.slane %v2624_v13, 2 }
 0x381   : > { %3068 = vmatpush1.bf16.msra.mxu1 %v5368_v24  ;;  %v5449_v24 = vld [vmem:[#allocation7 + $0x670] ss:$8 sps:$4 sm:$0xff]  }
 0x382   : > { %3069 = vmatprep.subr.bf16.mxu1 %v5376_v25  ;;  %v5457_v25 = vld [vmem:[#allocation7 + $0x664] ss:$8 sps:$4 sm:$0xff]  }
 0x383   : > { %2826 = vmatpush1.bf16.msra.mxu0 %v5371_v26  ;;  %v5460_v26 = vld [vmem:[#allocation7 + $0x754] ss:$8 sps:$4 sm:$0xff]  }
 0x384   : > { %2827 = vmatprep.subr.bf16.mxu0 %v5379_v27  ;;  %v6339_v27 = vld [vmem:[#allocation7 + $0x660] ss:$8 sps:$4 sm:$0xff]  }
 0x385   : > { %3070 = vmatpush1.bf16.msra.mxu1 %v5374_v28  ;;  %v6341_v28 = vld [vmem:[#allocation7 + $0x654] ss:$8 sps:$4 sm:$0xff]  }
 0x386   : > { %3071 = vmatprep.subr.bf16.mxu1 %v5382_v31  ;;  %v6343_v31 = vld [vmem:[#allocation7 + $0x750] ss:$8 sps:$4 sm:$0xff]  }
 0x387   : > { %2828 = vmatpush1.bf16.msra.mxu0 %v5377_v32  ;;  %v6345_v32 = vld [vmem:[#allocation7 + $0x744] ss:$8 sps:$4 sm:$0xff]  }
 0x388   : > { %2829 = vmatprep.subr.bf16.mxu0 %v5385_v33  ;;  %v6348_v33 = vld [vmem:[#allocation7 + $0x650] ss:$8 sps:$4 sm:$0xff]  }
 0x389   : > { %3072 = vmatpush1.bf16.msra.mxu1 %v5380_v34  ;;  %v6351_v34 = vld [vmem:[#allocation7 + $0x644] ss:$8 sps:$4 sm:$0xff]  }
 0x38a   : > { %3073 = vmatprep.subr.bf16.mxu1 %v5388_v35  ;;  %v6354_v35 = vld [vmem:[#allocation7 + $0x740] ss:$8 sps:$4 sm:$0xff]  }
 0x38b   : > { %2830 = vmatpush1.bf16.msra.mxu0 %v5383_v36  ;;  %v6357_v36 = vld [vmem:[#allocation7 + $0x734] ss:$8 sps:$4 sm:$0xff]  }
 0x38c   : > { %2831 = vmatprep.subr.bf16.mxu0 %v5391_v37  ;;  %v6360_v37 = vld [vmem:[#allocation7 + $0x640] ss:$8 sps:$4 sm:$0xff]  }
 0x38d   : > { %3074 = vmatpush1.bf16.msra.mxu1 %v5386_v38  ;;  %v6363_v38 = vld [vmem:[#allocation7 + $0x634] ss:$8 sps:$4 sm:$0xff]  }
 0x38e   : > { %3075 = vmatprep.subr.bf16.mxu1 %v5394_v39  ;;  %v6366_v39 = vld [vmem:[#allocation7 + $0x730] ss:$8 sps:$4 sm:$0xff]  }
 0x38f   : > { %2832 = vmatpush1.bf16.msra.mxu0 %v5389_v41  ;;  %v6369_v41 = vld [vmem:[#allocation7 + $0x724] ss:$8 sps:$4 sm:$0xff]  }
 0x390   : > { %2833 = vmatprep.subr.bf16.mxu0 %v5397_v40  ;;  %v6372_v40 = vld [vmem:[#allocation7 + $0x630] ss:$8 sps:$4 sm:$0xff]  }
 0x391   : > { %3076 = vmatpush1.bf16.msra.mxu1 %v5392_v43  ;;  %v6375_v43 = vld [vmem:[#allocation7 + $0x624] ss:$8 sps:$4 sm:$0xff]  }
 0x392   : > { %3077 = vmatprep.subr.bf16.mxu1 %v5400_v45  ;;  %v6378_v45 = vld [vmem:[#allocation7 + $0x720] ss:$8 sps:$4 sm:$0xff]  }
 0x393   : > { %2834 = vmatpush1.bf16.msra.mxu0 %v5395_v46  ;;  %v6381_v46 = vld [vmem:[#allocation7 + $0x714] ss:$8 sps:$4 sm:$0xff]  }
 0x394   : > { %2835 = vmatprep.subr.bf16.mxu0 %v5403_v47  ;;  %v6384_v47 = vld [vmem:[#allocation7 + $0x620] ss:$8 sps:$4 sm:$0xff]  }
 0x395   : > { %3078 = vmatpush2.bf16.msra.mxu1 %v5398_v48  ;;  %v6387_v48 = vld [vmem:[#allocation7 + $0x614] ss:$8 sps:$4 sm:$0xff]  }
 0x396   : > { %3079 = vmatprep.subr.bf16.mxu1 %v5406_v49  ;;  %v6390_v49 = vld [vmem:[#allocation7 + $0x710] ss:$8 sps:$4 sm:$0xff]  }
 0x397   : > { %2836 = vmatpush2.bf16.msra.mxu0 %v5401_v51  ;;  %v6393_v51 = vld [vmem:[#allocation7 + $0x704] ss:$8 sps:$4 sm:$0xff]  }
 0x398   : > { %2837 = vmatprep.subr.bf16.mxu0 %v5409_v53  ;;  %v6396_v53 = vld [vmem:[#allocation7 + $0x610] ss:$8 sps:$4 sm:$0xff]  }
 0x399   : > { %3080 = vmatpush2.bf16.msra.mxu1 %v5404_v54  ;;  %v6399_v54 = vld [vmem:[#allocation7 + $0x604] ss:$8 sps:$4 sm:$0xff]  }
 0x39a   : > { %3081 = vmatprep.subr.bf16.mxu1 %v5412_v55  ;;  %v6402_v55 = vld [vmem:[#allocation7 + $0x700] ss:$8 sps:$4 sm:$0xff]  }
 0x39b   : > { %2838 = vmatpush2.bf16.msra.mxu0 %v5407_v56  ;;  %v6405_v56 = vld [vmem:[#allocation7 + $0x7f4] ss:$8 sps:$4 sm:$0xff]  }
 0x39c   : > { %2839 = vmatprep.subr.bf16.mxu0 %v5415_v58  ;;  %v6408_v58 = vld [vmem:[#allocation7 + $0x600] ss:$8 sps:$4 sm:$0xff]  }
 0x39d   : > { %3082 = vmatpush2.bf16.msra.mxu1 %v5410_v59  ;;  %v6411_v59 = vld [vmem:[#allocation7 + $0x6f4] ss:$8 sps:$4 sm:$0xff]  }
 0x39e   : > { %3083 = vmatprep.subr.bf16.mxu1 %v5418_v60  ;;  %v6414_v60 = vld [vmem:[#allocation7 + $0x7f0] ss:$8 sps:$4 sm:$0xff]  }
 0x39f   : > { %2840 = vmatpush2.bf16.msra.mxu0 %v5413_v61  ;;  %v6417_v61 = vld [vmem:[#allocation7 + $0x7e4] ss:$8 sps:$4 sm:$0xff]  }
 0x3a0   : > { %2841 = vmatprep.subr.bf16.mxu0 %v5421_v62  ;;  %v6420_v62 = vld [vmem:[#allocation7 + $0x6f0] ss:$8 sps:$4 sm:$0xff]  }
 0x3a1   : > { %3084 = vmatpush2.bf16.msra.mxu1 %v5416_v63  ;;  %v6423_v63 = vld [vmem:[#allocation7 + $0x6e4] ss:$8 sps:$4 sm:$0xff]  }
 0x3a2   : > { %3085 = vmatprep.subr.bf16.mxu1 %v5424_v0  ;;  %v6426_v0 = vld [vmem:[#allocation7 + $0x7e0] ss:$8 sps:$4 sm:$0xff]  }
 0x3a3   : > { %2842 = vmatpush2.bf16.msra.mxu0 %v5419_v1  ;;  %v6429_v1 = vld [vmem:[#allocation7 + $0x7d4] ss:$8 sps:$4 sm:$0xff]  }
 0x3a4   : > { %2843 = vmatprep.subr.bf16.mxu0 %v5427_v2  ;;  %v6432_v2 = vld [vmem:[#allocation7 + $0x6e0] ss:$8 sps:$4 sm:$0xff]  }
 0x3a5   : > { %3086 = vmatpush2.bf16.msra.mxu1 %v5422_v3  ;;  %v6435_v3 = vld [vmem:[#allocation7 + $0x6d4] ss:$8 sps:$4 sm:$0xff]  }
 0x3a6   : > { %3087 = vmatprep.subr.bf16.mxu1 %v5430_v4  ;;  %v6438_v4 = vld [vmem:[#allocation7 + $0x7d0] ss:$8 sps:$4 sm:$0xff]  }
 0x3a7   : > { %2844 = vmatpush2.bf16.msra.mxu0 %v5425_v5  ;;  %v6441_v5 = vld [vmem:[#allocation7 + $0x7c4] ss:$8 sps:$4 sm:$0xff]  }
 0x3a8   : > { %2845 = vmatprep.subr.bf16.mxu0 %v5433_v6  ;;  %v6444_v6 = vld [vmem:[#allocation7 + $0x6d0] ss:$8 sps:$4 sm:$0xff]  }
 0x3a9   : > { %3088 = vmatpush2.bf16.msra.mxu1 %v5428_v16  ;;  %v6447_v16 = vld [vmem:[#allocation7 + $0x6c4] ss:$8 sps:$4 sm:$0xff]  }
 0x3aa   : > { %3089 = vmatprep.subr.bf16.mxu1 %v5436_v30  ;;  %v6450_v30 = vld [vmem:[#allocation7 + $0x7c0] ss:$8 sps:$4 sm:$0xff]  }
 0x3ab   : > { %2846 = vmatpush2.bf16.msra.mxu0 %v5431_v7  ;;  %6860 = vst [vmem:[#allocation13_spill] sm:$0xff] %v6450_v30  ;;  %v6453_v7 = vld [vmem:[#allocation7 + $0x7b4] ss:$8 sps:$4 sm:$0xff]  }
 0x3ac   : > { %2847 = vmatprep.subr.bf16.mxu0 %v5439_v19  ;;  %6861 = vst [vmem:[#allocation14_spill] sm:$0xff] %v6453_v7  ;;  %v6456_v19 = vld [vmem:[#allocation7 + $0x6c0] ss:$8 sps:$4 sm:$0xff]  }
 0x3ad   : > { %3090 = vmatpush2.bf16.msra.mxu1 %v5434_v44  ;;  %6862 = vst [vmem:[#allocation15_spill] sm:$0xff] %v6456_v19  ;;  %v6459_v44 = vld [vmem:[#allocation7 + $0x6b4] ss:$8 sps:$4 sm:$0xff]  }
 0x3ae   : > { %3091 = vmatprep.subr.bf16.mxu1 %v5442_v8  ;;  %6863 = vst [vmem:[#allocation16_spill] sm:$0xff] %v6459_v44  ;;  %v6462_v8 = vld [vmem:[#allocation7 + $0x7b0] ss:$8 sps:$4 sm:$0xff]  }
 0x3af   : > { %2848 = vmatpush2.bf16.msra.mxu0 %v5437_v10  ;;  %6864 = vst [vmem:[#allocation17_spill] sm:$0xff] %v6462_v8  ;;  %v6468_v10 = vld [vmem:[#allocation7 + $0x6b0] ss:$8 sps:$4 sm:$0xff]  }
 0x3b0   : > { %2849 = vmatprep.subr.bf16.mxu0 %v5445_v11  ;;  %6866 = vst [vmem:[#allocation19_spill] sm:$0xff] %v6468_v10  ;;  %v6471_v11 = vld [vmem:[#allocation7 + $0x6a4] ss:$8 sps:$4 sm:$0xff]  }
 0x3b1   : > { %3092 = vmatpush2.bf16.msra.mxu1 %v5440_v12  ;;  %6867 = vst [vmem:[#allocation20_spill] sm:$0xff] %v6471_v11  ;;  %v6474_v12 = vld [vmem:[#allocation7 + $0x7a0] ss:$8 sps:$4 sm:$0xff]  }
 0x3b2   : > { %3541 = vmatprep.subr.bf16.mxu1 %v5448_v14  ;;  %6868 = vst [vmem:[#allocation21_spill] sm:$0xff] %v6474_v12  ;;  %v6480_v14 = vld [vmem:[#allocation7 + $0x6a0] ss:$8 sps:$4 sm:$0xff]  }
 0x3b3   : > { %2850 = vmatpush2.bf16.msra.mxu0 %v5443_v17  ;;  %6870 = vst [vmem:[#allocation23_spill] sm:$0xff] %v6480_v14  ;;  %v6486_v17 = vld [vmem:[#allocation7 + $0x790] ss:$8 sps:$4 sm:$0xff]  }
 0x3b4   : > { %3094 = vmatmul.mubr.bf16.vlgmr.msra.gmra.mxu1 %v2897_v22  ;;  %3299 = vmatprep.subr.bf16.mxu0 %v5451_v18  ;;  %6872 = vst [vmem:[#allocation25_spill] sm:$0xff] %v6486_v17  ;;  %v6489_v18 = vld [vmem:[#allocation7 + $0x784] ss:$8 sps:$4 sm:$0xff]  }
 0x3b5   : > { %3542 = vmatpush1.bf16.msra.mxu1 %v5446_v20  ;;  %3573 = vmatprep.mubr.bf16.mxu1 %v3378_v52  ;;  %6873 = vst [vmem:[#allocation26_spill] sm:$0xff] %v6489_v18  ;;  %v6492_v20 = vld [vmem:[#allocation7 + $0x690] ss:$8 sps:$4 sm:$0xff]   ;;  %v6495_v22 = vld [vmem:[#allocation7 + $0x684] ss:$8 sps:$4 sm:$0xff]   ;;  %v3104_v52 = vpack.c.bf16 %v6320_v50, %v6320_v50 }
 0x3b6   : > { %2852 = vmatmul.mubr.bf16.vlgmr.msra.gmra.mxu0 %v2624_v13  ;;  %3543 = vmatprep.subr.bf16.mxu1 %v5454_v21  ;;  %v6477_v13 = vld [vmem:[#allocation7 + $0x794] ss:$8 sps:$4 sm:$0xff]   ;;  %6874 = vst [vmem:[#allocation27_spill] sm:$0xff] %v6492_v20  ;;  %6875 = vst [vmem:[#allocation28_spill] sm:$0xff] %v6495_v22  ;;  %v6498_v21 = vld [vmem:[#allocation7 + $0x780] ss:$8 sps:$4 sm:$0xff]  }
 0x3b7   : > { %3300 = vmatpush1.bf16.msra.mxu0 %v5449_v24  ;;  %3331 = vmatprep.mubr.bf16.mxu0 %v3105_v15  ;;  %6869 = vst [vmem:[#allocation22_spill] sm:$0xff] %v6477_v13  ;;  %v6483_v15 = vld [vmem:[#allocation7 + $0x694] ss:$8 sps:$4 sm:$0xff]   ;;  %6876 = vst [vmem:[#allocation29_spill] sm:$0xff] %v6498_v21  ;;  %v1666_v24 = vpop.f32.mrf.mxu0  ;;  %v3377_v29 = vrot.slane %v3104_v52, 2 }
 0x3b8   : > { %3301 = vmatprep.subr.bf16.mxu0 %v5457_v25  ;;  %6871 = vst [vmem:[#allocation24_spill] sm:$0xff] %v6483_v15  ;;  %v6504_v25 = vld [vmem:[#allocation7 + $0x680] ss:$8 sps:$4 sm:$0xff]   ;;  %v6512_v50 = vld [vmem:[#allocation7 + $0x870] ss:$8 sps:$4 sm:$0xff]  }
 0x3b9   : > { %3544 = vmatpush1.bf16.msra.mxu1 %v5452_v42  ;;  %6877 = vst [vmem:[#allocation30_spill] sm:$0xff] %v6504_v25  ;;  %v6507_v42 = vld [vmem:[#allocation7 + $0x874] ss:$8 sps:$4 sm:$0xff]   ;;  %6879 = vst [vmem:[#allocation32_spill] sm:$0xff] %v6512_v50 }
 0x3ba   : > { %3545 = vmatprep.subr.bf16.mxu1 %v5460_v26  ;;  %6878 = vst [vmem:[#allocation31_spill] sm:$0xff] %v6507_v42  ;;  %v1667_v26 = vadd.f32 %v1666_v24, %v6312_v23 }
 0x3bb   : > { %3302 = vmatpush1.bf16.msra.mxu0 %v6339_v27 }
 0x3bc   : > { %3303 = vmatprep.subr.bf16.mxu0 %v6341_v28 }
 0x3bd   : > { %3546 = vmatpush1.bf16.msra.mxu1 %v6343_v31 }
 0x3be   : > { %3547 = vmatprep.subr.bf16.mxu1 %v6345_v32 }
 0x3bf   : > { %3304 = vmatpush1.bf16.msra.mxu0 %v6348_v33 }
 0x3c0   : > { %3305 = vmatprep.subr.bf16.mxu0 %v6351_v34 }
 0x3c1   : > { %3548 = vmatpush1.bf16.msra.mxu1 %v6354_v35 }
 0x3c2   : > { %3549 = vmatprep.subr.bf16.mxu1 %v6357_v36 }
 0x3c3   : > { %3306 = vmatpush1.bf16.msra.mxu0 %v6360_v37 }
 0x3c4   : > { %3307 = vmatprep.subr.bf16.mxu0 %v6363_v38 }
 0x3c5   : > { %3550 = vmatpush1.bf16.msra.mxu1 %v6366_v39 }
 0x3c6   : > { %3551 = vmatprep.subr.bf16.mxu1 %v6369_v41 }
 0x3c7   : > { %3308 = vmatpush1.bf16.msra.mxu0 %v6372_v40 }
 0x3c8   : > { %3309 = vmatprep.subr.bf16.mxu0 %v6375_v43 }
 0x3c9   : > { %3552 = vmatpush1.bf16.msra.mxu1 %v6378_v45 }
 0x3ca   : > { %3553 = vmatprep.subr.bf16.mxu1 %v6381_v46 }
 0x3cb   : > { %3310 = vmatpush1.bf16.msra.mxu0 %v6384_v47 }
 0x3cc   : > { %3311 = vmatprep.subr.bf16.mxu0 %v6387_v48 }
 0x3cd   : > { %3554 = vmatpush1.bf16.msra.mxu1 %v6390_v49 }
 0x3ce   : > { %3555 = vmatprep.subr.bf16.mxu1 %v6393_v51 }
 0x3cf   : > { %3312 = vmatpush1.bf16.msra.mxu0 %v6396_v53 }
 0x3d0   : > { %3313 = vmatprep.subr.bf16.mxu0 %v6399_v54 }
 0x3d1   : > { %3556 = vmatpush1.bf16.msra.mxu1 %v6402_v55 }
 0x3d2   : > { %3557 = vmatprep.subr.bf16.mxu1 %v6405_v56 }
 0x3d3   : > { %3314 = vmatpush1.bf16.msra.mxu0 %v6408_v58 }
 0x3d4   : > { %3315 = vmatprep.subr.bf16.mxu0 %v6411_v59 }
 0x3d5   : > { %3558 = vmatpush2.bf16.msra.mxu1 %v6414_v60 }
 0x3d6   : > { %3559 = vmatprep.subr.bf16.mxu1 %v6417_v61 }
 0x3d7   : > { %3316 = vmatpush2.bf16.msra.mxu0 %v6420_v62 }
 0x3d8   : > { %3317 = vmatprep.subr.bf16.mxu0 %v6423_v63 }
 0x3d9   : > { %3560 = vmatpush2.bf16.msra.mxu1 %v6426_v0 }
 0x3da   : > { %3561 = vmatprep.subr.bf16.mxu1 %v6429_v1 }
 0x3db   : > { %3318 = vmatpush2.bf16.msra.mxu0 %v6432_v2 }
 0x3dc   : > { %3319 = vmatprep.subr.bf16.mxu0 %v6435_v3 }
 0x3dd   : > { %3562 = vmatpush2.bf16.msra.mxu1 %v6438_v4 }
 0x3de   : > { %3563 = vmatprep.subr.bf16.mxu1 %v6441_v5 }
 0x3df   : > { %3320 = vmatpush2.bf16.msra.mxu0 %v6444_v6 }
 0x3e0   : > { %3321 = vmatprep.subr.bf16.mxu0 %v6447_v16 }
 0x3e1   : > { %3564 = vmatpush2.bf16.msra.mxu1 %v6450_v30 }
 0x3e2   : > { %3565 = vmatprep.subr.bf16.mxu1 %v6453_v7 }
 0x3e3   : > { %3322 = vmatpush2.bf16.msra.mxu0 %v6456_v19 }
 0x3e4   : > { %3323 = vmatprep.subr.bf16.mxu0 %v6459_v44 }
 0x3e5   : > { %3566 = vmatpush2.bf16.msra.mxu1 %v6462_v8 }
 0x3e6   : > { %3567 = vmatprep.subr.bf16.mxu1 %v6465_v9 }
 0x3e7   : > { %3324 = vmatpush2.bf16.msra.mxu0 %v6468_v10 }
 0x3e8   : > { %3325 = vmatprep.subr.bf16.mxu0 %v6471_v11 }
 0x3e9   : > { %3568 = vmatpush2.bf16.msra.mxu1 %v6474_v12  ;;  %v6534_v12 = vld [vmem:[#allocation7 + $0x850] ss:$8 sps:$4 sm:$0xff]  }
 0x3ea   : > { %3569 = vmatprep.subr.bf16.mxu1 %v6477_v13  ;;  %v5598_v13 = vld [vmem:[#allocation7 + $0x154] ss:$8 sps:$4 sm:$0xff]   ;;  %6883 = vst [vmem:[#allocation36_spill] sm:$0xff] %v6534_v12 }
 0x3eb   : > { %3326 = vmatpush2.bf16.msra.mxu0 %v6480_v14 }
 0x3ec   : > { %3327 = vmatprep.subr.bf16.mxu0 %v6483_v15  ;;  %v5595_v15 = vld [vmem:[#allocation7 + $0x170] ss:$8 sps:$4 sm:$0xff]  }
 0x3ed   : > { %3570 = vmatpush2.bf16.msra.mxu1 %v6486_v17  ;;  %v5594_v17 = vld [vmem:[#allocation7 + $0x174] ss:$8 sps:$4 sm:$0xff]  }
 0x3ee   : > { %3571 = vmatprep.subr.bf16.mxu1 %v6489_v18 }
 0x3ef   : > { %3328 = vmatpush2.bf16.msra.mxu0 %v6492_v20  ;;  %v6515_v20 = vld [vmem:[#allocation7 + $0x864] ss:$8 sps:$4 sm:$0xff]  }
 0x3f0   : > { %3329 = vmatprep.subr.bf16.mxu0 %v6495_v22  ;;  %6880 = vst [vmem:[#allocation33_spill] sm:$0xff] %v6515_v20  ;;  %v3585_v22 = vpack.c.bf16 %v1667_v26, %v1667_v26 }
 0x3f1   : > { %3572 = vmatpush2.bf16.msra.mxu1 %v6498_v21  ;;  %v5596_v21 = vld [vmem:[#allocation7 + $0x164] ss:$8 sps:$4 sm:$0xff]  }
 0x3f2   : > { %3990 = vmatprep.subr.bf16.mxu1 %v5594_v17  ;;  %v3822_v17 = vld [vmem:[%s6777_s9] sm:$0xf] }
 0x3f3   : > { %3330 = vmatpush2.bf16.msra.mxu0 %v6504_v25  ;;  %3825 = vperm.xlu1 %5046, %v3822_v17   ;;  %v5599_v17 = vld [vmem:[#allocation7 + $0x150] ss:$8 sps:$4 sm:$0xff]  }
 0x3f4   : > { %3574 = vmatmul.mubr.bf16.vlgmr.msra.gmra.mxu1 %v3377_v29  ;;  %v2137_v18 = vpop.f32.mrf.mxu1  ;;  %3779 = vmatprep.subr.bf16.mxu0 %v6507_v42  ;;  %v6523_v29 = vld [vmem:[#allocation7 + $0x860] ss:$8 sps:$4 sm:$0xff]   ;;  %v6529_v42 = vld [vmem:[#allocation7 + $0x854] ss:$8 sps:$4 sm:$0xff]  }
 0x3f5   : > { %3991 = vmatpush1.bf16.msra.mxu1 %v5595_v15  ;;  %6881 = vst [vmem:[#allocation34_spill] sm:$0xff] %v6523_v29  ;;  %v3852_v15 = vld [vmem:[%s6780_s12] sm:$0xf]  ;;  %6882 = vst [vmem:[#allocation35_spill] sm:$0xff] %v6529_v42 }
 0x3f6   : > { %3332 = vmatmul.mubr.bf16.vlgmr.msra.gmra.mxu0 %v3104_v52  ;;  %v1936_v23 = vpop.f32.mrf.mxu0  ;;  %v2139_v24 = vpop.f32.mrf.mxu1  ;;  %3992 = vmatprep.subr.bf16.mxu1 %v5596_v21  ;;  %v5597_v21 = vld [vmem:[#allocation7 + $0x160] ss:$8 sps:$4 sm:$0xff]  }
 0x3f7   : > { %v6520_v25 = vadd.f32 %v2137_v18, %v1936_v23  ;;  %3780 = vmatpush1.bf16.msra.mxu0 %v6512_v50  ;;  %3811 = vmatprep.mubr.bf16.mxu0 %v3585_v22  ;;  %v3851_v18 = vpop.xlane.xlu0 %3850 }
 0x3f8   : > { %v1938_v52 = vpop.f32.mrf.mxu0  ;;  %v2141_v26 = vpop.f32.mrf.mxu1  ;;  %3781 = vmatprep.subr.bf16.mxu0 %v6515_v20  ;;  %v3853_v50 = vadd.f32 %v3852_v15, %v3851_v18  ;;  %v6537_v20 = vld [vmem:[#allocation7 + $0x844] ss:$8 sps:$4 sm:$0xff]   ;;  %v6546_v15 = vld [vmem:[#allocation7 + $0x834] ss:$8 sps:$4 sm:$0xff]   ;;  %v5601_v18 = vld [vmem:[#allocation7 + $0x140] ss:$8 sps:$4 sm:$0xff]  }
 0x3f9   : > { %v6531_v14 = vadd.f32 %v2139_v24, %v1938_v52  ;;  %3993 = vmatpush1.bf16.msra.mxu1 %v5597_v21  ;;  %6884 = vst [vmem:[#allocation37_spill] sm:$0xff] %v6537_v20  ;;  %v4399_v24 = vld [vmem:[%s6782_s14] sm:$0xf]  ;;  %v5600_v52 = vld [vmem:[#allocation7 + $0x144] ss:$8 sps:$4 sm:$0xff]   ;;  %6886 = vst [vmem:[#allocation39_spill] sm:$0xff] %v6546_v15 }
 0x3fa   : > { %v1940_v23 = vpop.f32.mrf.mxu0  ;;  %v2142_v22 = vpop.f32.mrf.mxu1  ;;  %3994 = vmatprep.subr.bf16.mxu1 %v5598_v13  ;;  %3856 = vperm.xlu1 %5046, %v3853_v50   ;;  %v6543_v13 = vld [vmem:[#allocation7 + $0x840] ss:$8 sps:$4 sm:$0xff]   ;;  %v5602_v50 = vld [vmem:[#allocation7 + $0x134] ss:$8 sps:$4 sm:$0xff]   ;;  %v6549_v21 = vld [vmem:[#allocation7 + $0x830] ss:$8 sps:$4 sm:$0xff]  }
 0x3fb   : > { %3782 = vmatpush1.bf16.msra.mxu0 %v6523_v29  ;;  %6885 = vst [vmem:[#allocation38_spill] sm:$0xff] %v6543_v13  ;;  %6887 = vst [vmem:[#allocation40_spill] sm:$0xff] %v6549_v21  ;;  %v6552_v23 = vld [vmem:[#allocation7 + $0x824] ss:$8 sps:$4 sm:$0xff]   ;;  %v5603_v22 = vld [vmem:[#allocation7 + $0x130] ss:$8 sps:$4 sm:$0xff]  }
 0x3fc   : > { %v1941_v26 = vpop.f32.mrf.mxu0  ;;  %3783 = vmatprep.subr.bf16.mxu0 %v6529_v42  ;;  %6888 = vst [vmem:[#allocation41_spill] sm:$0xff] %v6552_v23 }
 0x3fd   : > { %3995 = vmatpush1.bf16.msra.mxu1 %v5599_v17  ;;  %v5604_v26 = vld [vmem:[#allocation7 + $0x124] ss:$8 sps:$4 sm:$0xff]   ;;  %v6555_v17 = vld [vmem:[#allocation7 + $0x820] ss:$8 sps:$4 sm:$0xff]  }
 0x3fe   : > { %3996 = vmatprep.subr.bf16.mxu1 %v5600_v52  ;;  %4402 = vperm.xlu1 %5046, %v4399_v24   ;;  %6889 = vst [vmem:[#allocation42_spill] sm:$0xff] %v6555_v17  ;;  %v6558_v24 = vld [vmem:[#allocation7 + $0x814] ss:$8 sps:$4 sm:$0xff]   ;;  %v5605_v52 = vld [vmem:[#allocation7 + $0x120] ss:$8 sps:$4 sm:$0xff]  }
 0x3ff   : > { %3784 = vmatpush1.bf16.msra.mxu0 %v6534_v12  ;;  %6890 = vst [vmem:[#allocation43_spill] sm:$0xff] %v6558_v24 }
 0x400   : > { %3785 = vmatprep.subr.bf16.mxu0 %v6537_v20 }
 0x401   : > { %3997 = vmatpush1.bf16.msra.mxu1 %v5601_v18  ;;  %v5606_v18 = vld [vmem:[#allocation7 + $0x114] ss:$8 sps:$4 sm:$0xff]  }
 0x402   : > { %3998 = vmatprep.subr.bf16.mxu1 %v5602_v50  ;;  %v6561_v50 = vld [vmem:[#allocation7 + $0x810] ss:$8 sps:$4 sm:$0xff]  }
 0x403   : > { %3786 = vmatpush1.bf16.msra.mxu0 %v6543_v13  ;;  %6891 = vst [vmem:[#allocation44_spill] sm:$0xff] %v6561_v50 }
 0x404   : > { %3787 = vmatprep.subr.bf16.mxu0 %v6546_v15 }
 0x405   : > { %3999 = vmatpush1.bf16.msra.mxu1 %v5603_v22  ;;  %v6564_v22 = vld [vmem:[#allocation7 + $0x804] ss:$8 sps:$4 sm:$0xff]  }
 0x406   : > { %4000 = vmatprep.subr.bf16.mxu1 %v5604_v26  ;;  %6892 = vst [vmem:[#allocation45_spill] sm:$0xff] %v6564_v22  ;;  %v5607_v26 = vld [vmem:[#allocation7 + $0x110] ss:$8 sps:$4 sm:$0xff]  }
 0x407   : > { %3788 = vmatpush1.bf16.msra.mxu0 %v6549_v21  ;;  %v5608_v21 = vld [vmem:[#allocation7 + $0x104] ss:$8 sps:$4 sm:$0xff]  }
 0x408   : > { %3789 = vmatprep.subr.bf16.mxu0 %v6552_v23  ;;  %v6567_v23 = vld [vmem:[#allocation7 + $0x800] ss:$8 sps:$4 sm:$0xff]  }
 0x409   : > { %4001 = vmatpush1.bf16.msra.mxu1 %v5605_v52  ;;  %6893 = vst [vmem:[#allocation46_spill] sm:$0xff] %v6567_v23  ;;  %v6570_v52 = vld [vmem:[#allocation7 + $0x8f4] ss:$8 sps:$4 sm:$0xff]  }
 0x40a   : > { %4002 = vmatprep.subr.bf16.mxu1 %v5606_v18  ;;  %6894 = vst [vmem:[#allocation47_spill] sm:$0xff] %v6570_v52  ;;  %v5609_v18 = vld [vmem:[#allocation7 + $0x100] ss:$8 sps:$4 sm:$0xff]  }
 0x40b   : > { %3790 = vmatpush1.bf16.msra.mxu0 %v6555_v17  ;;  %v5610_v17 = vld [vmem:[#allocation7 + $0x1f4] ss:$8 sps:$4 sm:$0xff]  }
 0x40c   : > { %3791 = vmatprep.subr.bf16.mxu0 %v6558_v24  ;;  %v6573_v24 = vld [vmem:[#allocation7 + $0x8f0] ss:$8 sps:$4 sm:$0xff]  }
 0x40d   : > { %4003 = vmatpush1.bf16.msra.mxu1 %v5607_v26  ;;  %6895 = vst [vmem:[#allocation48_spill] sm:$0xff] %v6573_v24  ;;  %v6576_v26 = vld [vmem:[#allocation7 + $0x8e4] ss:$8 sps:$4 sm:$0xff]  }
 0x40e   : > { %4004 = vmatprep.subr.bf16.mxu1 %v5608_v21  ;;  %6896 = vst [vmem:[#allocation49_spill] sm:$0xff] %v6576_v26  ;;  %v5611_v21 = vld [vmem:[#allocation7 + $0x1f0] ss:$8 sps:$4 sm:$0xff]  }
 0x40f   : > { %3792 = vmatpush1.bf16.msra.mxu0 %v6561_v50  ;;  %v5612_v50 = vld [vmem:[#allocation7 + $0x1e4] ss:$8 sps:$4 sm:$0xff]  }
 0x410   : > { %3793 = vmatprep.subr.bf16.mxu0 %v6564_v22  ;;  %v6579_v22 = vld [vmem:[#allocation7 + $0x8e0] ss:$8 sps:$4 sm:$0xff]  }
 0x411   : > { %4005 = vmatpush1.bf16.msra.mxu1 %v5609_v18  ;;  %6897 = vst [vmem:[#allocation50_spill] sm:$0xff] %v6579_v22  ;;  %v6582_v18 = vld [vmem:[#allocation7 + $0x8d4] ss:$8 sps:$4 sm:$0xff]  }
 0x412   : > { %4006 = vmatprep.subr.bf16.mxu1 %v5610_v17  ;;  %6898 = vst [vmem:[#allocation51_spill] sm:$0xff] %v6582_v18  ;;  %v5613_v17 = vld [vmem:[#allocation7 + $0x1e0] ss:$8 sps:$4 sm:$0xff]  }
 0x413   : > { %3794 = vmatpush1.bf16.msra.mxu0 %v6567_v23  ;;  %v5614_v23 = vld [vmem:[#allocation7 + $0x1d4] ss:$8 sps:$4 sm:$0xff]  }
 0x414   : > { %3795 = vmatprep.subr.bf16.mxu0 %v6570_v52  ;;  %v6585_v52 = vld [vmem:[#allocation7 + $0x8d0] ss:$8 sps:$4 sm:$0xff]  }
 0x415   : > { %4007 = vmatpush2.bf16.msra.mxu1 %v5611_v21  ;;  %6899 = vst [vmem:[#allocation52_spill] sm:$0xff] %v6585_v52  ;;  %v6588_v21 = vld [vmem:[#allocation7 + $0x8c4] ss:$8 sps:$4 sm:$0xff]  }
 0x416   : > { %4008 = vmatprep.subr.bf16.mxu1 %v5612_v50  ;;  %6900 = vst [vmem:[#allocation53_spill] sm:$0xff] %v6588_v21  ;;  %v5615_v50 = vld [vmem:[#allocation7 + $0x1d0] ss:$8 sps:$4 sm:$0xff]  }
 0x417   : > { %3796 = vmatpush2.bf16.msra.mxu0 %v6573_v24  ;;  %v5616_v24 = vld [vmem:[#allocation7 + $0x1c4] ss:$8 sps:$4 sm:$0xff]  }
 0x418   : > { %3797 = vmatprep.subr.bf16.mxu0 %v6576_v26  ;;  %v6591_v26 = vld [vmem:[#allocation7 + $0x8c0] ss:$8 sps:$4 sm:$0xff]  }
 0x419   : > { %4009 = vmatpush2.bf16.msra.mxu1 %v5613_v17  ;;  %6901 = vst [vmem:[#allocation54_spill] sm:$0xff] %v6591_v26  ;;  %v6594_v17 = vld [vmem:[#allocation7 + $0x8b4] ss:$8 sps:$4 sm:$0xff]  }
 0x41a   : > { %4010 = vmatprep.subr.bf16.mxu1 %v5614_v23  ;;  %6902 = vst [vmem:[#allocation55_spill] sm:$0xff] %v6594_v17  ;;  %v5617_v23 = vld [vmem:[#allocation7 + $0x1c0] ss:$8 sps:$4 sm:$0xff]  }
 0x41b   : > { %3798 = vmatpush2.bf16.msra.mxu0 %v6579_v22  ;;  %v5618_v22 = vld [vmem:[#allocation7 + $0x1b4] ss:$8 sps:$4 sm:$0xff]  }
 0x41c   : > { %3799 = vmatprep.subr.bf16.mxu0 %v6582_v18  ;;  %v6597_v18 = vld [vmem:[#allocation7 + $0x8b0] ss:$8 sps:$4 sm:$0xff]  }
 0x41d   : > { %4011 = vmatpush2.bf16.msra.mxu1 %v5615_v50  ;;  %6903 = vst [vmem:[#allocation56_spill] sm:$0xff] %v6597_v18  ;;  %v6600_v50 = vld [vmem:[#allocation7 + $0x8a4] ss:$8 sps:$4 sm:$0xff]  }
 0x41e   : > { %4012 = vmatprep.subr.bf16.mxu1 %v5616_v24  ;;  %6904 = vst [vmem:[#allocation57_spill] sm:$0xff] %v6600_v50  ;;  %v5619_v24 = vld [vmem:[#allocation7 + $0x1b0] ss:$8 sps:$4 sm:$0xff]  }
 0x41f   : > { %3800 = vmatpush2.bf16.msra.mxu0 %v6585_v52  ;;  %v5620_v52 = vld [vmem:[#allocation7 + $0x1a4] ss:$8 sps:$4 sm:$0xff]  }
 0x420   : > { %3801 = vmatprep.subr.bf16.mxu0 %v6588_v21  ;;  %v6603_v21 = vld [vmem:[#allocation7 + $0x8a0] ss:$8 sps:$4 sm:$0xff]  }
 0x421   : > { %4013 = vmatpush2.bf16.msra.mxu1 %v5617_v23  ;;  %6905 = vst [vmem:[#allocation58_spill] sm:$0xff] %v6603_v21  ;;  %v6606_v23 = vld [vmem:[#allocation7 + $0x894] ss:$8 sps:$4 sm:$0xff]  }
 0x422   : > { %4014 = vmatprep.subr.bf16.mxu1 %v5618_v22  ;;  %6906 = vst [vmem:[#allocation59_spill] sm:$0xff] %v6606_v23  ;;  %v5621_v22 = vld [vmem:[#allocation7 + $0x1a0] ss:$8 sps:$4 sm:$0xff]  }
 0x423   : > { %3802 = vmatpush2.bf16.msra.mxu0 %v6591_v26  ;;  %v5622_v26 = vld [vmem:[#allocation7 + $0x194] ss:$8 sps:$4 sm:$0xff]  }
 0x424   : > { %3803 = vmatprep.subr.bf16.mxu0 %v6594_v17  ;;  %v6609_v17 = vld [vmem:[#allocation7 + $0x890] ss:$8 sps:$4 sm:$0xff]  }
 0x425   : > { %4015 = vmatpush2.bf16.msra.mxu1 %v5619_v24  ;;  %6907 = vst [vmem:[#allocation60_spill] sm:$0xff] %v6609_v17  ;;  %v6612_v24 = vld [vmem:[#allocation7 + $0x884] ss:$8 sps:$4 sm:$0xff]  }
 0x426   : > { %4016 = vmatprep.subr.bf16.mxu1 %v5620_v52  ;;  %6908 = vst [vmem:[#allocation61_spill] sm:$0xff] %v6612_v24  ;;  %v5623_v52 = vld [vmem:[#allocation7 + $0x190] ss:$8 sps:$4 sm:$0xff]  }
 0x427   : > { %3804 = vmatpush2.bf16.msra.mxu0 %v6597_v18  ;;  %v5624_v18 = vld [vmem:[#allocation7 + $0x184] ss:$8 sps:$4 sm:$0xff]  }
 0x428   : > { %3805 = vmatprep.subr.bf16.mxu0 %v6600_v50  ;;  %v6615_v50 = vld [vmem:[#allocation7 + $0x880] ss:$8 sps:$4 sm:$0xff]  }
 0x429   : > { %4017 = vmatpush2.bf16.msra.mxu1 %v5621_v22  ;;  %6909 = vst [vmem:[#allocation62_spill] sm:$0xff] %v6615_v50  ;;  %v5625_v22 = vld [vmem:[#allocation7 + $0x180] ss:$8 sps:$4 sm:$0xff]  }
 0x42a   : > { %4018 = vmatprep.subr.bf16.mxu1 %v5622_v26  ;;  %v5626_v26 = vld [vmem:[#allocation7 + $0x274] ss:$8 sps:$4 sm:$0xff]  }
 0x42b   : > { %3806 = vmatpush2.bf16.msra.mxu0 %v6603_v21 }
 0x42c   : > { %3807 = vmatprep.subr.bf16.mxu0 %v6606_v23  ;;  %v3584_v23 = vpack.c.bf16 %v6324_v57, %v6324_v57 }
 0x42d   : > { %4019 = vmatpush2.bf16.msra.mxu1 %v5623_v52 }
 0x42e   : > { %4020 = vmatprep.subr.bf16.mxu1 %v5624_v18 }
 0x42f   : > { %3808 = vmatpush2.bf16.msra.mxu0 %v6609_v17  ;;  %v6910_v17 = vmov 0.0  }
 0x430   : > { %3809 = vmatprep.subr.bf16.mxu0 %v6612_v24 }
 0x431   : > { %4021 = vmatpush2.bf16.msra.mxu1 %v5625_v22 }
 0x432   : > { %4074 = vmatprep.subr.bf16.mxu1 %v5626_v26 }
 0x433   : > { %3810 = vmatpush2.bf16.msra.mxu0 %v6615_v50 }
 0x434   : > { %v2615_v21 = vpop.f32.mrf.mxu1 }
 0x436   : > { %v2373_v15 = vpop.f32.mrf.mxu0  ;;  %v2617_v52 = vpop.f32.mrf.mxu1  ;;  %3812 = vmatmul.mubr.bf16.vlgmr.msra.gmra.mxu0 %v3584_v23 }
 0x437   : > { %v2380_v18 = vadd.f32 %v2373_v15, %v6520_v25  ;;  %3951 = vmatprep.mubr.f32.mxu0 %v6910_v17 }
 0x438   : > { %v2375_v13 = vpop.f32.mrf.mxu0  ;;  %v2619_v20 = vpop.f32.mrf.mxu1 }
 0x439   : > { %v2381_v24 = vadd.f32 %v2375_v13, %v6531_v14  ;;  %v2622_v22 = vadd.f32 %v2615_v21, %v2380_v18 }
 0x43a   : > { %v2377_v12 = vpop.f32.mrf.mxu0  ;;  %v2620_v26 = vpop.f32.mrf.mxu1 }
 0x43b   : > { %v2623_v42 = vadd.f32 %v2617_v52, %v2381_v24 }
 0x43c   : > { %v2378_v50 = vpop.f32.mrf.mxu0 }
 0x474   : > { %v3095_v29 = vpop.f32.mrf.mxu1 }
 0x476   : > { %v2853_v11 = vpop.f32.mrf.mxu0  ;;  %v3097_v57 = vpop.f32.mrf.mxu1 }
 0x477   : > { %v2860_v10 = vadd.f32 %v2853_v11, %v2622_v22 }
 0x478   : > { %v2855_v9 = vpop.f32.mrf.mxu0  ;;  %v3099_v8 = vpop.f32.mrf.mxu1 }
 0x479   : > { %v2861_v23 = vadd.f32 %v2855_v9, %v2623_v42  ;;  %v3102_v44 = vadd.f32 %v3095_v29, %v2860_v10  ;;  %v3826_v9 = vpop.permute.xlu1 %3825 }
 0x47a   : > { %v2857_v25 = vpop.f32.mrf.mxu0  ;;  %v3100_v15 = vpop.f32.mrf.mxu1 }
 0x47b   : > { %v3103_v19 = vadd.f32 %v3097_v57, %v2861_v23 }
 0x47c   : > { %v2858_v7 = vpop.f32.mrf.mxu0 }
 0x4b4   : > { %v3575_v20 = vpop.f32.mrf.mxu1 }
 0x4b6   : > { %v3333_v30 = vpop.f32.mrf.mxu0  ;;  %v3577_v14 = vpop.f32.mrf.mxu1 }
 0x4b7   : > { %v3340_v13 = vadd.f32 %v3333_v30, %v3102_v44  ;;  %v3857_v30 = vpop.permute.xlu1 %3856 }
 0x4b8   : > { %v3335_v12 = vpop.f32.mrf.mxu0  ;;  %v3579_v21 = vpop.f32.mrf.mxu1 }
 0x4b9   : > { %v3341_v24 = vadd.f32 %v3335_v12, %v3103_v19  ;;  %v3582_v50 = vadd.f32 %v3575_v20, %v3340_v13  ;;  %v3861_v19 = vld [vmem:[%s6911_s4] sm:$0xff]  ;;  %v5629_v12 = vld [vmem:[#allocation7 + $0x64] ss:$8 sps:$4 sm:$0xff]  }
 0x4ba   : > { %v3337_v52 = vpop.f32.mrf.mxu0  ;;  %v3580_v18 = vpop.f32.mrf.mxu1  ;;  %v5627_v20 = vld [vmem:[#allocation7 + $0x74] ss:$8 sps:$4 sm:$0xff]   ;;  %v5628_v13 = vld [vmem:[#allocation7 + $0x70] ss:$8 sps:$4 sm:$0xff]  }
 0x4bb   : > { %v3583_v26 = vadd.f32 %v3577_v14, %v3341_v24  ;;  %v3862_v14 = vld [vmem:[%s6911_s4 + $0x8] sm:$0xff]  ;;  %v3863_v24 = vld [vmem:[%s6911_s4 + $0x10] sm:$0xff]  ;;  %v5632_v18 = vld [vmem:[#allocation7 + $0x50] ss:$8 sps:$4 sm:$0xff]  }
 0x4bc   : > { %v3338_v11 = vpop.f32.mrf.mxu0  ;;  %v5631_v52 = vld [vmem:[#allocation7 + $0x54] ss:$8 sps:$4 sm:$0xff]  }
 0x4bd   : > { %v5633_v11 = vld [vmem:[#allocation7 + $0x44] ss:$8 sps:$4 sm:$0xff]  }
 0x4f6   : > { %v3813_v22 = vpop.f32.mrf.mxu0 }
 0x4f7   : > { %v3820_v8 = vadd.f32 %v3813_v22, %v3582_v50  ;;  %v5630_v50 = vld [vmem:[#allocation7 + $0x60] ss:$8 sps:$4 sm:$0xff]  }
 0x4f8   : > { %v3815_v10 = vpop.f32.mrf.mxu0  ;;  %v5634_v22 = vld [vmem:[#allocation7 + $0x40] ss:$8 sps:$4 sm:$0xff]  }
 0x4f9   : > { %v3828_v42 = vadd.f32 %v3826_v9, %v3820_v8  ;;  %v3821_v29 = vadd.f32 %v3815_v10, %v3583_v26  ;;  %v3864_v26 = vld [vmem:[%s6911_s4 + $0x18] sm:$0xff] }
 0x4fa   : > { %v3817_v57 = vpop.f32.mrf.mxu0  ;;  %v5635_v8 = vld [vmem:[#allocation7 + $0x34] ss:$8 sps:$4 sm:$0xff]   ;;  %v5637_v10 = vld [vmem:[#allocation7 + $0x24] ss:$8 sps:$4 sm:$0xff]  }
 0x4fb   : > { %v3829_v7 = vadd.f32 %v3826_v9, %v3821_v29  ;;  %v3830_v23 = vmax.f32 %v3828_v42, 0.0  ;;  %v5636_v9 = vld [vmem:[#allocation7 + $0x30] ss:$8 sps:$4 sm:$0xff]   ;;  %v5638_v42 = vld [vmem:[#allocation7 + $0x20] ss:$8 sps:$4 sm:$0xff]  }
 0x4fc   : > { %v3818_v25 = vpop.f32.mrf.mxu0  ;;  %v5639_v29 = vld [vmem:[#allocation7 + $0x14] ss:$8 sps:$4 sm:$0xff]   ;;  %v5640_v57 = vld [vmem:[#allocation7 + $0x10] ss:$8 sps:$4 sm:$0xff]  }
 0x4fd   : > { %v3831_v15 = vmax.f32 %v3829_v7, 0.0  ;;  %v3859_v21 = vadd.f32 %v3857_v30, %v3830_v23  ;;  %v5641_v7 = vld [vmem:[#allocation7 + $0x4] ss:$8 sps:$4 sm:$0xff]   ;;  %v5642_v23 = vld [vmem:[#allocation7] ss:$8 sps:$4 sm:$0xff]  }
 0x4fe   : > { %v5643_v25 = vld [vmem:[#allocation7 + $0xf4] ss:$8 sps:$4 sm:$0xff]  }
 0x4ff   : > { %v3860_v44 = vadd.f32 %v3857_v30, %v3831_v15  ;;  %v5644_v15 = vld [vmem:[#allocation7 + $0xf0] ss:$8 sps:$4 sm:$0xff]   ;;  %v5646_v30 = vld [vmem:[#allocation7 + $0xe0] ss:$8 sps:$4 sm:$0xff]  }
 0x501   : > { %4942 = vmatprep.subr.msk.mxu0 %vm1451_vm4, %v3860_v44  ;;  %v5647_v44 = vld [vmem:[#allocation7 + $0xd4] ss:$8 sps:$4 sm:$0xff]  }
 0x502   : > { %4943 = vmatpush1.msk.msra.mxu0 %vm1451_vm4, %v3859_v21  ;;  %v5648_v21 = vld [vmem:[#allocation7 + $0xd0] ss:$8 sps:$4 sm:$0xff]  }
 0x503   : > { %4944 = vmatmul.mubr.msk.f32.vlgmr.msra.gmra.mxu0 %vm1435_vm5, %v3861_v19  ;;  %4031 = vmatprep.subr.bf16.mxu0 %v5627_v20  ;;  %v5649_v19 = vld [vmem:[#allocation7 + $0xc4] ss:$8 sps:$4 sm:$0xff]   ;;  %v5650_v20 = vld [vmem:[#allocation7 + $0xc0] ss:$8 sps:$4 sm:$0xff]  }
 0x504   : > { %3957 = vmatprep.mubr.f32.mxu0 %v6910_v17  ;;  %4032 = vmatpush1.bf16.msra.mxu0 %v5628_v13  ;;  %v5652_v13 = vld [vmem:[#allocation7 + $0xb0] ss:$8 sps:$4 sm:$0xff]  }
 0x505   : > { %4033 = vmatprep.subr.bf16.mxu0 %v5629_v12  ;;  %v5653_v12 = vld [vmem:[#allocation7 + $0xa4] ss:$8 sps:$4 sm:$0xff]  }
 0x507   : > { %4945 = vmatmul.mubr.msk.f32.gmra.mxu0 %vm1435_vm5, %v3862_v14  ;;  %v5651_v14 = vld [vmem:[#allocation7 + $0xb4] ss:$8 sps:$4 sm:$0xff]  }
 0x508   : > { %3963 = vmatprep.mubr.f32.mxu0 %v6910_v17  ;;  %4034 = vmatpush1.bf16.msra.mxu0 %v5630_v50  ;;  %v5655_v50 = vld [vmem:[#allocation7 + $0x94] ss:$8 sps:$4 sm:$0xff]  }
 0x509   : > { %4035 = vmatprep.subr.bf16.mxu0 %v5631_v52  ;;  %v5656_v52 = vld [vmem:[#allocation7 + $0x90] ss:$8 sps:$4 sm:$0xff]  }
 0x50b   : > { %4946 = vmatmul.mubr.msk.f32.gmra.mxu0 %vm1435_vm5, %v3863_v24  ;;  %v5654_v24 = vld [vmem:[#allocation7 + $0xa0] ss:$8 sps:$4 sm:$0xff]  }
 0x50c   : > { %4036 = vmatpush1.bf16.msra.mxu0 %v5632_v18  ;;  %3969 = vmatprep.mubr.f32.mxu0 %v6910_v17  ;;  %v5657_v18 = vld [vmem:[#allocation7 + $0x84] ss:$8 sps:$4 sm:$0xff]  }
 0x50d   : > { %4037 = vmatprep.subr.bf16.mxu0 %v5633_v11  ;;  %v5659_v11 = vld [vmem:[#allocation7 + $0x374] ss:$8 sps:$4 sm:$0xff]  }
 0x50f   : > { %4947 = vmatmul.mubr.msk.f32.gmra.mxu0 %vm1435_vm5, %v3864_v26  ;;  %v5658_v26 = vld [vmem:[#allocation7 + $0x80] ss:$8 sps:$4 sm:$0xff]  }
 0x510   : > { %4038 = vmatpush1.bf16.msra.mxu0 %v5634_v22  ;;  %3975 = vmatprep.mubr.f32.mxu0 %v6910_v17  ;;  %v5645_v17 = vld [vmem:[#allocation7 + $0xe4] ss:$8 sps:$4 sm:$0xff]   ;;  %v3865_v22 = vld [vmem:[%s6911_s4 + $0x20] sm:$0xf] }
 0x511   : > { %4039 = vmatprep.subr.bf16.mxu0 %v5635_v8 }
 0x513   : > { %4948 = vmatmul.mubr.msk.f32.gmra.mxu0 %vm1435_vm5, %v3865_v22  ;;  %v5675_v22 = vld [vmem:[#allocation7 + $0x234] ss:$8 sps:$4 sm:$0xff]  }
 0x514   : > { %4040 = vmatpush1.bf16.msra.mxu0 %v5636_v9 }
 0x515   : > { %4041 = vmatprep.subr.bf16.mxu0 %v5637_v10 }
 0x518   : > { %4042 = vmatpush1.bf16.msra.mxu0 %v5638_v42 }
 0x519   : > { %4043 = vmatprep.subr.bf16.mxu0 %v5639_v29 }
 0x51c   : > { %4044 = vmatpush1.bf16.msra.mxu0 %v5640_v57 }
 0x51d   : > { %4045 = vmatprep.subr.bf16.mxu0 %v5641_v7 }
 0x520   : > { %4046 = vmatpush1.bf16.msra.mxu0 %v5642_v23 }
 0x521   : > { %4047 = vmatprep.subr.bf16.mxu0 %v5643_v25  ;;  %v5660_v25 = vld [vmem:[#allocation7 + $0x370] ss:$8 sps:$4 sm:$0xff]  }
 0x524   : > { %4048 = vmatpush2.bf16.msra.mxu0 %v5644_v15 }
 0x525   : > { %4049 = vmatprep.subr.bf16.mxu0 %v5645_v17  ;;  %v5661_v17 = vld [vmem:[#allocation7 + $0x364] ss:$8 sps:$4 sm:$0xff]  }
 0x528   : > { %4050 = vmatpush2.bf16.msra.mxu0 %v5646_v30  ;;  %v5662_v30 = vld [vmem:[#allocation7 + $0x270] ss:$8 sps:$4 sm:$0xff]  }
 0x529   : > { %4051 = vmatprep.subr.bf16.mxu0 %v5647_v44 }
 0x52c   : > { %4052 = vmatpush2.bf16.msra.mxu0 %v5648_v21  ;;  %v5663_v21 = vld [vmem:[#allocation7 + $0x264] ss:$8 sps:$4 sm:$0xff]  }
 0x52d   : > { %4053 = vmatprep.subr.bf16.mxu0 %v5649_v19  ;;  %v5664_v19 = vld [vmem:[#allocation7 + $0x360] ss:$8 sps:$4 sm:$0xff]  }
 0x530   : > { %4054 = vmatpush2.bf16.msra.mxu0 %v5650_v20  ;;  %v5665_v20 = vld [vmem:[#allocation7 + $0x354] ss:$8 sps:$4 sm:$0xff]  }
 0x531   : > { %4055 = vmatprep.subr.bf16.mxu0 %v5651_v14  ;;  %v5666_v14 = vld [vmem:[#allocation7 + $0x260] ss:$8 sps:$4 sm:$0xff]  }
 0x534   : > { %4056 = vmatpush2.bf16.msra.mxu0 %v5652_v13  ;;  %v5667_v13 = vld [vmem:[#allocation7 + $0x254] ss:$8 sps:$4 sm:$0xff]  }
 0x535   : > { %4057 = vmatprep.subr.bf16.mxu0 %v5653_v12  ;;  %v5668_v12 = vld [vmem:[#allocation7 + $0x350] ss:$8 sps:$4 sm:$0xff]  }
 0x538   : > { %4058 = vmatpush2.bf16.msra.mxu0 %v5654_v24  ;;  %v5669_v24 = vld [vmem:[#allocation7 + $0x344] ss:$8 sps:$4 sm:$0xff]  }
 0x539   : > { %4059 = vmatprep.subr.bf16.mxu0 %v5655_v50  ;;  %v5670_v50 = vld [vmem:[#allocation7 + $0x250] ss:$8 sps:$4 sm:$0xff]  }
 0x53c   : > { %4060 = vmatpush2.bf16.msra.mxu0 %v5656_v52  ;;  %v5671_v52 = vld [vmem:[#allocation7 + $0x244] ss:$8 sps:$4 sm:$0xff]  }
 0x53d   : > { %4061 = vmatprep.subr.bf16.mxu0 %v5657_v18  ;;  %v5672_v18 = vld [vmem:[#allocation7 + $0x340] ss:$8 sps:$4 sm:$0xff]  }
 0x540   : > { %4062 = vmatpush2.bf16.msra.mxu0 %v5658_v26  ;;  %v5673_v26 = vld [vmem:[#allocation7 + $0x334] ss:$8 sps:$4 sm:$0xff]  }
 0x541   : > { %4123 = vmatprep.subr.bf16.mxu0 %v5659_v11  ;;  %v5674_v11 = vld [vmem:[#allocation7 + $0x240] ss:$8 sps:$4 sm:$0xff]  }
 0x5c3   : > { %v3953_v8 = vpop.f32.mrf.mxu0 }
 0x5c4   : > { %v3982_v9 = vpack.c.bf16 %v3953_v8, %v3953_v8  ;;  %v5676_v8 = vld [vmem:[#allocation7 + $0x330] ss:$8 sps:$4 sm:$0xff]  }
 0x5c5   : > { %v3955_v10 = vpop.f32.mrf.mxu0 }
 0x5c6   : > { %v3983_v42 = vpack.c.bf16 %v3955_v10, %v3955_v10  ;;  %v3986_v7 = vrot.slane %v3982_v9, 2  ;;  %v5678_v10 = vld [vmem:[#allocation7 + $0x230] ss:$8 sps:$4 sm:$0xff]  }
 0x5c7   : > { %v6650_v29 = vpop.f32.mrf.mxu0 }
 0x5c8   : > { %v3987_v57 = vrot.slane %v3983_v42, 2  ;;  %4063 = vmatprep.mubr.bf16.mxu0 %v3983_v42  ;;  %v5679_v42 = vld [vmem:[#allocation7 + $0x224] ss:$8 sps:$4 sm:$0xff]  }
 0x5c9   : > { %4064 = vmatmul.mubr.bf16.vlgmr.msra.gmra.mxu0 %v3982_v9  ;;  %v3961_v23 = vpop.f32.mrf.mxu0  ;;  %v5677_v9 = vld [vmem:[#allocation7 + $0x324] ss:$8 sps:$4 sm:$0xff]  }
 0x5ca   : > { %4022 = vmatprep.mubr.bf16.mxu1 %v3987_v57  ;;  %4124 = vmatpush1.bf16.msra.mxu0 %v5660_v25  ;;  %v4073_v15 = vpack.c.bf16 %v3961_v23, %v3961_v23  ;;  %v5680_v57 = vld [vmem:[#allocation7 + $0x320] ss:$8 sps:$4 sm:$0xff]   ;;  %v5683_v25 = vld [vmem:[#allocation7 + $0x214] ss:$8 sps:$4 sm:$0xff]  }
 0x5cb   : > { %4023 = vmatmul.mubr.bf16.vlgmr.msra.gmra.mxu1 %v3986_v7  ;;  %4125 = vmatprep.subr.bf16.mxu0 %v5661_v17  ;;  %v5681_v7 = vld [vmem:[#allocation7 + $0x314] ss:$8 sps:$4 sm:$0xff]   ;;  %v5682_v23 = vld [vmem:[#allocation7 + $0x220] ss:$8 sps:$4 sm:$0xff]   ;;  %v5685_v17 = vld [vmem:[#allocation7 + $0x304] ss:$8 sps:$4 sm:$0xff]  }
 0x5cc   : > { %4075 = vmatpush1.bf16.msra.mxu1 %v5662_v30  ;;  %v4120_v44 = vrot.slane %v4073_v15, 2  ;;  %4106 = vmatprep.mubr.bf16.mxu1 %v4073_v15  ;;  %v5684_v15 = vld [vmem:[#allocation7 + $0x310] ss:$8 sps:$4 sm:$0xff]  }
 0x5cd   : > { %4076 = vmatprep.subr.bf16.mxu1 %v5663_v21  ;;  %v5686_v30 = vld [vmem:[#allocation7 + $0x210] ss:$8 sps:$4 sm:$0xff]   ;;  %v5688_v21 = vld [vmem:[#allocation7 + $0x300] ss:$8 sps:$4 sm:$0xff]  }
 0x5ce   : > { %4126 = vmatpush1.bf16.msra.mxu0 %v5664_v19  ;;  %4155 = vmatprep.mubr.bf16.mxu0 %v4120_v44  ;;  %v5687_v44 = vld [vmem:[#allocation7 + $0x204] ss:$8 sps:$4 sm:$0xff]   ;;  %v5689_v19 = vld [vmem:[#allocation7 + $0x3f4] ss:$8 sps:$4 sm:$0xff]  }
 0x5cf   : > { %4127 = vmatprep.subr.bf16.mxu0 %v5665_v20  ;;  %v5690_v20 = vld [vmem:[#allocation7 + $0x200] ss:$8 sps:$4 sm:$0xff]  }
 0x5d0   : > { %4077 = vmatpush1.bf16.msra.mxu1 %v5666_v14  ;;  %v5691_v14 = vld [vmem:[#allocation7 + $0x2f4] ss:$8 sps:$4 sm:$0xff]  }
 0x5d1   : > { %4078 = vmatprep.subr.bf16.mxu1 %v5667_v13  ;;  %v5692_v13 = vld [vmem:[#allocation7 + $0x3f0] ss:$8 sps:$4 sm:$0xff]  }
 0x5d2   : > { %4128 = vmatpush1.bf16.msra.mxu0 %v5668_v12  ;;  %v5693_v12 = vld [vmem:[#allocation7 + $0x3e4] ss:$8 sps:$4 sm:$0xff]  }
 0x5d3   : > { %4129 = vmatprep.subr.bf16.mxu0 %v5669_v24  ;;  %v5694_v24 = vld [vmem:[#allocation7 + $0x2f0] ss:$8 sps:$4 sm:$0xff]  }
 0x5d4   : > { %4079 = vmatpush1.bf16.msra.mxu1 %v5670_v50  ;;  %v5695_v50 = vld [vmem:[#allocation7 + $0x2e4] ss:$8 sps:$4 sm:$0xff]  }
 0x5d5   : > { %4080 = vmatprep.subr.bf16.mxu1 %v5671_v52  ;;  %v5696_v52 = vld [vmem:[#allocation7 + $0x3e0] ss:$8 sps:$4 sm:$0xff]  }
 0x5d6   : > { %4130 = vmatpush1.bf16.msra.mxu0 %v5672_v18  ;;  %v5697_v18 = vld [vmem:[#allocation7 + $0x3d4] ss:$8 sps:$4 sm:$0xff]  }
 0x5d7   : > { %4131 = vmatprep.subr.bf16.mxu0 %v5673_v26  ;;  %v5698_v26 = vld [vmem:[#allocation7 + $0x2e0] ss:$8 sps:$4 sm:$0xff]  }
 0x5d8   : > { %4081 = vmatpush1.bf16.msra.mxu1 %v5674_v11  ;;  %v5699_v11 = vld [vmem:[#allocation7 + $0x2d4] ss:$8 sps:$4 sm:$0xff]  }
 0x5d9   : > { %4082 = vmatprep.subr.bf16.mxu1 %v5675_v22  ;;  %v5700_v22 = vld [vmem:[#allocation7 + $0x3d0] ss:$8 sps:$4 sm:$0xff]  }
 0x5da   : > { %4132 = vmatpush1.bf16.msra.mxu0 %v5676_v8  ;;  %v5701_v8 = vld [vmem:[#allocation7 + $0x3c4] ss:$8 sps:$4 sm:$0xff]  }
 0x5db   : > { %4133 = vmatprep.subr.bf16.mxu0 %v5677_v9  ;;  %v5702_v9 = vld [vmem:[#allocation7 + $0x2d0] ss:$8 sps:$4 sm:$0xff]  }
 0x5dc   : > { %4083 = vmatpush1.bf16.msra.mxu1 %v5678_v10  ;;  %v5703_v10 = vld [vmem:[#allocation7 + $0x2c4] ss:$8 sps:$4 sm:$0xff]  }
 0x5dd   : > { %4084 = vmatprep.subr.bf16.mxu1 %v5679_v42  ;;  %v5704_v42 = vld [vmem:[#allocation7 + $0x3c0] ss:$8 sps:$4 sm:$0xff]  }
 0x5de   : > { %4134 = vmatpush1.bf16.msra.mxu0 %v5680_v57  ;;  %v5705_v57 = vld [vmem:[#allocation7 + $0x3b4] ss:$8 sps:$4 sm:$0xff]  }
 0x5df   : > { %4135 = vmatprep.subr.bf16.mxu0 %v5681_v7  ;;  %v5706_v7 = vld [vmem:[#allocation7 + $0x2c0] ss:$8 sps:$4 sm:$0xff]  }
 0x5e0   : > { %4085 = vmatpush1.bf16.msra.mxu1 %v5682_v23  ;;  %v5707_v23 = vld [vmem:[#allocation7 + $0x2b4] ss:$8 sps:$4 sm:$0xff]  }
 0x5e1   : > { %4086 = vmatprep.subr.bf16.mxu1 %v5683_v25  ;;  %v5708_v25 = vld [vmem:[#allocation7 + $0x3b0] ss:$8 sps:$4 sm:$0xff]  }
 0x5e2   : > { %4136 = vmatpush1.bf16.msra.mxu0 %v5684_v15  ;;  %v5709_v15 = vld [vmem:[#allocation7 + $0x3a4] ss:$8 sps:$4 sm:$0xff]  }
 0x5e3   : > { %4137 = vmatprep.subr.bf16.mxu0 %v5685_v17  ;;  %v6652_v17 = vpop.f32.mrf.mxu0 }
 0x5e4   : > { %4087 = vmatpush1.bf16.msra.mxu1 %v5686_v30  ;;  %v5710_v30 = vld [vmem:[#allocation7 + $0x2b0] ss:$8 sps:$4 sm:$0xff]  }
 0x5e5   : > { %4088 = vmatprep.subr.bf16.mxu1 %v5687_v44  ;;  %v5711_v44 = vld [vmem:[#allocation7 + $0x2a4] ss:$8 sps:$4 sm:$0xff]  }
 0x5e6   : > { %4138 = vmatpush1.bf16.msra.mxu0 %v5688_v21  ;;  %v5712_v21 = vld [vmem:[#allocation7 + $0x3a0] ss:$8 sps:$4 sm:$0xff]  }
 0x5e7   : > { %4139 = vmatprep.subr.bf16.mxu0 %v5689_v19  ;;  %v5713_v19 = vld [vmem:[#allocation7 + $0x394] ss:$8 sps:$4 sm:$0xff]  }
 0x5e8   : > { %4089 = vmatpush1.bf16.msra.mxu1 %v5690_v20  ;;  %v3967_v20 = vpop.f32.mrf.mxu0 }
 0x5e9   : > { %4090 = vmatprep.subr.bf16.mxu1 %v5691_v14  ;;  %v5714_v14 = vld [vmem:[#allocation7 + $0x2a0] ss:$8 sps:$4 sm:$0xff]  }
 0x5ea   : > { %4140 = vmatpush2.bf16.msra.mxu0 %v5692_v13  ;;  %v5715_v13 = vld [vmem:[#allocation7 + $0x294] ss:$8 sps:$4 sm:$0xff]  }
 0x5eb   : > { %4141 = vmatprep.subr.bf16.mxu0 %v5693_v12  ;;  %v4072_v12 = vpack.c.bf16 %v6650_v29, %v6650_v29  ;;  %v5724_v29 = vld [vmem:[#allocation7 + $0x570] ss:$8 sps:$4 sm:$0xff]  }
 0x5ec   : > { %4091 = vmatpush2.bf16.msra.mxu1 %v5694_v24  ;;  %v5716_v24 = vld [vmem:[#allocation7 + $0x390] ss:$8 sps:$4 sm:$0xff]  }
 0x5ed   : > { %4092 = vmatprep.subr.bf16.mxu1 %v5695_v50  ;;  %v4167_v50 = vpack.c.bf16 %v3967_v20, %v3967_v20  ;;  %v5734_v20 = vld [vmem:[#allocation7 + $0x450] ss:$8 sps:$4 sm:$0xff]  }
 0x5ee   : > { %4142 = vmatpush2.bf16.msra.mxu0 %v5696_v52  ;;  %v5717_v52 = vld [vmem:[#allocation7 + $0x384] ss:$8 sps:$4 sm:$0xff]  }
 0x5ef   : > { %4143 = vmatprep.subr.bf16.mxu0 %v5697_v18  ;;  %v5718_v18 = vld [vmem:[#allocation7 + $0x290] ss:$8 sps:$4 sm:$0xff]  }
 0x5f0   : > { %4093 = vmatpush2.bf16.msra.mxu1 %v5698_v26  ;;  %v4119_v26 = vrot.slane %v4072_v12, 2 }
 0x5f1   : > { %4094 = vmatprep.subr.bf16.mxu1 %v5699_v11  ;;  %v5719_v11 = vld [vmem:[#allocation7 + $0x284] ss:$8 sps:$4 sm:$0xff]  }
 0x5f2   : > { %4144 = vmatpush2.bf16.msra.mxu0 %v5700_v22  ;;  %v5720_v22 = vld [vmem:[#allocation7 + $0x380] ss:$8 sps:$4 sm:$0xff]  }
 0x5f3   : > { %4145 = vmatprep.subr.bf16.mxu0 %v5701_v8  ;;  %v4214_v8 = vrot.slane %v4167_v50, 2 }
 0x5f4   : > { %4095 = vmatpush2.bf16.msra.mxu1 %v5702_v9  ;;  %v5721_v9 = vld [vmem:[#allocation7 + $0x574] ss:$8 sps:$4 sm:$0xff]  }
 0x5f5   : > { %4096 = vmatprep.subr.bf16.mxu1 %v5703_v10  ;;  %v5722_v10 = vld [vmem:[#allocation7 + $0x280] ss:$8 sps:$4 sm:$0xff]  }
 0x5f6   : > { %4146 = vmatpush2.bf16.msra.mxu0 %v5704_v42  ;;  %v5723_v42 = vld [vmem:[#allocation7 + $0x474] ss:$8 sps:$4 sm:$0xff]  }
 0x5f7   : > { %4147 = vmatprep.subr.bf16.mxu0 %v5705_v57  ;;  %v5725_v57 = vld [vmem:[#allocation7 + $0x564] ss:$8 sps:$4 sm:$0xff]  }
 0x5f8   : > { %4097 = vmatpush2.bf16.msra.mxu1 %v5706_v7  ;;  %v5726_v7 = vld [vmem:[#allocation7 + $0x470] ss:$8 sps:$4 sm:$0xff]  }
 0x5f9   : > { %4098 = vmatprep.subr.bf16.mxu1 %v5707_v23  ;;  %v5727_v23 = vld [vmem:[#allocation7 + $0x464] ss:$8 sps:$4 sm:$0xff]  }
 0x5fa   : > { %4148 = vmatpush2.bf16.msra.mxu0 %v5708_v25  ;;  %v5728_v25 = vld [vmem:[#allocation7 + $0x560] ss:$8 sps:$4 sm:$0xff]  }
 0x5fb   : > { %4149 = vmatprep.subr.bf16.mxu0 %v5709_v15  ;;  %v5729_v15 = vld [vmem:[#allocation7 + $0x554] ss:$8 sps:$4 sm:$0xff]  }
 0x5fc   : > { %4099 = vmatpush2.bf16.msra.mxu1 %v5710_v30  ;;  %v5730_v30 = vld [vmem:[#allocation7 + $0x460] ss:$8 sps:$4 sm:$0xff]  }
 0x5fd   : > { %4100 = vmatprep.subr.bf16.mxu1 %v5711_v44  ;;  %v5731_v44 = vld [vmem:[#allocation7 + $0x454] ss:$8 sps:$4 sm:$0xff]  }
 0x5fe   : > { %4150 = vmatpush2.bf16.msra.mxu0 %v5712_v21  ;;  %v5732_v21 = vld [vmem:[#allocation7 + $0x550] ss:$8 sps:$4 sm:$0xff]  }
 0x5ff   : > { %4151 = vmatprep.subr.bf16.mxu0 %v5713_v19  ;;  %v5733_v19 = vld [vmem:[#allocation7 + $0x544] ss:$8 sps:$4 sm:$0xff]  }
 0x600   : > { %4101 = vmatpush2.bf16.msra.mxu1 %v5714_v14  ;;  %v5735_v14 = vld [vmem:[#allocation7 + $0x444] ss:$8 sps:$4 sm:$0xff]  }
 0x601   : > { %4102 = vmatprep.subr.bf16.mxu1 %v5715_v13  ;;  %v5736_v13 = vld [vmem:[#allocation7 + $0x540] ss:$8 sps:$4 sm:$0xff]  }
 0x602   : > { %4152 = vmatpush2.bf16.msra.mxu0 %v5716_v24  ;;  %v5738_v24 = vld [vmem:[#allocation7 + $0x440] ss:$8 sps:$4 sm:$0xff]  }
 0x603   : > { %4153 = vmatprep.subr.bf16.mxu0 %v5717_v52  ;;  %v5740_v52 = vld [vmem:[#allocation7 + $0x530] ss:$8 sps:$4 sm:$0xff]  }
 0x604   : > { %4103 = vmatpush2.bf16.msra.mxu1 %v5718_v18  ;;  %v5741_v18 = vld [vmem:[#allocation7 + $0x524] ss:$8 sps:$4 sm:$0xff]  }
 0x605   : > { %4104 = vmatprep.subr.bf16.mxu1 %v5719_v11  ;;  %v5743_v11 = vld [vmem:[#allocation7 + $0x424] ss:$8 sps:$4 sm:$0xff]  }
 0x606   : > { %4154 = vmatpush2.bf16.msra.mxu0 %v5720_v22  ;;  %v5744_v22 = vld [vmem:[#allocation7 + $0x520] ss:$8 sps:$4 sm:$0xff]  }
 0x607   : > { %4217 = vmatprep.subr.bf16.mxu0 %v5721_v9  ;;  %v5746_v9 = vld [vmem:[#allocation7 + $0x420] ss:$8 sps:$4 sm:$0xff]  }
 0x608   : > { %4105 = vmatpush2.bf16.msra.mxu1 %v5722_v10  ;;  %v5747_v10 = vld [vmem:[#allocation7 + $0x414] ss:$8 sps:$4 sm:$0xff]  }
 0x609   : > { %4168 = vmatprep.subr.bf16.mxu1 %v5723_v42  ;;  %4156 = vmatmul.mubr.bf16.vlgmr.msra.gmra.mxu0 %v4119_v26  ;;  %v5742_v26 = vld [vmem:[#allocation7 + $0x430] ss:$8 sps:$4 sm:$0xff]  }
 0x60a   : > { %4218 = vmatpush1.bf16.msra.mxu0 %v5724_v29  ;;  %4249 = vmatprep.mubr.bf16.mxu0 %v4214_v8  ;;  %v5745_v8 = vld [vmem:[#allocation7 + $0x514] ss:$8 sps:$4 sm:$0xff]   ;;  %v5748_v42 = vld [vmem:[#allocation7 + $0x510] ss:$8 sps:$4 sm:$0xff]   ;;  %v5749_v29 = vld [vmem:[#allocation7 + $0x504] ss:$8 sps:$4 sm:$0xff]  }
 0x60b   : > { %4107 = vmatmul.mubr.bf16.vlgmr.msra.gmra.mxu1 %v4072_v12  ;;  %4219 = vmatprep.subr.bf16.mxu0 %v5725_v57  ;;  %v5737_v12 = vld [vmem:[#allocation7 + $0x534] ss:$8 sps:$4 sm:$0xff]   ;;  %v5750_v57 = vld [vmem:[#allocation7 + $0x410] ss:$8 sps:$4 sm:$0xff]  }
 0x60c   : > { %4169 = vmatpush1.bf16.msra.mxu1 %v5726_v7  ;;  %4200 = vmatprep.mubr.bf16.mxu1 %v4167_v50  ;;  %v5739_v50 = vld [vmem:[#allocation7 + $0x434] ss:$8 sps:$4 sm:$0xff]   ;;  %v5751_v7 = vld [vmem:[#allocation7 + $0x404] ss:$8 sps:$4 sm:$0xff]  }
 0x60d   : > { %4170 = vmatprep.subr.bf16.mxu1 %v5727_v23  ;;  %v5752_v23 = vld [vmem:[#allocation7 + $0x500] ss:$8 sps:$4 sm:$0xff]  }
 0x60e   : > { %4220 = vmatpush1.bf16.msra.mxu0 %v5728_v25  ;;  %v5753_v25 = vld [vmem:[#allocation7 + $0x5f4] ss:$8 sps:$4 sm:$0xff]  }
 0x60f   : > { %4221 = vmatprep.subr.bf16.mxu0 %v5729_v15  ;;  %v5754_v15 = vld [vmem:[#allocation7 + $0x400] ss:$8 sps:$4 sm:$0xff]  }
 0x610   : > { %4171 = vmatpush1.bf16.msra.mxu1 %v5730_v30  ;;  %v5755_v30 = vld [vmem:[#allocation7 + $0x4f4] ss:$8 sps:$4 sm:$0xff]  }
 0x611   : > { %4172 = vmatprep.subr.bf16.mxu1 %v5731_v44  ;;  %v5756_v44 = vld [vmem:[#allocation7 + $0x5f0] ss:$8 sps:$4 sm:$0xff]  }
 0x612   : > { %4222 = vmatpush1.bf16.msra.mxu0 %v5732_v21  ;;  %v5757_v21 = vld [vmem:[#allocation7 + $0x5e4] ss:$8 sps:$4 sm:$0xff]  }
 0x613   : > { %4223 = vmatprep.subr.bf16.mxu0 %v5733_v19  ;;  %v5758_v19 = vld [vmem:[#allocation7 + $0x4f0] ss:$8 sps:$4 sm:$0xff]  }
 0x614   : > { %4173 = vmatpush1.bf16.msra.mxu1 %v5734_v20  ;;  %v5759_v20 = vld [vmem:[#allocation7 + $0x4e4] ss:$8 sps:$4 sm:$0xff]  }
 0x615   : > { %4174 = vmatprep.subr.bf16.mxu1 %v5735_v14  ;;  %v5760_v14 = vld [vmem:[#allocation7 + $0x5e0] ss:$8 sps:$4 sm:$0xff]  }
 0x616   : > { %4224 = vmatpush1.bf16.msra.mxu0 %v5736_v13  ;;  %v5761_v13 = vld [vmem:[#allocation7 + $0x5d4] ss:$8 sps:$4 sm:$0xff]  }
 0x617   : > { %4225 = vmatprep.subr.bf16.mxu0 %v5737_v12  ;;  %v5762_v12 = vld [vmem:[#allocation7 + $0x4e0] ss:$8 sps:$4 sm:$0xff]  }
 0x618   : > { %4175 = vmatpush1.bf16.msra.mxu1 %v5738_v24  ;;  %v5763_v24 = vld [vmem:[#allocation7 + $0x4d4] ss:$8 sps:$4 sm:$0xff]  }
 0x619   : > { %4176 = vmatprep.subr.bf16.mxu1 %v5739_v50  ;;  %v5764_v50 = vld [vmem:[#allocation7 + $0x5d0] ss:$8 sps:$4 sm:$0xff]  }
 0x61a   : > { %4226 = vmatpush1.bf16.msra.mxu0 %v5740_v52  ;;  %v5765_v52 = vld [vmem:[#allocation7 + $0x5c4] ss:$8 sps:$4 sm:$0xff]  }
 0x61b   : > { %4227 = vmatprep.subr.bf16.mxu0 %v5741_v18  ;;  %v5766_v18 = vld [vmem:[#allocation7 + $0x4d0] ss:$8 sps:$4 sm:$0xff]  }
 0x61c   : > { %4177 = vmatpush1.bf16.msra.mxu1 %v5742_v26  ;;  %v5767_v26 = vld [vmem:[#allocation7 + $0x4c4] ss:$8 sps:$4 sm:$0xff]  }
 0x61d   : > { %4178 = vmatprep.subr.bf16.mxu1 %v5743_v11  ;;  %v5768_v11 = vld [vmem:[#allocation7 + $0x5c0] ss:$8 sps:$4 sm:$0xff]  }
 0x61e   : > { %4228 = vmatpush1.bf16.msra.mxu0 %v5744_v22  ;;  %v5769_v22 = vld [vmem:[#allocation7 + $0x5b4] ss:$8 sps:$4 sm:$0xff]  }
 0x61f   : > { %4229 = vmatprep.subr.bf16.mxu0 %v5745_v8  ;;  %v5770_v8 = vld [vmem:[#allocation7 + $0x4c0] ss:$8 sps:$4 sm:$0xff]  }
 0x620   : > { %4179 = vmatpush1.bf16.msra.mxu1 %v5746_v9  ;;  %v5771_v9 = vld [vmem:[#allocation7 + $0x4b4] ss:$8 sps:$4 sm:$0xff]  }
 0x621   : > { %4180 = vmatprep.subr.bf16.mxu1 %v5747_v10  ;;  %v5772_v10 = vld [vmem:[#allocation7 + $0x5b0] ss:$8 sps:$4 sm:$0xff]  }
 0x622   : > { %4230 = vmatpush1.bf16.msra.mxu0 %v5748_v42  ;;  %v5773_v42 = vld [vmem:[#allocation7 + $0x5a4] ss:$8 sps:$4 sm:$0xff]  }
 0x623   : > { %4231 = vmatprep.subr.bf16.mxu0 %v5749_v29  ;;  %v6656_v29 = vpop.f32.mrf.mxu0 }
 0x624   : > { %4181 = vmatpush1.bf16.msra.mxu1 %v5750_v57  ;;  %v5774_v57 = vld [vmem:[#allocation7 + $0x4b0] ss:$8 sps:$4 sm:$0xff]  }
 0x625   : > { %4182 = vmatprep.subr.bf16.mxu1 %v5751_v7  ;;  %v5775_v7 = vld [vmem:[#allocation7 + $0x4a4] ss:$8 sps:$4 sm:$0xff]  }
 0x626   : > { %4232 = vmatpush1.bf16.msra.mxu0 %v5752_v23  ;;  %v5776_v23 = vld [vmem:[#allocation7 + $0x5a0] ss:$8 sps:$4 sm:$0xff]  }
 0x627   : > { %4233 = vmatprep.subr.bf16.mxu0 %v5753_v25  ;;  %v5777_v25 = vld [vmem:[#allocation7 + $0x594] ss:$8 sps:$4 sm:$0xff]  }
 0x628   : > { %4183 = vmatpush1.bf16.msra.mxu1 %v5754_v15  ;;  %v3973_v15 = vpop.f32.mrf.mxu0 }
 0x629   : > { %4184 = vmatprep.subr.bf16.mxu1 %v5755_v30  ;;  %v5778_v30 = vld [vmem:[#allocation7 + $0x4a0] ss:$8 sps:$4 sm:$0xff]  }
 0x62a   : > { %4234 = vmatpush2.bf16.msra.mxu0 %v5756_v44  ;;  %v5779_v44 = vld [vmem:[#allocation7 + $0x494] ss:$8 sps:$4 sm:$0xff]  }
 0x62b   : > { %4235 = vmatprep.subr.bf16.mxu0 %v5757_v21  ;;  %v4166_v21 = vpack.c.bf16 %v6652_v17, %v6652_v17  ;;  %v5788_v17 = vld [vmem:[#allocation7 + $0x770] ss:$8 sps:$4 sm:$0xff]  }
 0x62c   : > { %4185 = vmatpush2.bf16.msra.mxu1 %v5758_v19  ;;  %v5780_v19 = vld [vmem:[#allocation7 + $0x590] ss:$8 sps:$4 sm:$0xff]  }
 0x62d   : > { %4186 = vmatprep.subr.bf16.mxu1 %v5759_v20  ;;  %v4261_v20 = vpack.c.bf16 %v3973_v15, %v3973_v15  ;;  %v6940_v15 = vld [vmem:[#allocation41_spill] sm:$0xff] }
 0x62e   : > { %4236 = vmatpush2.bf16.msra.mxu0 %v5760_v14  ;;  %v5781_v14 = vld [vmem:[#allocation7 + $0x584] ss:$8 sps:$4 sm:$0xff]  }
 0x62f   : > { %4237 = vmatprep.subr.bf16.mxu0 %v5761_v13  ;;  %v5782_v13 = vld [vmem:[#allocation7 + $0x490] ss:$8 sps:$4 sm:$0xff]  }
 0x630   : > { %4187 = vmatpush2.bf16.msra.mxu1 %v5762_v12  ;;  %v4213_v12 = vrot.slane %v4166_v21, 2 }
 0x631   : > { %4188 = vmatprep.subr.bf16.mxu1 %v5763_v24  ;;  %v5783_v24 = vld [vmem:[#allocation7 + $0x484] ss:$8 sps:$4 sm:$0xff]  }
 0x632   : > { %4238 = vmatpush2.bf16.msra.mxu0 %v5764_v50  ;;  %v5784_v50 = vld [vmem:[#allocation7 + $0x580] ss:$8 sps:$4 sm:$0xff]  }
 0x633   : > { %4239 = vmatprep.subr.bf16.mxu0 %v5765_v52  ;;  %v4308_v52 = vrot.slane %v4261_v20, 2 }
 0x634   : > { %4189 = vmatpush2.bf16.msra.mxu1 %v5766_v18  ;;  %v5785_v18 = vld [vmem:[#allocation7 + $0x774] ss:$8 sps:$4 sm:$0xff]  }
 0x635   : > { %4190 = vmatprep.subr.bf16.mxu1 %v5767_v26  ;;  %v5786_v26 = vld [vmem:[#allocation7 + $0x480] ss:$8 sps:$4 sm:$0xff]  }
 0x636   : > { %4240 = vmatpush2.bf16.msra.mxu0 %v5768_v11  ;;  %v5787_v11 = vld [vmem:[#allocation7 + $0x674] ss:$8 sps:$4 sm:$0xff]  }
 0x637   : > { %4241 = vmatprep.subr.bf16.mxu0 %v5769_v22  ;;  %v5789_v22 = vld [vmem:[#allocation7 + $0x764] ss:$8 sps:$4 sm:$0xff]  }
 0x638   : > { %4191 = vmatpush2.bf16.msra.mxu1 %v5770_v8  ;;  %v5790_v8 = vld [vmem:[#allocation7 + $0x670] ss:$8 sps:$4 sm:$0xff]  }
 0x639   : > { %4192 = vmatprep.subr.bf16.mxu1 %v5771_v9  ;;  %v5791_v9 = vld [vmem:[#allocation7 + $0x664] ss:$8 sps:$4 sm:$0xff]  }
 0x63a   : > { %4242 = vmatpush2.bf16.msra.mxu0 %v5772_v10  ;;  %v5792_v10 = vld [vmem:[#allocation7 + $0x760] ss:$8 sps:$4 sm:$0xff]  }
 0x63b   : > { %4243 = vmatprep.subr.bf16.mxu0 %v5773_v42  ;;  %v5793_v42 = vld [vmem:[#allocation7 + $0x754] ss:$8 sps:$4 sm:$0xff]  }
 0x63c   : > { %4193 = vmatpush2.bf16.msra.mxu1 %v5774_v57  ;;  %v6936_v57 = vld [vmem:[#allocation37_spill] sm:$0xff] }
 0x63d   : > { %4194 = vmatprep.subr.bf16.mxu1 %v5775_v7  ;;  %v6937_v7 = vld [vmem:[#allocation38_spill] sm:$0xff] }
 0x63e   : > { %4244 = vmatpush2.bf16.msra.mxu0 %v5776_v23  ;;  %v6938_v23 = vld [vmem:[#allocation39_spill] sm:$0xff] }
 0x63f   : > { %4245 = vmatprep.subr.bf16.mxu0 %v5777_v25  ;;  %v6939_v25 = vld [vmem:[#allocation40_spill] sm:$0xff] }
 0x640   : > { %4195 = vmatpush2.bf16.msra.mxu1 %v5778_v30  ;;  %v6941_v30 = vld [vmem:[#allocation42_spill] sm:$0xff] }
 0x641   : > { %4196 = vmatprep.subr.bf16.mxu1 %v5779_v44  ;;  %v6942_v44 = vld [vmem:[#allocation43_spill] sm:$0xff] }
 0x642   : > { %4246 = vmatpush2.bf16.msra.mxu0 %v5780_v19  ;;  %v6944_v19 = vld [vmem:[#allocation45_spill] sm:$0xff] }
 0x643   : > { %4247 = vmatprep.subr.bf16.mxu0 %v5781_v14  ;;  %v6946_v14 = vld [vmem:[#allocation47_spill] sm:$0xff] }
 0x644   : > { %4197 = vmatpush2.bf16.msra.mxu1 %v5782_v13  ;;  %v6947_v13 = vld [vmem:[#allocation48_spill] sm:$0xff] }
 0x645   : > { %4198 = vmatprep.subr.bf16.mxu1 %v5783_v24  ;;  %v6949_v24 = vld [vmem:[#allocation50_spill] sm:$0xff] }
 0x646   : > { %4248 = vmatpush2.bf16.msra.mxu0 %v5784_v50  ;;  %v6950_v50 = vld [vmem:[#allocation51_spill] sm:$0xff] }
 0x647   : > { %4311 = vmatprep.subr.bf16.mxu0 %v5785_v18  ;;  %v6952_v18 = vld [vmem:[#allocation53_spill] sm:$0xff] }
 0x648   : > { %4199 = vmatpush2.bf16.msra.mxu1 %v5786_v26  ;;  %v6953_v26 = vld [vmem:[#allocation54_spill] sm:$0xff] }
 0x649   : > { %4262 = vmatprep.subr.bf16.mxu1 %v5787_v11  ;;  %4250 = vmatmul.mubr.bf16.vlgmr.msra.gmra.mxu0 %v4213_v12  ;;  %v6948_v12 = vld [vmem:[#allocation49_spill] sm:$0xff]  ;;  %v6954_v11 = vld [vmem:[#allocation55_spill] sm:$0xff] }
 0x64a   : > { %4312 = vmatpush1.bf16.msra.mxu0 %v5788_v17  ;;  %4343 = vmatprep.mubr.bf16.mxu0 %v4308_v52  ;;  %v6951_v52 = vld [vmem:[#allocation52_spill] sm:$0xff] }
 0x64b   : > { %4201 = vmatmul.mubr.bf16.vlgmr.msra.gmra.mxu1 %v4166_v21  ;;  %4313 = vmatprep.subr.bf16.mxu0 %v5789_v22  ;;  %v6943_v21 = vld [vmem:[#allocation44_spill] sm:$0xff]  ;;  %v6956_v22 = vld [vmem:[#allocation57_spill] sm:$0xff] }
 0x64c   : > { %4263 = vmatpush1.bf16.msra.mxu1 %v5790_v8  ;;  %4294 = vmatprep.mubr.bf16.mxu1 %v4261_v20  ;;  %v6945_v20 = vld [vmem:[#allocation46_spill] sm:$0xff]  ;;  %v6955_v17 = vld [vmem:[#allocation56_spill] sm:$0xff] }
 0x64d   : > { %4264 = vmatprep.subr.bf16.mxu1 %v5791_v9  ;;  %v6957_v8 = vld [vmem:[#allocation58_spill] sm:$0xff]  ;;  %v6958_v9 = vld [vmem:[#allocation59_spill] sm:$0xff] }
 0x64e   : > { %4314 = vmatpush1.bf16.msra.mxu0 %v5792_v10  ;;  %v6959_v10 = vld [vmem:[#allocation60_spill] sm:$0xff] }
 0x64f   : > { %4315 = vmatprep.subr.bf16.mxu0 %v5793_v42  ;;  %v6960_v42 = vld [vmem:[#allocation61_spill] sm:$0xff] }
 0x650   : > { %4265 = vmatpush1.bf16.msra.mxu1 %v6339_v27  ;;  %v6912_v27 = vld [vmem:[#allocation13_spill] sm:$0xff] }
 0x651   : > { %4266 = vmatprep.subr.bf16.mxu1 %v6341_v28  ;;  %v6913_v28 = vld [vmem:[#allocation14_spill] sm:$0xff] }
 0x652   : > { %4316 = vmatpush1.bf16.msra.mxu0 %v6343_v31  ;;  %v6914_v31 = vld [vmem:[#allocation15_spill] sm:$0xff] }
 0x653   : > { %4317 = vmatprep.subr.bf16.mxu0 %v6345_v32  ;;  %v6915_v32 = vld [vmem:[#allocation16_spill] sm:$0xff] }
 0x654   : > { %4267 = vmatpush1.bf16.msra.mxu1 %v6348_v33  ;;  %v6916_v33 = vld [vmem:[#allocation17_spill] sm:$0xff] }
 0x655   : > { %4268 = vmatprep.subr.bf16.mxu1 %v6351_v34  ;;  %v6917_v34 = vld [vmem:[#allocation18_spill] sm:$0xff] }
 0x656   : > { %4318 = vmatpush1.bf16.msra.mxu0 %v6354_v35  ;;  %v6918_v35 = vld [vmem:[#allocation19_spill] sm:$0xff] }
 0x657   : > { %4319 = vmatprep.subr.bf16.mxu0 %v6357_v36  ;;  %v6919_v36 = vld [vmem:[#allocation20_spill] sm:$0xff] }
 0x658   : > { %4269 = vmatpush1.bf16.msra.mxu1 %v6360_v37  ;;  %v6920_v37 = vld [vmem:[#allocation21_spill] sm:$0xff] }
 0x659   : > { %4270 = vmatprep.subr.bf16.mxu1 %v6363_v38  ;;  %v6921_v38 = vld [vmem:[#allocation22_spill] sm:$0xff] }
 0x65a   : > { %4320 = vmatpush1.bf16.msra.mxu0 %v6366_v39  ;;  %v6922_v39 = vld [vmem:[#allocation23_spill] sm:$0xff] }
 0x65b   : > { %4321 = vmatprep.subr.bf16.mxu0 %v6369_v41  ;;  %v4260_v41 = vpack.c.bf16 %v6656_v29, %v6656_v29  ;;  %v6935_v29 = vld [vmem:[#allocation36_spill] sm:$0xff] }
 0x65c   : > { %4271 = vmatpush1.bf16.msra.mxu1 %v6372_v40  ;;  %v6923_v40 = vld [vmem:[#allocation24_spill] sm:$0xff] }
 0x65d   : > { %4272 = vmatprep.subr.bf16.mxu1 %v6375_v43  ;;  %v3977_v43 = vpop.f32.mrf.mxu0 }
 0x65e   : > { %4322 = vmatpush1.bf16.msra.mxu0 %v6378_v45  ;;  %v6924_v45 = vld [vmem:[#allocation25_spill] sm:$0xff] }
 0x65f   : > { %4323 = vmatprep.subr.bf16.mxu0 %v6381_v46  ;;  %v6925_v46 = vld [vmem:[#allocation26_spill] sm:$0xff] }
 0x660   : > { %4273 = vmatpush1.bf16.msra.mxu1 %v6384_v47  ;;  %v6926_v47 = vld [vmem:[#allocation27_spill] sm:$0xff] }
 0x661   : > { %4274 = vmatprep.subr.bf16.mxu1 %v6387_v48  ;;  %v4307_v48 = vrot.slane %v4260_v41, 2 }
 0x662   : > { %4324 = vmatpush1.bf16.msra.mxu0 %v6390_v49  ;;  %v6927_v49 = vld [vmem:[#allocation28_spill] sm:$0xff] }
 0x663   : > { %4325 = vmatprep.subr.bf16.mxu0 %v6393_v51  ;;  %v3979_v51 = vpop.f32.mrf.mxu0 }
 0x664   : > { %4275 = vmatpush1.bf16.msra.mxu1 %v6396_v53  ;;  %v6928_v53 = vld [vmem:[#allocation29_spill] sm:$0xff] }
 0x665   : > { %4276 = vmatprep.subr.bf16.mxu1 %v6399_v54  ;;  %v4355_v54 = vpack.c.bf16 %v3979_v51, %v3979_v51 }
 0x666   : > { %4326 = vmatpush1.bf16.msra.mxu0 %v6402_v55  ;;  %v6929_v55 = vld [vmem:[#allocation30_spill] sm:$0xff] }
 0x667   : > { %4327 = vmatprep.subr.bf16.mxu0 %v6405_v56 }
 0x668   : > { %4277 = vmatpush1.bf16.msra.mxu1 %v6408_v58  ;;  %v6930_v58 = vld [vmem:[#allocation31_spill] sm:$0xff] }
 0x669   : > { %4278 = vmatprep.subr.bf16.mxu1 %v6411_v59 }
 0x66a   : > { %4328 = vmatpush2.bf16.msra.mxu0 %v6414_v60 }
 0x66b   : > { %4329 = vmatprep.subr.bf16.mxu0 %v6417_v61 }
 0x66c   : > { %4279 = vmatpush2.bf16.msra.mxu1 %v6420_v62  ;;  %v6931_v62 = vld [vmem:[#allocation32_spill] sm:$0xff] }
 0x66d   : > { %4280 = vmatprep.subr.bf16.mxu1 %v6423_v63 }
 0x66e   : > { %4330 = vmatpush2.bf16.msra.mxu0 %v6426_v0 }
 0x66f   : > { %4331 = vmatprep.subr.bf16.mxu0 %v6429_v1  ;;  %v6932_v1 = vld [vmem:[#allocation33_spill] sm:$0xff] }
 0x670   : > { %4281 = vmatpush2.bf16.msra.mxu1 %v6432_v2 }
 0x671   : > { %4282 = vmatprep.subr.bf16.mxu1 %v6435_v3 }
 0x672   : > { %4332 = vmatpush2.bf16.msra.mxu0 %v6438_v4 }
 0x673   : > { %4333 = vmatprep.subr.bf16.mxu0 %v6441_v5  ;;  %v6933_v5 = vld [vmem:[#allocation34_spill] sm:$0xff] }
 0x674   : > { %4283 = vmatpush2.bf16.msra.mxu1 %v6444_v6 }
 0x675   : > { %4284 = vmatprep.subr.bf16.mxu1 %v6447_v16  ;;  %v6934_v16 = vld [vmem:[#allocation35_spill] sm:$0xff] }
 0x676   : > { %4334 = vmatpush2.bf16.msra.mxu0 %v6912_v27  ;;  %v6961_v27 = vld [vmem:[#allocation62_spill] sm:$0xff] }
 0x677   : > { %4335 = vmatprep.subr.bf16.mxu0 %v6913_v28  ;;  %v4354_v28 = vpack.c.bf16 %v3977_v43, %v3977_v43 }
 0x678   : > { %4285 = vmatpush2.bf16.msra.mxu1 %v6914_v31 }
 0x679   : > { %4286 = vmatprep.subr.bf16.mxu1 %v6915_v32 }
 0x67a   : > { %4336 = vmatpush2.bf16.msra.mxu0 %v6916_v33 }
 0x67b   : > { %4337 = vmatprep.subr.bf16.mxu0 %v6917_v34 }
 0x67c   : > { %4287 = vmatpush2.bf16.msra.mxu1 %v6918_v35 }
 0x67d   : > { %4288 = vmatprep.subr.bf16.mxu1 %v6919_v36 }
 0x67e   : > { %4338 = vmatpush2.bf16.msra.mxu0 %v6920_v37 }
 0x67f   : > { %4339 = vmatprep.subr.bf16.mxu0 %v6921_v38 }
 0x680   : > { %4289 = vmatpush2.bf16.msra.mxu1 %v6922_v39 }
 0x681   : > { %4290 = vmatprep.subr.bf16.mxu1 %v6923_v40 }
 0x682   : > { %4340 = vmatpush2.bf16.msra.mxu0 %v6924_v45 }
 0x683   : > { %4341 = vmatprep.subr.bf16.mxu0 %v6925_v46 }
 0x684   : > { %4291 = vmatpush2.bf16.msra.mxu1 %v6926_v47 }
 0x685   : > { %4292 = vmatprep.subr.bf16.mxu1 %v6927_v49 }
 0x686   : > { %4342 = vmatpush2.bf16.msra.mxu0 %v6928_v53 }
 0x688   : > { %4293 = vmatpush2.bf16.msra.mxu1 %v6929_v55 }
 0x689   : > { %v4065_v56 = vpop.f32.mrf.mxu0  ;;  %4356 = vmatprep.subr.bf16.mxu1 %v6930_v58  ;;  %4344 = vmatmul.mubr.bf16.vlgmr.msra.gmra.mxu0 %v4307_v48 }
 0x68b   : > { %4295 = vmatmul.mubr.bf16.vlgmr.msra.gmra.mxu1 %v4260_v41  ;;  %v4024_v59 = vpop.f32.mrf.mxu1  ;;  %v4067_v60 = vpop.f32.mrf.mxu0 }
 0x68c   : > { %v4066_v61 = vadd.f32 %v4065_v56, %v4024_v59  ;;  %4357 = vmatpush1.bf16.msra.mxu1 %v6931_v62  ;;  %4388 = vmatprep.mubr.bf16.mxu1 %v4355_v54 }
 0x68d   : > { %v4026_v63 = vpop.f32.mrf.mxu1  ;;  %v4069_v0 = vpop.f32.mrf.mxu0  ;;  %4358 = vmatprep.subr.bf16.mxu1 %v6932_v1 }
 0x68e   : > { %v4068_v2 = vadd.f32 %v4067_v60, %v4026_v63 }
 0x68f   : > { %v4028_v3 = vpop.f32.mrf.mxu1  ;;  %v4070_v4 = vpop.f32.mrf.mxu0 }
 0x690   : > { %4359 = vmatpush1.bf16.msra.mxu1 %v6933_v5 }
 0x691   : > { %v4029_v6 = vpop.f32.mrf.mxu1  ;;  %4360 = vmatprep.subr.bf16.mxu1 %v6934_v16 }
 0x694   : > { %4361 = vmatpush1.bf16.msra.mxu1 %v6935_v29 }
 0x695   : > { %4362 = vmatprep.subr.bf16.mxu1 %v6936_v57 }
 0x698   : > { %4363 = vmatpush1.bf16.msra.mxu1 %v6937_v7  ;;  %v4403_v7 = vpop.permute.xlu1 %4402 }
 0x699   : > { %4364 = vmatprep.subr.bf16.mxu1 %v6938_v23 }
 0x69c   : > { %4365 = vmatpush1.bf16.msra.mxu1 %v6939_v25 }
 0x69d   : > { %4366 = vmatprep.subr.bf16.mxu1 %v6940_v15 }
 0x6a0   : > { %4367 = vmatpush1.bf16.msra.mxu1 %v6941_v30 }
 0x6a1   : > { %4368 = vmatprep.subr.bf16.mxu1 %v6942_v44 }
 0x6a4   : > { %4369 = vmatpush1.bf16.msra.mxu1 %v6943_v21 }
 0x6a5   : > { %4370 = vmatprep.subr.bf16.mxu1 %v6944_v19 }
 0x6a8   : > { %4371 = vmatpush1.bf16.msra.mxu1 %v6945_v20 }
 0x6a9   : > { %4372 = vmatprep.subr.bf16.mxu1 %v6946_v14 }
 0x6ac   : > { %4373 = vmatpush2.bf16.msra.mxu1 %v6947_v13 }
 0x6ad   : > { %4374 = vmatprep.subr.bf16.mxu1 %v6948_v12 }
 0x6b0   : > { %4375 = vmatpush2.bf16.msra.mxu1 %v6949_v24 }
 0x6b1   : > { %4376 = vmatprep.subr.bf16.mxu1 %v6950_v50 }
 0x6b4   : > { %4377 = vmatpush2.bf16.msra.mxu1 %v6951_v52 }
 0x6b5   : > { %4378 = vmatprep.subr.bf16.mxu1 %v6952_v18 }
 0x6b8   : > { %4379 = vmatpush2.bf16.msra.mxu1 %v6953_v26 }
 0x6b9   : > { %4380 = vmatprep.subr.bf16.mxu1 %v6954_v11 }
 0x6bc   : > { %4381 = vmatpush2.bf16.msra.mxu1 %v6955_v17 }
 0x6bd   : > { %4382 = vmatprep.subr.bf16.mxu1 %v6956_v22 }
 0x6c0   : > { %4383 = vmatpush2.bf16.msra.mxu1 %v6957_v8 }
 0x6c1   : > { %4384 = vmatprep.subr.bf16.mxu1 %v6958_v9 }
 0x6c4   : > { %4385 = vmatpush2.bf16.msra.mxu1 %v6959_v10 }
 0x6c5   : > { %4386 = vmatprep.subr.bf16.mxu1 %v6960_v42 }
 0x6c8   : > { %4387 = vmatpush2.bf16.msra.mxu1 %v6961_v27 }
 0x6c9   : > { %v4157_v31 = vpop.f32.mrf.mxu0 }
 0x6cb   : > { %v4108_v32 = vpop.f32.mrf.mxu1  ;;  %4389 = vmatmul.mubr.bf16.vlgmr.msra.gmra.mxu1 %v4354_v28  ;;  %v4159_v33 = vpop.f32.mrf.mxu0 }
 0x6cc   : > { %v4115_v34 = vadd.f32 %v4108_v32, %v4066_v61 }
 0x6cd   : > { %v4110_v35 = vpop.f32.mrf.mxu1  ;;  %v4161_v36 = vpop.f32.mrf.mxu0 }
 0x6ce   : > { %v4164_v37 = vadd.f32 %v4157_v31, %v4115_v34  ;;  %v4116_v38 = vadd.f32 %v4110_v35, %v4068_v2 }
 0x6cf   : > { %v4112_v39 = vpop.f32.mrf.mxu1  ;;  %v4162_v41 = vpop.f32.mrf.mxu0 }
 0x6d0   : > { %v4165_v40 = vadd.f32 %v4159_v33, %v4116_v38 }
 0x6d1   : > { %v4113_v45 = vpop.f32.mrf.mxu1 }
 0x709   : > { %v4251_v46 = vpop.f32.mrf.mxu0 }
 0x70b   : > { %v4202_v47 = vpop.f32.mrf.mxu1  ;;  %v4253_v48 = vpop.f32.mrf.mxu0 }
 0x70c   : > { %v4209_v49 = vadd.f32 %v4202_v47, %v4164_v37 }
 0x70d   : > { %v4204_v51 = vpop.f32.mrf.mxu1  ;;  %v4255_v53 = vpop.f32.mrf.mxu0 }
 0x70e   : > { %v4258_v43 = vadd.f32 %v4251_v46, %v4209_v49  ;;  %v4210_v54 = vadd.f32 %v4204_v51, %v4165_v40 }
 0x70f   : > { %v4206_v55 = vpop.f32.mrf.mxu1  ;;  %v4256_v56 = vpop.f32.mrf.mxu0 }
 0x710   : > { %v4259_v58 = vadd.f32 %v4253_v48, %v4210_v54 }
 0x711   : > { %v4207_v59 = vpop.f32.mrf.mxu1 }
 0x749   : > { %v4345_v60 = vpop.f32.mrf.mxu0 }
 0x74b   : > { %v4296_v61 = vpop.f32.mrf.mxu1  ;;  %v4347_v62 = vpop.f32.mrf.mxu0 }
 0x74c   : > { %v4303_v63 = vadd.f32 %v4296_v61, %v4258_v43 }
 0x74d   : > { %v4298_v0 = vpop.f32.mrf.mxu1  ;;  %v4349_v1 = vpop.f32.mrf.mxu0 }
 0x74e   : > { %v4352_v2 = vadd.f32 %v4345_v60, %v4303_v63  ;;  %v4304_v3 = vadd.f32 %v4298_v0, %v4259_v58 }
 0x74f   : > { %v4300_v4 = vpop.f32.mrf.mxu1  ;;  %v4350_v5 = vpop.f32.mrf.mxu0 }
 0x750   : > { %v4353_v6 = vadd.f32 %v4347_v62, %v4304_v3 }
 0x751   : > { %v4301_v16 = vpop.f32.mrf.mxu1 }
 0x78b   : > { %v4390_v29 = vpop.f32.mrf.mxu1 }
 0x78c   : > { %v4397_v57 = vadd.f32 %v4390_v29, %v4352_v2 }
 0x78d   : > { %v4392_v23 = vpop.f32.mrf.mxu1 }
 0x78e   : > { %v4405_v25 = vadd.f32 %v4403_v7, %v4397_v57  ;;  %v4398_v15 = vadd.f32 %v4392_v23, %v4353_v6 }
 0x78f   : > { %v4394_v30 = vpop.f32.mrf.mxu1 }
 0x790   : > { %v4406_v44 = vadd.f32 %v4403_v7, %v4398_v15  ;;  %v4407_v19 = vmax.f32 %v4405_v25, 0.0 }
 0x791   : > { %v4395_v21 = vpop.f32.mrf.mxu1 }
 0x792   : > { %v4408_v20 = vmax.f32 %v4406_v44, 0.0 }
 0x794   : > { %v4411_v14 = vcombine.low %v4407_v19, %v4408_v20 }
 0x796   : > { %4413 = vst [vmem:[%s601_s29] sm:$0xff] %v4411_v14 }
 0x797 PF: > { %p27_p2 = scmp.ge.s32.totalorder %s6146_s30, 4   ;;  %s6963_s18 = smov %s5960_s19 }
 0x798   : > { %s6964_s19 = smov %s5964_s20  ;;  %s6965_s20 = smov %s6158_s22 }
 0x799   : > { %s6966_s21 = smov %s6146_s30  ;;  %29 = sbr.rel (!%p27_p2) target bundleno = 12 (0xc), region = 153 }
 0x79e   :  { %4435 = vsyncpa [#allocation3], 1 }
 0x79f   :  { %4437 = vsyncpa [#allocation3 + $0x1], 1 }
 0x7a0   :  { %4438 = vsyncpa [#allocation5], 1 }
 0x7a1   :  { %4439 = vsyncpa [#allocation8], 1 }

</bundles_post_ra>
